<compile_context>
chip_gen: v6e
topology: v6e:2x2x1
jax: 0.10.0
libtpu: 0.0.40
codegen_flags: <defaults>
</compile_context>

<pallas_src>
import functools

import jax
import jax.numpy as jnp
from jax.experimental import pallas as pl
from jax.experimental.pallas import tpu as pltpu


# ----------------------------- Pallas kernel --------------------------------
def _fused_matmul_kernel(act, has_skip, *refs):
    """out = act(w @ patches + b) [+ skip] ; lane-dense (Cout, R) tiles."""
    if has_skip:
        w_ref, x_ref, b_ref, s_ref, o_ref = refs
    else:
        w_ref, x_ref, b_ref, o_ref = refs
        s_ref = None
    acc = jnp.dot(w_ref[...], x_ref[...],
                  preferred_element_type=jnp.float32)   # (Co, Rt) f32 on MXU
    acc = acc + b_ref[...]                              # (Co, 1) broadcast
    if act == "relu":
        acc = jnp.maximum(acc, 0.0)
    elif act == "sigmoid":
        acc = jax.nn.sigmoid(acc)
    if s_ref is not None:
        acc = acc + s_ref[...]          # post-activation skip (PyTorch order)
    o_ref[...] = acc.astype(o_ref.dtype)


def fused_matmul(wmat, patches, bias, skip=None, act="relu", r_tile=256):
    """wmat (Co,K) bf16, patches (K,R) bf16, bias (Co,1) f32, skip (Co,R) f32."""
    Co, K = wmat.shape
    R = patches.shape[1]
    if R % 128 == 0:                      # tile lanes when divisible by 128
        Rt = min(R, r_tile)
        while R % Rt:
            Rt -= 128
    else:                                 # small / ragged R -> one full block
        Rt = R
    grid = (R // Rt,)

    in_specs = [
        pl.BlockSpec((Co, K), lambda r: (0, 0)),     # weights: resident
        pl.BlockSpec((K, Rt), lambda r: (0, r)),     # patches: tiled over R
        pl.BlockSpec((Co, 1), lambda r: (0, 0)),     # bias: resident
    ]
    inputs = [wmat, patches, bias]
    if skip is not None:
        in_specs.append(pl.BlockSpec((Co, Rt), lambda r: (0, r)))
        inputs.append(skip)

    kernel = functools.partial(_fused_matmul_kernel, act, skip is not None)
    return pl.pallas_call(
        kernel,
        out_shape=jax.ShapeDtypeStruct((Co, R), jnp.float32),
        grid=grid,
        in_specs=in_specs,
        out_specs=pl.BlockSpec((Co, Rt), lambda r: (0, r)),
        compiler_params=pltpu.CompilerParams(
            dimension_semantics=("parallel",)),
    )(*inputs)


# ------------------------------ layer glue -----------------------------------
def _im2col_cnhw(xpad, kh, kw, stride, Ho, Wo):
    """xpad (Cin, N, Hp, Wp) -> patches (Cin*kh*kw, N*Ho*Wo), K order (Cin,i,j)."""
    Cin, N = xpad.shape[0], xpad.shape[1]
    cols = [xpad[:, :, i:i + stride * Ho:stride, j:j + stride * Wo:stride]
            for i in range(kh) for j in range(kw)]      # each (Cin, N, Ho, Wo)
    p = jnp.stack(cols, axis=1)                         # (Cin, kh*kw, N, Ho, Wo)
    return p.reshape(Cin * kh * kw, N * Ho * Wo)


def conv2d_s2(x, w, b, act="relu"):
    """Conv2d(k=3, s=2, p=1). x (Cin,N,H,W), w (Cout,Cin,3,3) -> (Cout,N,Ho,Wo)."""
    Cin, N, H, W = x.shape
    Cout = w.shape[0]
    Ho, Wo = (H + 2 - 3) // 2 + 1, (W + 2 - 3) // 2 + 1
    xp = jnp.pad(x, ((0, 0), (0, 0), (1, 1), (1, 1)))
    patches = _im2col_cnhw(xp, 3, 3, 2, Ho, Wo).astype(jnp.bfloat16)
    wmat = w.reshape(Cout, Cin * 9).astype(jnp.bfloat16)
    bmat = b.reshape(Cout, 1).astype(jnp.float32)
    out = fused_matmul(wmat, patches, bmat, None, act)   # (Cout, N*Ho*Wo)
    return out.reshape(Cout, N, Ho, Wo)


def _convT_phase_weight(w):
    """PyTorch ConvTranspose2d weight (Cin,Cout,4,4) -> (4*Cout, Cin*9).

    Phase (py,px) of the stride-2 transposed conv only touches the 2x2 input
    taps dy in {py-1,py}, dx in {px-1,px}; the corresponding original-kernel
    index is ky = 1 - 2*dy + py (same for x).  Taps are laid out on the shared
    3x3 neighborhood (dy+1, dx+1); unused taps stay zero."""
    Cin, Cout = w.shape[0], w.shape[1]
    wp = jnp.zeros((2, 2, Cout, Cin, 3, 3), w.dtype)
    for py in range(2):
        for px in range(2):
            for dy in (py - 1, py):
                for dx in (px - 1, px):
                    ky = 1 - 2 * dy + py
                    kx = 1 - 2 * dx + px
                    wp = wp.at[py, px, :, :, dy + 1, dx + 1].set(
                        jnp.transpose(w[:, :, ky, kx]))      # (Cout, Cin)
    return wp.reshape(4 * Cout, Cin * 9)


def conv_transpose2d_s2(x, w, b, skip=None, act="relu"):
    """ConvTranspose2d(k=4, s=2, p=1). x (Cin,N,H,W), w (Cin,Cout,4,4).

    Four output phases computed in one lane-dense matmul over shared 3x3
    patches of the (un-dilated) input; output rows are (phase, Cout)."""
    Cin, N, H, W = x.shape
    Cout = w.shape[1]
    xp = jnp.pad(x, ((0, 0), (0, 0), (1, 1), (1, 1)))
    patches = _im2col_cnhw(xp, 3, 3, 1, H, W).astype(jnp.bfloat16)  # (Cin*9, R)
    wmat = _convT_phase_weight(w).astype(jnp.bfloat16)              # (4Cout, Cin*9)
    bmat = jnp.tile(b.reshape(1, Cout), (4, 1)).reshape(4 * Cout, 1)
    bmat = bmat.astype(jnp.float32)
    smat = None
    if skip is not None:   # skip (Cout, N, 2H, 2W) -> phase layout (4Cout, N*H*W)
        smat = skip.reshape(Cout, N, H, 2, W, 2).transpose(3, 5, 0, 1, 2, 4)
        smat = smat.reshape(4 * Cout, N * H * W)
    out = fused_matmul(wmat, patches, bmat, smat, act)              # (4Cout, R)
    out = out.reshape(2, 2, Cout, N, H, W).transpose(2, 3, 4, 0, 5, 1)
    return out.reshape(Cout, N, 2 * H, 2 * W)


# ------------------------------ parameters -----------------------------------
def _init_conv(key, cout, cin, k):
    kw_, kb_ = jax.random.split(key)
    bound = 1.0 / jnp.sqrt(cin * k * k)
    w = jax.random.uniform(kw_, (cout, cin, k, k), jnp.float32, -bound, bound)
    b = jax.random.uniform(kb_, (cout,), jnp.float32, -bound, bound)
    return w, b


def _init_convT(key, cin, cout, k):
    kw_, kb_ = jax.random.split(key)
    bound = 1.0 / jnp.sqrt(cout * k * k)      # PyTorch: fan_in = weight.size(1)*k*k
    w = jax.random.uniform(kw_, (cin, cout, k, k), jnp.float32, -bound, bound)
    b = jax.random.uniform(kb_, (cout,), jnp.float32, -bound, bound)
    return w, b


def init_params(key):
    ks = jax.random.split(key, 8)
    return {
        "enc1": _init_conv(ks[0], 8, 1, 3),
        "enc2": _init_conv(ks[1], 16, 8, 3),
        "enc3": _init_conv(ks[2], 32, 16, 3),
        "enc4": _init_conv(ks[3], 64, 32, 3),
        "dec1": _init_convT(ks[4], 64, 32, 4),
        "dec2": _init_convT(ks[5], 32, 16, 4),
        "dec3": _init_convT(ks[6], 16, 8, 4),
        "dec4": _init_convT(ks[7], 8, 1, 4),
    }


# ------------------------------- forward -------------------------------------
def net_forward(params, x_nchw):
    x = jnp.transpose(x_nchw, (1, 0, 2, 3))          # internal (C, N, H, W)
    e1 = conv2d_s2(x, *params["enc1"])
    e2 = conv2d_s2(e1, *params["enc2"])
    e3 = conv2d_s2(e2, *params["enc3"])
    e4 = conv2d_s2(e3, *params["enc4"])
    d1 = conv_transpose2d_s2(e4, *params["dec1"], skip=e3, act="relu")
    d2 = conv_transpose2d_s2(d1, *params["dec2"], skip=e2, act="relu")
    d3 = conv_transpose2d_s2(d2, *params["dec3"], skip=e1, act="relu")
    d4 = conv_transpose2d_s2(d3, *params["dec4"], skip=None, act="sigmoid")
    return jnp.transpose(d4, (1, 0, 2, 3))           # back to NCHW


# ---------------------- pure-XLA f32 reference (checking) --------------------
def _conv_ref(x, w, b):
    y = jax.lax.conv_general_dilated(
        x, w, window_strides=(2, 2), padding=((1, 1), (1, 1)),
        dimension_numbers=("NCHW", "OIHW", "NCHW"))
    return y + b.reshape(1, -1, 1, 1)


def _convT_ref(x, w, b):
    wt = jnp.flip(w, axis=(2, 3)).transpose(1, 0, 2, 3)      # (Cout,Cin,4,4)
    y = jax.lax.conv_general_dilated(
        x, wt, window_strides=(1, 1), padding=((2, 2), (2, 2)),
        lhs_dilation=(2, 2), dimension_numbers=("NCHW", "OIHW", "NCHW"))
    return y + b.reshape(1, -1, 1, 1)


def net_forward_reference(params, x):
    e1 = jax.nn.relu(_conv_ref(x, *params["enc1"]))
    e2 = jax.nn.relu(_conv_ref(e1, *params["enc2"]))
    e3 = jax.nn.relu(_conv_ref(e2, *params["enc3"]))
    e4 = jax.nn.relu(_conv_ref(e3, *params["enc4"]))
    d1 = jax.nn.relu(_convT_ref(e4, *params["dec1"])) + e3
    d2 = jax.nn.relu(_convT_ref(d1, *params["dec2"])) + e2
    d3 = jax.nn.relu(_convT_ref(d2, *params["dec3"])) + e1
    return jax.nn.sigmoid(_convT_ref(d3, *params["dec4"]))


if __name__ == "__main__":
    key = jax.random.PRNGKey(0)
    pkey, xkey = jax.random.split(key)
    params = init_params(pkey)
    x = jax.random.normal(xkey, (2, 1, 32, 32), jnp.float32)   # NCHW

    out = jax.jit(net_forward)(params, x)
    out = jax.block_until_ready(out)

    assert out.shape == (2, 1, 32, 32)
    assert bool(jnp.all(jnp.isfinite(out)))
    assert bool(jnp.all((out >= 0.0) & (out <= 1.0)))          # sigmoid range

    # Correctness vs. pure-XLA f32 reference (loose tol: MXU operands are bf16).
    ref = jax.jit(net_forward_reference)(params, x)
    ref = jax.block_until_ready(ref)
    max_err = float(jnp.max(jnp.abs(out - ref)))
    assert max_err < 2e-2, f"max abs err vs reference: {max_err}"

    print("KERNEL_OK")
</pallas_src>

<mosaic_0001>
module attributes {stable_mosaic.version = 11 : i64} {
  func.func @_fused_matmul_kernel(%arg0: i32, %arg1: memref<8x9xbf16, #tpu.memory_space<vmem>>, %arg2: memref<9x256xbf16, #tpu.memory_space<vmem>>, %arg3: memref<8x1xf32, #tpu.memory_space<vmem>>, %arg4: memref<8x256xf32, #tpu.memory_space<vmem>>) attributes {dimension_semantics = [#tpu.dimension_semantics<parallel>], iteration_bounds = array<i64: 2>, scalar_prefetch = 0 : i64, scratch_operands = 0 : i64, tpu.core_type = #tpu.core_type<tc>, window_params = [{pipeline_mode = #tpu.pipeline_mode<synchronous>, transform_indices = @transform_0, window_bounds = array<i64: 8, 9>}, {transform_indices = @transform_1, window_bounds = array<i64: 9, 256>}, {pipeline_mode = #tpu.pipeline_mode<synchronous>, transform_indices = @transform_2, window_bounds = array<i64: 8, 1>}, {transform_indices = @transform_3, window_bounds = array<i64: 8, 256>}]} {
    %c0 = arith.constant 0 : index
    %c0_0 = arith.constant 0 : index
    %0 = vector.load %arg1[%c0, %c0_0] : memref<8x9xbf16, #tpu.memory_space<vmem>>, vector<8x9xbf16>
    %c0_1 = arith.constant 0 : index
    %c0_2 = arith.constant 0 : index
    %1 = vector.load %arg2[%c0_1, %c0_2] : memref<9x256xbf16, #tpu.memory_space<vmem>>, vector<9x256xbf16>
    %cst = arith.constant dense<0.000000e+00> : vector<8x256xf32>
    %2 = tpu.matmul %0, %1, %cst {dimension_numbers = #tpu.dot_dimension_numbers<[1], [0], [0], [1], [0, 0, 1, 1], [], []>} : vector<8x9xbf16>, vector<9x256xbf16>, vector<8x256xf32> -> vector<8x256xf32>
    %c0_3 = arith.constant 0 : index
    %c0_4 = arith.constant 0 : index
    %3 = vector.load %arg3[%c0_3, %c0_4] : memref<8x1xf32, #tpu.memory_space<vmem>>, vector<8x1xf32>
    %4 = vector.broadcast %3 : vector<8x1xf32> to vector<8x256xf32>
    %5 = arith.addf %2, %4 : vector<8x256xf32>
    %cst_5 = arith.constant 0.000000e+00 : f32
    %6 = vector.broadcast %cst_5 : f32 to vector<8x256xf32>
    %7 = arith.maximumf %5, %6 : vector<8x256xf32>
    %c0_6 = arith.constant 0 : index
    %c0_7 = arith.constant 0 : index
    %8 = vector.load %arg4[%c0_6, %c0_7] : memref<8x256xf32, #tpu.memory_space<vmem>>, vector<8x256xf32>
    tpu.vector_store %arg4[%c0_6, %c0_7], %7 {strides = array<i32>} : memref<8x256xf32, #tpu.memory_space<vmem>>, vector<8x256xf32>,
    return
  }
  func.func @transform_0(%arg0: i32) -> (i32, i32) {
    %c0_i32 = arith.constant 0 : i32
    %c0_i32_0 = arith.constant 0 : i32
    %c0_i32_1 = arith.constant 0 : i32
    return %c0_i32, %c0_i32_0 : i32, i32
  }
  func.func @transform_1(%arg0: i32) -> (i32, i32) {
    %c0_i32 = arith.constant 0 : i32
    %c0_i32_0 = arith.constant 0 : i32
    return %c0_i32, %arg0 : i32, i32
  }
  func.func @transform_2(%arg0: i32) -> (i32, i32) {
    %c0_i32 = arith.constant 0 : i32
    %c0_i32_0 = arith.constant 0 : i32
    %c0_i32_1 = arith.constant 0 : i32
    return %c0_i32, %c0_i32_0 : i32, i32
  }
  func.func @transform_3(%arg0: i32) -> (i32, i32) {
    %c0_i32 = arith.constant 0 : i32
    %c0_i32_0 = arith.constant 0 : i32
    return %c0_i32, %arg0 : i32, i32
  }
}

module attributes {stable_mosaic.version = 11 : i64} {
  func.func @_fused_matmul_kernel(%arg0: i32, %arg1: memref<16x72xbf16, #tpu.memory_space<vmem>>, %arg2: memref<72x128xbf16, #tpu.memory_space<vmem>>, %arg3: memref<16x1xf32, #tpu.memory_space<vmem>>, %arg4: memref<16x128xf32, #tpu.memory_space<vmem>>) attributes {dimension_semantics = [#tpu.dimension_semantics<parallel>], iteration_bounds = array<i64: 1>, scalar_prefetch = 0 : i64, scratch_operands = 0 : i64, tpu.core_type = #tpu.core_type<tc>, window_params = [{pipeline_mode = #tpu.pipeline_mode<synchronous>, transform_indices = @transform_0, window_bounds = array<i64: 16, 72>}, {transform_indices = @transform_1, window_bounds = array<i64: 72, 128>}, {pipeline_mode = #tpu.pipeline_mode<synchronous>, transform_indices = @transform_2, window_bounds = array<i64: 16, 1>}, {transform_indices = @transform_3, window_bounds = array<i64: 16, 128>}]} {
    %c0 = arith.constant 0 : index
    %c0_0 = arith.constant 0 : index
    %0 = vector.load %arg1[%c0, %c0_0] : memref<16x72xbf16, #tpu.memory_space<vmem>>, vector<16x72xbf16>
    %c0_1 = arith.constant 0 : index
    %c0_2 = arith.constant 0 : index
    %1 = vector.load %arg2[%c0_1, %c0_2] : memref<72x128xbf16, #tpu.memory_space<vmem>>, vector<72x128xbf16>
    %cst = arith.constant dense<0.000000e+00> : vector<16x128xf32>
    %2 = tpu.matmul %0, %1, %cst {dimension_numbers = #tpu.dot_dimension_numbers<[1], [0], [0], [1], [0, 0, 1, 1], [], []>} : vector<16x72xbf16>, vector<72x128xbf16>, vector<16x128xf32> -> vector<16x128xf32>
    %c0_3 = arith.constant 0 : index
    %c0_4 = arith.constant 0 : index
    %3 = vector.load %arg3[%c0_3, %c0_4] : memref<16x1xf32, #tpu.memory_space<vmem>>, vector<16x1xf32>
    %4 = vector.broadcast %3 : vector<16x1xf32> to vector<16x128xf32>
    %5 = arith.addf %2, %4 : vector<16x128xf32>
    %cst_5 = arith.constant 0.000000e+00 : f32
    %6 = vector.broadcast %cst_5 : f32 to vector<16x128xf32>
    %7 = arith.maximumf %5, %6 : vector<16x128xf32>
    %c0_6 = arith.constant 0 : index
    %c0_7 = arith.constant 0 : index
    %8 = vector.load %arg4[%c0_6, %c0_7] : memref<16x128xf32, #tpu.memory_space<vmem>>, vector<16x128xf32>
    tpu.vector_store %arg4[%c0_6, %c0_7], %7 {strides = array<i32>} : memref<16x128xf32, #tpu.memory_space<vmem>>, vector<16x128xf32>,
    return
  }
  func.func @transform_0(%arg0: i32) -> (i32, i32) {
    %c0_i32 = arith.constant 0 : i32
    %c0_i32_0 = arith.constant 0 : i32
    %c0_i32_1 = arith.constant 0 : i32
    return %c0_i32, %c0_i32_0 : i32, i32
  }
  func.func @transform_1(%arg0: i32) -> (i32, i32) {
    %c0_i32 = arith.constant 0 : i32
    %c0_i32_0 = arith.constant 0 : i32
    return %c0_i32, %arg0 : i32, i32
  }
  func.func @transform_2(%arg0: i32) -> (i32, i32) {
    %c0_i32 = arith.constant 0 : i32
    %c0_i32_0 = arith.constant 0 : i32
    %c0_i32_1 = arith.constant 0 : i32
    return %c0_i32, %c0_i32_0 : i32, i32
  }
  func.func @transform_3(%arg0: i32) -> (i32, i32) {
    %c0_i32 = arith.constant 0 : i32
    %c0_i32_0 = arith.constant 0 : i32
    return %c0_i32, %arg0 : i32, i32
  }
}

module attributes {stable_mosaic.version = 11 : i64} {
  func.func @_fused_matmul_kernel(%arg0: i32, %arg1: memref<32x144xbf16, #tpu.memory_space<vmem>>, %arg2: memref<144x32xbf16, #tpu.memory_space<vmem>>, %arg3: memref<32x1xf32, #tpu.memory_space<vmem>>, %arg4: memref<32x32xf32, #tpu.memory_space<vmem>>) attributes {dimension_semantics = [#tpu.dimension_semantics<parallel>], iteration_bounds = array<i64: 1>, scalar_prefetch = 0 : i64, scratch_operands = 0 : i64, tpu.core_type = #tpu.core_type<tc>, window_params = [{pipeline_mode = #tpu.pipeline_mode<synchronous>, transform_indices = @transform_0, window_bounds = array<i64: 32, 144>}, {transform_indices = @transform_1, window_bounds = array<i64: 144, 32>}, {pipeline_mode = #tpu.pipeline_mode<synchronous>, transform_indices = @transform_2, window_bounds = array<i64: 32, 1>}, {transform_indices = @transform_3, window_bounds = array<i64: 32, 32>}]} {
    %c0 = arith.constant 0 : index
    %c0_0 = arith.constant 0 : index
    %0 = vector.load %arg1[%c0, %c0_0] : memref<32x144xbf16, #tpu.memory_space<vmem>>, vector<32x144xbf16>
    %c0_1 = arith.constant 0 : index
    %c0_2 = arith.constant 0 : index
    %1 = vector.load %arg2[%c0_1, %c0_2] : memref<144x32xbf16, #tpu.memory_space<vmem>>, vector<144x32xbf16>
    %cst = arith.constant dense<0.000000e+00> : vector<32x32xf32>
    %2 = tpu.matmul %0, %1, %cst {dimension_numbers = #tpu.dot_dimension_numbers<[1], [0], [0], [1], [0, 0, 1, 1], [], []>} : vector<32x144xbf16>, vector<144x32xbf16>, vector<32x32xf32> -> vector<32x32xf32>
    %c0_3 = arith.constant 0 : index
    %c0_4 = arith.constant 0 : index
    %3 = vector.load %arg3[%c0_3, %c0_4] : memref<32x1xf32, #tpu.memory_space<vmem>>, vector<32x1xf32>
    %4 = vector.broadcast %3 : vector<32x1xf32> to vector<32x32xf32>
    %5 = arith.addf %2, %4 : vector<32x32xf32>
    %cst_5 = arith.constant 0.000000e+00 : f32
    %6 = vector.broadcast %cst_5 : f32 to vector<32x32xf32>
    %7 = arith.maximumf %5, %6 : vector<32x32xf32>
    %c0_6 = arith.constant 0 : index
    %c0_7 = arith.constant 0 : index
    %8 = vector.load %arg4[%c0_6, %c0_7] : memref<32x32xf32, #tpu.memory_space<vmem>>, vector<32x32xf32>
    tpu.vector_store %arg4[%c0_6, %c0_7], %7 {strides = array<i32>} : memref<32x32xf32, #tpu.memory_space<vmem>>, vector<32x32xf32>,
    return
  }
  func.func @transform_0(%arg0: i32) -> (i32, i32) {
    %c0_i32 = arith.constant 0 : i32
    %c0_i32_0 = arith.constant 0 : i32
    %c0_i32_1 = arith.constant 0 : i32
    return %c0_i32, %c0_i32_0 : i32, i32
  }
  func.func @transform_1(%arg0: i32) -> (i32, i32) {
    %c0_i32 = arith.constant 0 : i32
    %c0_i32_0 = arith.constant 0 : i32
    return %c0_i32, %arg0 : i32, i32
  }
  func.func @transform_2(%arg0: i32) -> (i32, i32) {
    %c0_i32 = arith.constant 0 : i32
    %c0_i32_0 = arith.constant 0 : i32
    %c0_i32_1 = arith.constant 0 : i32
    return %c0_i32, %c0_i32_0 : i32, i32
  }
  func.func @transform_3(%arg0: i32) -> (i32, i32) {
    %c0_i32 = arith.constant 0 : i32
    %c0_i32_0 = arith.constant 0 : i32
    return %c0_i32, %arg0 : i32, i32
  }
}

module attributes {stable_mosaic.version = 11 : i64} {
  func.func @_fused_matmul_kernel(%arg0: i32, %arg1: memref<64x288xbf16, #tpu.memory_space<vmem>>, %arg2: memref<288x8xbf16, #tpu.memory_space<vmem>>, %arg3: memref<64x1xf32, #tpu.memory_space<vmem>>, %arg4: memref<64x8xf32, #tpu.memory_space<vmem>>) attributes {dimension_semantics = [#tpu.dimension_semantics<parallel>], iteration_bounds = array<i64: 1>, scalar_prefetch = 0 : i64, scratch_operands = 0 : i64, tpu.core_type = #tpu.core_type<tc>, window_params = [{pipeline_mode = #tpu.pipeline_mode<synchronous>, transform_indices = @transform_0, window_bounds = array<i64: 64, 288>}, {transform_indices = @transform_1, window_bounds = array<i64: 288, 8>}, {pipeline_mode = #tpu.pipeline_mode<synchronous>, transform_indices = @transform_2, window_bounds = array<i64: 64, 1>}, {transform_indices = @transform_3, window_bounds = array<i64: 64, 8>}]} {
    %c0 = arith.constant 0 : index
    %c0_0 = arith.constant 0 : index
    %0 = vector.load %arg1[%c0, %c0_0] : memref<64x288xbf16, #tpu.memory_space<vmem>>, vector<64x288xbf16>
    %c0_1 = arith.constant 0 : index
    %c0_2 = arith.constant 0 : index
    %1 = vector.load %arg2[%c0_1, %c0_2] : memref<288x8xbf16, #tpu.memory_space<vmem>>, vector<288x8xbf16>
    %cst = arith.constant dense<0.000000e+00> : vector<64x8xf32>
    %2 = tpu.matmul %0, %1, %cst {dimension_numbers = #tpu.dot_dimension_numbers<[1], [0], [0], [1], [0, 0, 1, 1], [], []>} : vector<64x288xbf16>, vector<288x8xbf16>, vector<64x8xf32> -> vector<64x8xf32>
    %c0_3 = arith.constant 0 : index
    %c0_4 = arith.constant 0 : index
    %3 = vector.load %arg3[%c0_3, %c0_4] : memref<64x1xf32, #tpu.memory_space<vmem>>, vector<64x1xf32>
    %4 = vector.broadcast %3 : vector<64x1xf32> to vector<64x8xf32>
    %5 = arith.addf %2, %4 : vector<64x8xf32>
    %cst_5 = arith.constant 0.000000e+00 : f32
    %6 = vector.broadcast %cst_5 : f32 to vector<64x8xf32>
    %7 = arith.maximumf %5, %6 : vector<64x8xf32>
    %c0_6 = arith.constant 0 : index
    %c0_7 = arith.constant 0 : index
    %8 = vector.load %arg4[%c0_6, %c0_7] : memref<64x8xf32, #tpu.memory_space<vmem>>, vector<64x8xf32>
    tpu.vector_store %arg4[%c0_6, %c0_7], %7 {strides = array<i32>} : memref<64x8xf32, #tpu.memory_space<vmem>>, vector<64x8xf32>,
    return
  }
  func.func @transform_0(%arg0: i32) -> (i32, i32) {
    %c0_i32 = arith.constant 0 : i32
    %c0_i32_0 = arith.constant 0 : i32
    %c0_i32_1 = arith.constant 0 : i32
    return %c0_i32, %c0_i32_0 : i32, i32
  }
  func.func @transform_1(%arg0: i32) -> (i32, i32) {
    %c0_i32 = arith.constant 0 : i32
    %c0_i32_0 = arith.constant 0 : i32
    return %c0_i32, %arg0 : i32, i32
  }
  func.func @transform_2(%arg0: i32) -> (i32, i32) {
    %c0_i32 = arith.constant 0 : i32
    %c0_i32_0 = arith.constant 0 : i32
    %c0_i32_1 = arith.constant 0 : i32
    return %c0_i32, %c0_i32_0 : i32, i32
  }
  func.func @transform_3(%arg0: i32) -> (i32, i32) {
    %c0_i32 = arith.constant 0 : i32
    %c0_i32_0 = arith.constant 0 : i32
    return %c0_i32, %arg0 : i32, i32
  }
}

module attributes {stable_mosaic.version = 11 : i64} {
  func.func @_fused_matmul_kernel(%arg0: i32, %arg1: memref<128x576xbf16, #tpu.memory_space<vmem>>, %arg2: memref<576x8xbf16, #tpu.memory_space<vmem>>, %arg3: memref<128x1xf32, #tpu.memory_space<vmem>>, %arg4: memref<128x8xf32, #tpu.memory_space<vmem>>, %arg5: memref<128x8xf32, #tpu.memory_space<vmem>>) attributes {dimension_semantics = [#tpu.dimension_semantics<parallel>], iteration_bounds = array<i64: 1>, scalar_prefetch = 0 : i64, scratch_operands = 0 : i64, tpu.core_type = #tpu.core_type<tc>, window_params = [{pipeline_mode = #tpu.pipeline_mode<synchronous>, transform_indices = @transform_0, window_bounds = array<i64: 128, 576>}, {transform_indices = @transform_1, window_bounds = array<i64: 576, 8>}, {pipeline_mode = #tpu.pipeline_mode<synchronous>, transform_indices = @transform_2, window_bounds = array<i64: 128, 1>}, {transform_indices = @transform_3, window_bounds = array<i64: 128, 8>}, {transform_indices = @transform_4, window_bounds = array<i64: 128, 8>}]} {
    %c0 = arith.constant 0 : index
    %c0_0 = arith.constant 0 : index
    %0 = vector.load %arg1[%c0, %c0_0] : memref<128x576xbf16, #tpu.memory_space<vmem>>, vector<128x576xbf16>
    %c0_1 = arith.constant 0 : index
    %c0_2 = arith.constant 0 : index
    %1 = vector.load %arg2[%c0_1, %c0_2] : memref<576x8xbf16, #tpu.memory_space<vmem>>, vector<576x8xbf16>
    %cst = arith.constant dense<0.000000e+00> : vector<128x8xf32>
    %2 = tpu.matmul %0, %1, %cst {dimension_numbers = #tpu.dot_dimension_numbers<[1], [0], [0], [1], [0, 0, 1, 1], [], []>} : vector<128x576xbf16>, vector<576x8xbf16>, vector<128x8xf32> -> vector<128x8xf32>
    %c0_3 = arith.constant 0 : index
    %c0_4 = arith.constant 0 : index
    %3 = vector.load %arg3[%c0_3, %c0_4] : memref<128x1xf32, #tpu.memory_space<vmem>>, vector<128x1xf32>
    %4 = vector.broadcast %3 : vector<128x1xf32> to vector<128x8xf32>
    %5 = arith.addf %2, %4 : vector<128x8xf32>
    %cst_5 = arith.constant 0.000000e+00 : f32
    %6 = vector.broadcast %cst_5 : f32 to vector<128x8xf32>
    %7 = arith.maximumf %5, %6 : vector<128x8xf32>
    %c0_6 = arith.constant 0 : index
    %c0_7 = arith.constant 0 : index
    %8 = vector.load %arg4[%c0_6, %c0_7] : memref<128x8xf32, #tpu.memory_space<vmem>>, vector<128x8xf32>
    %9 = arith.addf %7, %8 : vector<128x8xf32>
    %c0_8 = arith.constant 0 : index
    %c0_9 = arith.constant 0 : index
    %10 = vector.load %arg5[%c0_8, %c0_9] : memref<128x8xf32, #tpu.memory_space<vmem>>, vector<128x8xf32>
    tpu.vector_store %arg5[%c0_8, %c0_9], %9 {strides = array<i32>} : memref<128x8xf32, #tpu.memory_space<vmem>>, vector<128x8xf32>,
    return
  }
  func.func @transform_0(%arg0: i32) -> (i32, i32) {
    %c0_i32 = arith.constant 0 : i32
    %c0_i32_0 = arith.constant 0 : i32
    %c0_i32_1 = arith.constant 0 : i32
    return %c0_i32, %c0_i32_0 : i32, i32
  }
  func.func @transform_1(%arg0: i32) -> (i32, i32) {
    %c0_i32 = arith.constant 0 : i32
    %c0_i32_0 = arith.constant 0 : i32
    return %c0_i32, %arg0 : i32, i32
  }
  func.func @transform_2(%arg0: i32) -> (i32, i32) {
    %c0_i32 = arith.constant 0 : i32
    %c0_i32_0 = arith.constant 0 : i32
    %c0_i32_1 = arith.constant 0 : i32
    return %c0_i32, %c0_i32_0 : i32, i32
  }
  func.func @transform_3(%arg0: i32) -> (i32, i32) {
    %c0_i32 = arith.constant 0 : i32
    %c0_i32_0 = arith.constant 0 : i32
    return %c0_i32, %arg0 : i32, i32
  }
  func.func @transform_4(%arg0: i32) -> (i32, i32) {
    %c0_i32 = arith.constant 0 : i32
    %c0_i32_0 = arith.constant 0 : i32
    return %c0_i32, %arg0 : i32, i32
  }
}

module attributes {stable_mosaic.version = 11 : i64} {
  func.func @_fused_matmul_kernel(%arg0: i32, %arg1: memref<64x288xbf16, #tpu.memory_space<vmem>>, %arg2: memref<288x32xbf16, #tpu.memory_space<vmem>>, %arg3: memref<64x1xf32, #tpu.memory_space<vmem>>, %arg4: memref<64x32xf32, #tpu.memory_space<vmem>>, %arg5: memref<64x32xf32, #tpu.memory_space<vmem>>) attributes {dimension_semantics = [#tpu.dimension_semantics<parallel>], iteration_bounds = array<i64: 1>, scalar_prefetch = 0 : i64, scratch_operands = 0 : i64, tpu.core_type = #tpu.core_type<tc>, window_params = [{pipeline_mode = #tpu.pipeline_mode<synchronous>, transform_indices = @transform_0, window_bounds = array<i64: 64, 288>}, {transform_indices = @transform_1, window_bounds = array<i64: 288, 32>}, {pipeline_mode = #tpu.pipeline_mode<synchronous>, transform_indices = @transform_2, window_bounds = array<i64: 64, 1>}, {transform_indices = @transform_3, window_bounds = array<i64: 64, 32>}, {transform_indices = @transform_4, window_bounds = array<i64: 64, 32>}]} {
    %c0 = arith.constant 0 : index
    %c0_0 = arith.constant 0 : index
    %0 = vector.load %arg1[%c0, %c0_0] : memref<64x288xbf16, #tpu.memory_space<vmem>>, vector<64x288xbf16>
    %c0_1 = arith.constant 0 : index
    %c0_2 = arith.constant 0 : index
    %1 = vector.load %arg2[%c0_1, %c0_2] : memref<288x32xbf16, #tpu.memory_space<vmem>>, vector<288x32xbf16>
    %cst = arith.constant dense<0.000000e+00> : vector<64x32xf32>
    %2 = tpu.matmul %0, %1, %cst {dimension_numbers = #tpu.dot_dimension_numbers<[1], [0], [0], [1], [0, 0, 1, 1], [], []>} : vector<64x288xbf16>, vector<288x32xbf16>, vector<64x32xf32> -> vector<64x32xf32>
    %c0_3 = arith.constant 0 : index
    %c0_4 = arith.constant 0 : index
    %3 = vector.load %arg3[%c0_3, %c0_4] : memref<64x1xf32, #tpu.memory_space<vmem>>, vector<64x1xf32>
    %4 = vector.broadcast %3 : vector<64x1xf32> to vector<64x32xf32>
    %5 = arith.addf %2, %4 : vector<64x32xf32>
    %cst_5 = arith.constant 0.000000e+00 : f32
    %6 = vector.broadcast %cst_5 : f32 to vector<64x32xf32>
    %7 = arith.maximumf %5, %6 : vector<64x32xf32>
    %c0_6 = arith.constant 0 : index
    %c0_7 = arith.constant 0 : index
    %8 = vector.load %arg4[%c0_6, %c0_7] : memref<64x32xf32, #tpu.memory_space<vmem>>, vector<64x32xf32>
    %9 = arith.addf %7, %8 : vector<64x32xf32>
    %c0_8 = arith.constant 0 : index
    %c0_9 = arith.constant 0 : index
    %10 = vector.load %arg5[%c0_8, %c0_9] : memref<64x32xf32, #tpu.memory_space<vmem>>, vector<64x32xf32>
    tpu.vector_store %arg5[%c0_8, %c0_9], %9 {strides = array<i32>} : memref<64x32xf32, #tpu.memory_space<vmem>>, vector<64x32xf32>,
    return
  }
  func.func @transform_0(%arg0: i32) -> (i32, i32) {
    %c0_i32 = arith.constant 0 : i32
    %c0_i32_0 = arith.constant 0 : i32
    %c0_i32_1 = arith.constant 0 : i32
    return %c0_i32, %c0_i32_0 : i32, i32
  }
  func.func @transform_1(%arg0: i32) -> (i32, i32) {
    %c0_i32 = arith.constant 0 : i32
    %c0_i32_0 = arith.constant 0 : i32
    return %c0_i32, %arg0 : i32, i32
  }
  func.func @transform_2(%arg0: i32) -> (i32, i32) {
    %c0_i32 = arith.constant 0 : i32
    %c0_i32_0 = arith.constant 0 : i32
    %c0_i32_1 = arith.constant 0 : i32
    return %c0_i32, %c0_i32_0 : i32, i32
  }
  func.func @transform_3(%arg0: i32) -> (i32, i32) {
    %c0_i32 = arith.constant 0 : i32
    %c0_i32_0 = arith.constant 0 : i32
    return %c0_i32, %arg0 : i32, i32
  }
  func.func @transform_4(%arg0: i32) -> (i32, i32) {
    %c0_i32 = arith.constant 0 : i32
    %c0_i32_0 = arith.constant 0 : i32
    return %c0_i32, %arg0 : i32, i32
  }
}

module attributes {stable_mosaic.version = 11 : i64} {
  func.func @_fused_matmul_kernel(%arg0: i32, %arg1: memref<32x144xbf16, #tpu.memory_space<vmem>>, %arg2: memref<144x128xbf16, #tpu.memory_space<vmem>>, %arg3: memref<32x1xf32, #tpu.memory_space<vmem>>, %arg4: memref<32x128xf32, #tpu.memory_space<vmem>>, %arg5: memref<32x128xf32, #tpu.memory_space<vmem>>) attributes {dimension_semantics = [#tpu.dimension_semantics<parallel>], iteration_bounds = array<i64: 1>, scalar_prefetch = 0 : i64, scratch_operands = 0 : i64, tpu.core_type = #tpu.core_type<tc>, window_params = [{pipeline_mode = #tpu.pipeline_mode<synchronous>, transform_indices = @transform_0, window_bounds = array<i64: 32, 144>}, {transform_indices = @transform_1, window_bounds = array<i64: 144, 128>}, {pipeline_mode = #tpu.pipeline_mode<synchronous>, transform_indices = @transform_2, window_bounds = array<i64: 32, 1>}, {transform_indices = @transform_3, window_bounds = array<i64: 32, 128>}, {transform_indices = @transform_4, window_bounds = array<i64: 32, 128>}]} {
    %c0 = arith.constant 0 : index
    %c0_0 = arith.constant 0 : index
    %0 = vector.load %arg1[%c0, %c0_0] : memref<32x144xbf16, #tpu.memory_space<vmem>>, vector<32x144xbf16>
    %c0_1 = arith.constant 0 : index
    %c0_2 = arith.constant 0 : index
    %1 = vector.load %arg2[%c0_1, %c0_2] : memref<144x128xbf16, #tpu.memory_space<vmem>>, vector<144x128xbf16>
    %cst = arith.constant dense<0.000000e+00> : vector<32x128xf32>
    %2 = tpu.matmul %0, %1, %cst {dimension_numbers = #tpu.dot_dimension_numbers<[1], [0], [0], [1], [0, 0, 1, 1], [], []>} : vector<32x144xbf16>, vector<144x128xbf16>, vector<32x128xf32> -> vector<32x128xf32>
    %c0_3 = arith.constant 0 : index
    %c0_4 = arith.constant 0 : index
    %3 = vector.load %arg3[%c0_3, %c0_4] : memref<32x1xf32, #tpu.memory_space<vmem>>, vector<32x1xf32>
    %4 = vector.broadcast %3 : vector<32x1xf32> to vector<32x128xf32>
    %5 = arith.addf %2, %4 : vector<32x128xf32>
    %cst_5 = arith.constant 0.000000e+00 : f32
    %6 = vector.broadcast %cst_5 : f32 to vector<32x128xf32>
    %7 = arith.maximumf %5, %6 : vector<32x128xf32>
    %c0_6 = arith.constant 0 : index
    %c0_7 = arith.constant 0 : index
    %8 = vector.load %arg4[%c0_6, %c0_7] : memref<32x128xf32, #tpu.memory_space<vmem>>, vector<32x128xf32>
    %9 = arith.addf %7, %8 : vector<32x128xf32>
    %c0_8 = arith.constant 0 : index
    %c0_9 = arith.constant 0 : index
    %10 = vector.load %arg5[%c0_8, %c0_9] : memref<32x128xf32, #tpu.memory_space<vmem>>, vector<32x128xf32>
    tpu.vector_store %arg5[%c0_8, %c0_9], %9 {strides = array<i32>} : memref<32x128xf32, #tpu.memory_space<vmem>>, vector<32x128xf32>,
    return
  }
  func.func @transform_0(%arg0: i32) -> (i32, i32) {
    %c0_i32 = arith.constant 0 : i32
    %c0_i32_0 = arith.constant 0 : i32
    %c0_i32_1 = arith.constant 0 : i32
    return %c0_i32, %c0_i32_0 : i32, i32
  }
  func.func @transform_1(%arg0: i32) -> (i32, i32) {
    %c0_i32 = arith.constant 0 : i32
    %c0_i32_0 = arith.constant 0 : i32
    return %c0_i32, %arg0 : i32, i32
  }
  func.func @transform_2(%arg0: i32) -> (i32, i32) {
    %c0_i32 = arith.constant 0 : i32
    %c0_i32_0 = arith.constant 0 : i32
    %c0_i32_1 = arith.constant 0 : i32
    return %c0_i32, %c0_i32_0 : i32, i32
  }
  func.func @transform_3(%arg0: i32) -> (i32, i32) {
    %c0_i32 = arith.constant 0 : i32
    %c0_i32_0 = arith.constant 0 : i32
    return %c0_i32, %arg0 : i32, i32
  }
  func.func @transform_4(%arg0: i32) -> (i32, i32) {
    %c0_i32 = arith.constant 0 : i32
    %c0_i32_0 = arith.constant 0 : i32
    return %c0_i32, %arg0 : i32, i32
  }
}

module attributes {stable_mosaic.version = 11 : i64} {
  func.func @_fused_matmul_kernel(%arg0: i32, %arg1: memref<4x72xbf16, #tpu.memory_space<vmem>>, %arg2: memref<72x256xbf16, #tpu.memory_space<vmem>>, %arg3: memref<4x1xf32, #tpu.memory_space<vmem>>, %arg4: memref<4x256xf32, #tpu.memory_space<vmem>>) attributes {dimension_semantics = [#tpu.dimension_semantics<parallel>], iteration_bounds = array<i64: 2>, scalar_prefetch = 0 : i64, scratch_operands = 0 : i64, tpu.core_type = #tpu.core_type<tc>, window_params = [{pipeline_mode = #tpu.pipeline_mode<synchronous>, transform_indices = @transform_0, window_bounds = array<i64: 4, 72>}, {transform_indices = @transform_1, window_bounds = array<i64: 72, 256>}, {pipeline_mode = #tpu.pipeline_mode<synchronous>, transform_indices = @transform_2, window_bounds = array<i64: 4, 1>}, {transform_indices = @transform_3, window_bounds = array<i64: 4, 256>}]} {
    %c0 = arith.constant 0 : index
    %c0_0 = arith.constant 0 : index
    %0 = vector.load %arg1[%c0, %c0_0] : memref<4x72xbf16, #tpu.memory_space<vmem>>, vector<4x72xbf16>
    %c0_1 = arith.constant 0 : index
    %c0_2 = arith.constant 0 : index
    %1 = vector.load %arg2[%c0_1, %c0_2] : memref<72x256xbf16, #tpu.memory_space<vmem>>, vector<72x256xbf16>
    %cst = arith.constant dense<0.000000e+00> : vector<4x256xf32>
    %2 = tpu.matmul %0, %1, %cst {dimension_numbers = #tpu.dot_dimension_numbers<[1], [0], [0], [1], [0, 0, 1, 1], [], []>} : vector<4x72xbf16>, vector<72x256xbf16>, vector<4x256xf32> -> vector<4x256xf32>
    %c0_3 = arith.constant 0 : index
    %c0_4 = arith.constant 0 : index
    %3 = vector.load %arg3[%c0_3, %c0_4] : memref<4x1xf32, #tpu.memory_space<vmem>>, vector<4x1xf32>
    %4 = vector.broadcast %3 : vector<4x1xf32> to vector<4x256xf32>
    %5 = arith.addf %2, %4 : vector<4x256xf32>
    %6 = arith.negf %5 : vector<4x256xf32>
    %7 = math.exp %6 : vector<4x256xf32>
    %cst_5 = arith.constant 1.000000e+00 : f32
    %8 = vector.broadcast %cst_5 : f32 to vector<4x256xf32>
    %9 = arith.addf %8, %7 : vector<4x256xf32>
    %10 = arith.divf %8, %9 : vector<4x256xf32>
    %c0_6 = arith.constant 0 : index
    %c0_7 = arith.constant 0 : index
    %11 = vector.load %arg4[%c0_6, %c0_7] : memref<4x256xf32, #tpu.memory_space<vmem>>, vector<4x256xf32>
    tpu.vector_store %arg4[%c0_6, %c0_7], %10 {strides = array<i32>} : memref<4x256xf32, #tpu.memory_space<vmem>>, vector<4x256xf32>,
    return
  }
  func.func @transform_0(%arg0: i32) -> (i32, i32) {
    %c0_i32 = arith.constant 0 : i32
    %c0_i32_0 = arith.constant 0 : i32
    %c0_i32_1 = arith.constant 0 : i32
    return %c0_i32, %c0_i32_0 : i32, i32
  }
  func.func @transform_1(%arg0: i32) -> (i32, i32) {
    %c0_i32 = arith.constant 0 : i32
    %c0_i32_0 = arith.constant 0 : i32
    return %c0_i32, %arg0 : i32, i32
  }
  func.func @transform_2(%arg0: i32) -> (i32, i32) {
    %c0_i32 = arith.constant 0 : i32
    %c0_i32_0 = arith.constant 0 : i32
    %c0_i32_1 = arith.constant 0 : i32
    return %c0_i32, %c0_i32_0 : i32, i32
  }
  func.func @transform_3(%arg0: i32) -> (i32, i32) {
    %c0_i32 = arith.constant 0 : i32
    %c0_i32_0 = arith.constant 0 : i32
    return %c0_i32, %arg0 : i32, i32
  }
}

</mosaic_0001>

<bundles_post_ra>
// kernel: net_forward.8
= control target key start
LH: loop header
LB: loop body
LE: loop exit
PB: predicated region body
PF: predicated region fallthrough
CT: control target
= control target key end

     0   :  { %s445_s12 = smov 0   ;;  %s447_s13 = smov 0   ;;  %s503_s0 = inlined_call_operand.vmem [shape: bf16[8,9], index: 0, kind: input, shape index: {}]   ;;  %s504_s1 = inlined_call_operand.vmem [shape: bf16[9,512], index: 1, kind: input, shape index: {}]   ;;  %s505_s2 = inlined_call_operand.vmem [shape: f32[8,1], index: 2, kind: input, shape index: {}]   ;;  %s506_s3 = inlined_call_operand.vmem [shape: f32[8,512], index: 3, kind: output, shape index: {}]  }
   0x1   :  { %s449_s14 = smov 0  }
   0x2 LB: > { %s352_s15 = sadd.s32 4294967295, %s421_s14   ;;  %s462_s16 = sadd.s32 1, %s421_s14   ;;  %s421_s14 = sphi %s449_s14, %s509_s14   ;;  %s417_s13 = sphi %s447_s13, %s508_s13   ;;  %s413_s12 = sphi %s445_s12, %s507_s12  }
   0x3   : > { %s38_s17 = ssub.s32 %s421_s14, %s462_s16  ;;  %s41_s18 = sadd.s32 1, %s417_s13 }
   0x4   : > { %p39_p0 = scmp.eq.s32.totalorder %s38_s17, 0  ;;  %p48_p1 = scmp.ne.s32.totalorder %s417_s13, %s413_s12 }
   0x5   : > { %p49_p2 = scmp.eq.s32.totalorder %s421_s14, 0  ;;  %p355_p4 = scmp.ge.s32.totalorder %s421_s14, 2 }
   0x6   : > { %s471_s19 = scalar_select %p39_p0, %s417_s13, %s41_s18  }
   0x7   : > { %p50_p3 = por %p49_p2, %p48_p1  ;;  %127 = sbr.rel (%p355_p4) target bundleno = 17 (0x11), region = 24 }
   0xc   : > { %130 = sbr.rel (!%p50_p3) target bundleno = 17 (0x11), region = 28  ;;  %s132_s20 = sand.u32 (%p50_p3), 1, %s417_s13  }
   0xd   : > { %s368_s21 = sshll.u32 (%p50_p3), %s421_s14, 3  ;;  %s356_s22 = sshll.u32 (%p50_p3), %s132_s20, 4 }
   0xe   : > { %s137_s25 = scalar_lea.vmem (%p50_p3), %s504_s1, %s368_s21  ;;  %s134_s26 = scalar_lea.vmem (%p50_p3), [#allocation2], %s356_s22 }
   0xf   : > { %v168_v0 = vld [vmem:[%s137_s25] sm:$0xff] (%p50_p3)  ;;  %v170_v1 = vld [vmem:[%s137_s25 + $0x10] sm:$0xff] (%p50_p3) }
  0x10   : > { %169 = vst [vmem:[%s134_s26] sm:$0xff] (%p50_p3), %v168_v0  ;;  %171 = vst [vmem:[%s134_s26 + $0x8] sm:$0xff] (%p50_p3), %v170_v1 }
  0x11 PF: > { %p359_p5 = scmp.ge.s32.totalorder %s421_s14, 1  ;;  %p176_p6 = scmp.lt.s32.totalorder %s421_s14, 3 }
  0x13   : > { %p177_p7 = pnand %p359_p5, %p176_p6 }
  0x14   : > { %s183_s27 = sand.u32 (!%p177_p7), 1, %s413_s12   ;;  %s361_s7 = sshll.u32 (!%p177_p7), %s352_s15, 1 }
  0x15   : > { %180 = sbr.rel (%p177_p7) target bundleno = 235 (0xeb), region = 66  ;;  %s360_s30 = sshll.u32 (!%p177_p7), %s183_s27, 4 }
  0x16   : > { %s185_s4 = scalar_lea.vmem (!%p177_p7), [#allocation2], %s360_s30  ;;  %p208_p8 = scmp.lt.s32.totalorder (!%p177_p7), %s361_s7, 3 }
  0x1a   : > { %vm235_vm0 = vcmask 1043456   ;;  %vm236_vm1 = vcmask 1044480   ;;  %v217_v2 = vld [vmem:[%s505_s2] sm:$0xff]  ;;  %v423_v3 = vmov 65535   ;;  %v424_v5 = vmov 0   ;;  %s511_s7 = smov (!%p208_p8, %s361_s7), 3 }
  0x1b   : > { %v237_v4 = vsel %vm235_vm0, 4294967295, %v423_v3  ;;  %277 = vmatprep.mubr.bf16.mxu0 %v424_v5  ;;  %395 = vset.pattern.permute.xlu0 %v424_v5  ;;  %v396_v7 = vld [vmem:[%s185_s4 + $0x4] ss:$8 sps:$4 sm:$0x1f]   ;;  %v214_v11 = vld [vmem:[%s503_s0] sm:$0xf] }
  0x1c   : > { %v238_v6 = vsel %vm236_vm1, %v237_v4, 0  ;;  %220 = vperm.xlu0 %395, %v217_v2   ;;  %v398_v8 = vld [vmem:[%s185_s4] ss:$8 sps:$4 sm:$0x1f]   ;;  %vm231_vm2 = vcmask 72704   ;;  %s362_s8 = sshll.u32 %s511_s7, 3 }
  0x1d   : > { %v243_v9 = vand.u32 %v396_v7, %v238_v6  ;;  %v240_v10 = vand.u32 %v398_v8, %v238_v6  ;;  %s211_s11 = scalar_lea.vmem %s506_s3, %s362_s8 }
  0x1f   : > { %259 = vmatprep.subr.bf16.mxu0 %v243_v9 }
  0x20   : > { %260 = vmatpush1.bf16.msra.mxu0 %v240_v10 }
  0x23   : > { %365 = vmatmul.mubr.msk.bf16.vlgmr.msra.gmra.mxu0 %vm231_vm2, %v214_v11 }
  0x97   : > { %v221_v12 = vpop.permute.xlu0 %220 }
  0xe3   : > { %v279_v13 = vpop.f32.mrf.mxu0 }
  0xe4   : > { %v280_v14 = vadd.f32 %v279_v13, %v221_v12 }
  0xe5   : > { %v281_v15 = vpop.f32.mrf.mxu0 }
  0xe6   : > { %v286_v16 = vmax.f32 %v280_v14, 0.0  ;;  %v282_v17 = vadd.f32 %v281_v15, %v221_v12 }
  0xe7   : > { %v283_v18 = vpop.f32.mrf.mxu0 }
  0xe8   : > { %288 = vst [vmem:[%s211_s11] sm:$0xff] %v286_v16  ;;  %v287_v19 = vmax.f32 %v282_v17, 0.0 }
  0xe9   : > { %v284_v20 = vpop.f32.mrf.mxu0 }
  0xea   : > { %289 = vst [vmem:[%s211_s11 + $0x8] sm:$0xff] %v287_v19 }
  0xeb PF: > { %p10_p9 = scmp.ge.s32.totalorder %s462_s16, 4   ;;  %s507_s12 = smov %s417_s13 }
  0xec   : > { %s508_s13 = smov %s471_s19  ;;  %s509_s14 = smov %s462_s16 }
  0xed   :  { %12 = sbr.rel (!%p10_p9) target bundleno = 2 (0x2), region = 105 }

// kernel: net_forward.9
= control target key start
LH: loop header
LB: loop body
LE: loop exit
PB: predicated region body
PF: predicated region fallthrough
CT: control target
= control target key end

     0   :  { %vm74_vm0 = vcmask 1043456   ;;  %v164_v0 = vmov 0.0   ;;  %vm165_vm1 = vmmov 0   ;;  %v166_v3 = vmov 0   ;;  %s217_s1 = inlined_call_operand.vmem [shape: bf16[72,128], index: 1, kind: input, shape index: {}]   ;;  %s218_s2 = inlined_call_operand.vmem [shape: f32[16,1], index: 2, kind: input, shape index: {}]   ;;  %s219_s0 = inlined_call_operand.vmem [shape: bf16[16,72], index: 0, kind: input, shape index: {}]   ;;  %s220_s3 = inlined_call_operand.vmem [shape: f32[16,128], index: 3, kind: output, shape index: {}]  }
   0x1   :  { %140 = vmatprep.subr.bf16.mxu0 %v164_v0  ;;  %v158_v1 = vld [vmem:[%s217_s1 + $0x20] ss:$0 sps:$4 sm:$0xff]   ;;  %150 = vmatprep.mubr.msk.bf16.mxu0 %vm165_vm1, %v164_v0  ;;  %v159_v4 = vld [vmem:[%s217_s1 + $0x18] sm:$0xff]   ;;  %v160_v6 = vld [vmem:[%s217_s1 + $0x10] sm:$0xff]   ;;  %vm70_vm2 = vcmask 588800  }
   0x2   :  { %v76_v2 = vsel %vm74_vm0, %v158_v1, 0  ;;  %157 = vset.pattern.permute.xlu0 %v166_v3  ;;  %v26_v5 = vld [vmem:[%s218_s2] sm:$0xff]  ;;  %v27_v7 = vld [vmem:[%s218_s2 + $0x8] sm:$0xff] }
   0x3   :  { %141 = vmatpush3.bf16.msra.mxu0 %v76_v2  ;;  %30 = vperm.xlu0 %157, %v26_v5   ;;  %v161_v8 = vld [vmem:[%s217_s1 + $0x8] sm:$0xff]   ;;  %v162_v9 = vld [vmem:[%s217_s1] sm:$0xff]  }
   0x4   :  { %142 = vmatprep.subr.bf16.mxu0 %v164_v0  ;;  %v163_v10 = vld [vmem:[%s219_s0] sm:$0xff]  }
   0x7   :  { %143 = vmatpush3.bf16.msra.mxu0 %v159_v4  ;;  %35 = vperm.xlu0 %157, %v27_v7  }
   0x8   :  { %144 = vmatprep.subr.bf16.mxu0 %v164_v0 }
   0xb   :  { %145 = vmatpush3.bf16.msra.mxu0 %v160_v6 }
   0xc   :  { %146 = vmatprep.subr.bf16.mxu0 %v164_v0 }
   0xf   :  { %147 = vmatpush3.bf16.msra.mxu0 %v161_v8 }
  0x10   :  { %148 = vmatprep.subr.bf16.mxu0 %v164_v0 }
  0x13   :  { %149 = vmatpush3.bf16.msra.mxu0 %v162_v9 }
  0x16   :  { %151 = vmatmul.mubr.msk.bf16.vlgmr.msra.gmra.mxu0 %vm70_vm2, %v163_v10 }
  0x7e   :  { %v31_v11 = vpop.permute.xlu0 %30 }
  0x82   :  { %v36_v16 = vpop.permute.xlu0 %35 }
  0xd6   :  { %v112_v12 = vpop.f32.mrf.mxu0 }
  0xd7   :  { %v113_v13 = vadd.f32 %v112_v12, %v31_v11 }
  0xd8   :  { %v152_v14 = vpop.f32.mrf.mxu0 }
  0xd9   :  { %v119_v15 = vmax.f32 %v113_v13, 0.0 }
  0xda   :  { %v115_v17 = vpop.f32.mrf.mxu0 }
  0xdb   :  { %121 = vst [vmem:[%s220_s3] sm:$0xff] %v119_v15  ;;  %v116_v18 = vadd.f32 %v115_v17, %v36_v16 }
  0xdc   :  { %v153_v19 = vpop.f32.mrf.mxu0 }
  0xdd   :  { %v120_v20 = vmax.f32 %v116_v18, 0.0 }
  0xdf   :  { %122 = vst [vmem:[%s220_s3 + $0x8] sm:$0xff] %v120_v20 }

// kernel: net_forward.10
= control target key start
LH: loop header
LB: loop body
LE: loop exit
PB: predicated region body
PF: predicated region fallthrough
CT: control target
= control target key end

     0   :  { %v253_v0 = vmov 0   ;;  %vm133_vm0 = vcmask 130048   ;;  %vm193_vm1 = vcmask 261120   ;;  %s341_s1 = inlined_call_operand.vmem [shape: bf16[144,32], index: 1, kind: input, shape index: {}]   ;;  %s342_s0 = inlined_call_operand.vmem [shape: bf16[32,144], index: 0, kind: input, shape index: {}]   ;;  %s343_s2 = inlined_call_operand.vmem [shape: f32[32,1], index: 2, kind: input, shape index: {}]   ;;  %s344_s3 = inlined_call_operand.vmem [shape: f32[32,32], index: 3, kind: output, shape index: {}]  }
   0x1   :  { %140 = vmatprep.subr.bf16.mxu0 %v253_v0  ;;  %217 = vmatprep.subr.bf16.mxu1 %v253_v0  ;;  %v238_v1 = vld [vmem:[%s341_s1 + $0x38] sm:$0xff]   ;;  %v239_v2 = vld [vmem:[%s341_s1 + $0x30] sm:$0xff]   ;;  %v240_v3 = vld [vmem:[%s341_s1 + $0x28] sm:$0xff]  }
   0x2   :  { %237 = vset.pattern.permute.xlu1 %v253_v0  ;;  %236 = vset.pattern.permute.xlu0 %v253_v0  ;;  %v241_v4 = vld [vmem:[%s341_s1 + $0x20] sm:$0xff]   ;;  %v252_v6 = vld [vmem:[%s342_s0 + $0x14] ss:$8 sps:$4 sm:$0xff]   ;;  %v38_v11 = vld [vmem:[%s343_s2 + $0x8] sm:$0xff] }
   0x3   :  { %141 = vmatpush1.bf16.msra.mxu0 %v238_v1  ;;  %226 = vmatpush1.bf16.msra.mxu1 %v238_v1  ;;  %v249_v5 = vld [vmem:[%s342_s0 + $0x4] ss:$8 sps:$4 sm:$0xff]   ;;  %v39_v7 = vld [vmem:[%s343_s2 + $0x10] sm:$0xff]  ;;  %v40_v9 = vld [vmem:[%s343_s2 + $0x18] sm:$0xff] }
   0x4   :  { %142 = vmatprep.subr.bf16.mxu0 %v253_v0  ;;  %218 = vmatprep.subr.bf16.mxu1 %v253_v0  ;;  %v37_v8 = vld [vmem:[%s343_s2] sm:$0xff]  ;;  %v242_v10 = vld [vmem:[%s341_s1 + $0x18] sm:$0xff]   ;;  %v243_v12 = vld [vmem:[%s341_s1 + $0x10] sm:$0xff]  }
   0x5   :  { %215 = vmatprep.mubr.msk.bf16.mxu0 %vm133_vm0, %v249_v5  ;;  %53 = vperm.xlu1 %237, %v39_v7   ;;  %v244_v13 = vld [vmem:[%s341_s1 + $0x8] sm:$0xff]   ;;  %v245_v14 = vld [vmem:[%s341_s1] sm:$0xff]   ;;  %v250_v17 = vld [vmem:[%s342_s0 + $0x10] ss:$8 sps:$4 sm:$0xff]  }
   0x6   :  { %216 = vmatprep.mubr.msk.bf16.mxu1 %vm133_vm0, %v252_v6  ;;  %43 = vperm.xlu0 %236, %v37_v8   ;;  %v246_v15 = vld [vmem:[%s341_s1 + $0x40] sm:$0xff]  }
   0x7   :  { %143 = vmatpush1.bf16.msra.mxu0 %v239_v2  ;;  %227 = vmatpush1.bf16.msra.mxu1 %v239_v2  ;;  %v247_v16 = vld [vmem:[%s342_s0] ss:$8 sps:$4 sm:$0xff]  }
   0x8   :  { %144 = vmatprep.subr.bf16.mxu0 %v253_v0  ;;  %219 = vmatprep.subr.bf16.mxu1 %v253_v0 }
   0x9   :  { %58 = vperm.xlu1 %237, %v40_v9  }
   0xa   :  { %48 = vperm.xlu0 %236, %v38_v11  }
   0xb   :  { %145 = vmatpush1.bf16.msra.mxu0 %v240_v3  ;;  %228 = vmatpush1.bf16.msra.mxu1 %v240_v3 }
   0xc   :  { %146 = vmatprep.subr.bf16.mxu0 %v253_v0  ;;  %220 = vmatprep.subr.bf16.mxu1 %v253_v0 }
   0xf   :  { %147 = vmatpush1.bf16.msra.mxu0 %v241_v4  ;;  %229 = vmatpush1.bf16.msra.mxu1 %v241_v4 }
  0x10   :  { %148 = vmatprep.subr.bf16.mxu0 %v253_v0  ;;  %221 = vmatprep.subr.bf16.mxu1 %v253_v0 }
  0x13   :  { %149 = vmatpush1.bf16.msra.mxu0 %v242_v10  ;;  %230 = vmatpush1.bf16.msra.mxu1 %v242_v10 }
  0x14   :  { %150 = vmatprep.subr.bf16.mxu0 %v253_v0  ;;  %222 = vmatprep.subr.bf16.mxu1 %v253_v0 }
  0x17   :  { %151 = vmatpush1.bf16.msra.mxu0 %v243_v12  ;;  %231 = vmatpush1.bf16.msra.mxu1 %v243_v12 }
  0x18   :  { %152 = vmatprep.subr.bf16.mxu0 %v253_v0  ;;  %223 = vmatprep.subr.bf16.mxu1 %v253_v0 }
  0x1b   :  { %153 = vmatpush1.bf16.msra.mxu0 %v244_v13  ;;  %232 = vmatpush1.bf16.msra.mxu1 %v244_v13 }
  0x1c   :  { %154 = vmatprep.subr.bf16.mxu0 %v253_v0  ;;  %224 = vmatprep.subr.bf16.mxu1 %v253_v0 }
  0x1f   :  { %155 = vmatpush1.bf16.msra.mxu0 %v245_v14  ;;  %233 = vmatpush1.bf16.msra.mxu1 %v245_v14 }
  0x20   :  { %170 = vmatprep.subr.bf16.mxu0 %v253_v0  ;;  %225 = vmatprep.subr.bf16.mxu1 %v253_v0 }
  0x23   :  { %171 = vmatpush2.bf16.msra.mxu0 %v246_v15  ;;  %234 = vmatpush2.bf16.msra.mxu1 %v246_v15 }
  0x26   :  { %173 = vmatmul.mubr.bf16.vlgmr.msra.gmra.mxu0 %v247_v16  ;;  %181 = vmatmul.mubr.bf16.vlgmr.msra.gmra.mxu1 %v250_v17 }
  0x80   :  { %v54_v18 = vpop.permute.xlu1 %53 }
  0x81   :  { %v44_v19 = vpop.permute.xlu0 %43 }
  0x84   :  { %v59_v26 = vpop.permute.xlu1 %58 }
  0x85   :  { %v49_v27 = vpop.permute.xlu0 %48 }
  0xe6   :  { %v174_v20 = vpop.f32.mrf.mxu0  ;;  %v182_v21 = vpop.f32.mrf.mxu1 }
  0xe7   :  { %v175_v22 = vadd.f32 %v174_v20, %v44_v19  ;;  %v183_v23 = vadd.f32 %v182_v21, %v54_v18 }
  0xe8   :  { %v176_v24 = vpop.f32.mrf.mxu0  ;;  %v184_v25 = vpop.f32.mrf.mxu1 }
  0xe9   :  { %v189_v28 = vmax.f32 %v175_v22, 0.0  ;;  %v191_v29 = vmax.f32 %v183_v23, 0.0 }
  0xea   :  { %v177_v30 = vpop.f32.mrf.mxu0  ;;  %v185_v31 = vpop.f32.mrf.mxu1 }
  0xeb   :  { %194 = vst.msk [vmem:[%s344_s3] sm:$0xff] %vm193_vm1, %v189_v28  ;;  %196 = vst.msk [vmem:[%s344_s3 + $0x10] sm:$0xff] %vm193_vm1, %v191_v29  ;;  %v178_v32 = vadd.f32 %v177_v30, %v49_v27  ;;  %v186_v33 = vadd.f32 %v185_v31, %v59_v26 }
  0xec   :  { %v179_v34 = vpop.f32.mrf.mxu0  ;;  %v187_v35 = vpop.f32.mrf.mxu1 }
  0xed   :  { %v190_v36 = vmax.f32 %v178_v32, 0.0  ;;  %v192_v37 = vmax.f32 %v186_v33, 0.0 }
  0xef   :  { %195 = vst.msk [vmem:[%s344_s3 + $0x8] sm:$0xff] %vm193_vm1, %v190_v36  ;;  %197 = vst.msk [vmem:[%s344_s3 + $0x18] sm:$0xff] %vm193_vm1, %v192_v37 }

// kernel: net_forward.11
= control target key start
LH: loop header
LB: loop body
LE: loop exit
PB: predicated region body
PF: predicated region fallthrough
CT: control target
= control target key end

     0   :  { %v592_v1 = vmov 0   ;;  %vm283_vm0 = vcmask 261120   ;;  %vm434_vm1 = vcmask 64512   ;;  %s763_s1 = inlined_call_operand.vmem [shape: bf16[288,8], index: 1, kind: input, shape index: {}]   ;;  %s764_s0 = inlined_call_operand.vmem [shape: bf16[64,288], index: 0, kind: input, shape index: {}]   ;;  %s765_s2 = inlined_call_operand.vmem [shape: f32[64,1], index: 2, kind: input, shape index: {}]   ;;  %s766_s3 = inlined_call_operand.vmem [shape: f32[64,8], index: 3, kind: output, shape index: {}]  }
   0x1   :  { %v558_v0 = vld [vmem:[%s763_s1 + $0x78] sm:$0xff]   ;;  %556 = vset.pattern.permute.xlu0 %v592_v1  ;;  %557 = vset.pattern.permute.xlu1 %v592_v1  ;;  %v560_v3 = vld [vmem:[%s763_s1 + $0x70] sm:$0xff]   ;;  %v562_v5 = vld [vmem:[%s763_s1 + $0x68] sm:$0xff]  }
   0x2   :  { %v559_v2 = vld [vmem:[%s763_s1 + $0x38] sm:$0xff]   ;;  %481 = vmatprep.subr.bf16.mxu0 %v558_v0  ;;  %539 = vmatprep.subr.bf16.mxu1 %v558_v0  ;;  %v561_v4 = vld [vmem:[%s763_s1 + $0x30] sm:$0xff]   ;;  %v563_v6 = vld [vmem:[%s763_s1 + $0x28] sm:$0xff]  }
   0x3   :  { %482 = vmatpush3.bf16.msra.mxu0 %v559_v2  ;;  %547 = vmatpush3.bf16.msra.mxu1 %v559_v2  ;;  %v564_v7 = vld [vmem:[%s763_s1 + $0x60] sm:$0xff]   ;;  %v566_v9 = vld [vmem:[%s763_s1 + $0x58] sm:$0xff]   ;;  %v568_v11 = vld [vmem:[%s763_s1 + $0x50] sm:$0xff]  }
   0x4   :  { %483 = vmatprep.subr.bf16.mxu0 %v560_v3  ;;  %540 = vmatprep.subr.bf16.mxu1 %v560_v3  ;;  %v565_v8 = vld [vmem:[%s763_s1 + $0x20] sm:$0xff]   ;;  %v567_v10 = vld [vmem:[%s763_s1 + $0x18] sm:$0xff]   ;;  %v569_v14 = vld [vmem:[%s763_s1 + $0x10] sm:$0xff]  }
   0x5   :  { %v576_v12 = vld [vmem:[%s764_s0 + $0x4] ss:$12 sps:$4 sm:$0xff]   ;;  %v579_v13 = vld [vmem:[%s764_s0 + $0x4c] ss:$12 sps:$4 sm:$0xff]   ;;  %v577_v23 = vld [vmem:[%s764_s0 + $0x48] ss:$12 sps:$4 sm:$0xff]  }
   0x6   :  { %v570_v15 = vld [vmem:[%s763_s1 + $0x48] sm:$0xff]   ;;  %328 = vmatprep.mubr.bf16.mxu0 %v576_v12  ;;  %352 = vmatprep.mubr.bf16.mxu1 %v579_v13  ;;  %v572_v17 = vld [vmem:[%s763_s1 + $0x40] sm:$0xff]   ;;  %v69_v20 = vld [vmem:[%s765_s2 + $0x10] sm:$0xff] }
   0x7   :  { %484 = vmatpush3.bf16.msra.mxu0 %v561_v4  ;;  %548 = vmatpush3.bf16.msra.mxu1 %v561_v4  ;;  %v571_v16 = vld [vmem:[%s763_s1 + $0x8] sm:$0xff]   ;;  %v573_v18 = vld [vmem:[%s763_s1] sm:$0xff]   ;;  %v70_v25 = vld [vmem:[%s765_s2 + $0x18] sm:$0xff] }
   0x8   :  { %485 = vmatprep.subr.bf16.mxu0 %v562_v5  ;;  %541 = vmatprep.subr.bf16.mxu1 %v562_v5  ;;  %v67_v19 = vld [vmem:[%s765_s2] sm:$0xff]  ;;  %v580_v21 = vld [vmem:[%s763_s1 + $0x88] sm:$0xff]   ;;  %v73_v33 = vld [vmem:[%s765_s2 + $0x30] sm:$0xff] }
   0x9   :  { %v574_v22 = vld [vmem:[%s764_s0] ss:$12 sps:$4 sm:$0xff]   ;;  %77 = vperm.xlu0 %556, %v67_v19   ;;  %87 = vperm.xlu1 %557, %v69_v20   ;;  %v582_v26 = vld [vmem:[%s764_s0 + $0x1c] ss:$12 sps:$4 sm:$0xff]   ;;  %v585_v31 = vld [vmem:[%s764_s0 + $0x18] ss:$12 sps:$4 sm:$0xff]  }
   0xa   :  { %v68_v24 = vld [vmem:[%s765_s2 + $0x8] sm:$0xff]  ;;  %v581_v27 = vld [vmem:[%s763_s1 + $0x80] sm:$0xff]   ;;  %v74_v34 = vld [vmem:[%s765_s2 + $0x38] sm:$0xff] }
   0xb   :  { %486 = vmatpush3.bf16.msra.mxu0 %v563_v6  ;;  %549 = vmatpush3.bf16.msra.mxu1 %v563_v6  ;;  %v584_v28 = vld [vmem:[%s764_s0 + $0x8] ss:$12 sps:$4 sm:$0xff]   ;;  %v71_v29 = vld [vmem:[%s765_s2 + $0x20] sm:$0xff]  ;;  %v590_v37 = vld [vmem:[%s764_s0 + $0x30] ss:$12 sps:$4 sm:$0xff]  }
   0xc   :  { %487 = vmatprep.subr.bf16.mxu0 %v564_v7  ;;  %542 = vmatprep.subr.bf16.mxu1 %v564_v7  ;;  %v72_v30 = vld [vmem:[%s765_s2 + $0x28] sm:$0xff]  ;;  %v587_v35 = vld [vmem:[%s764_s0 + $0x34] ss:$12 sps:$4 sm:$0xff]   ;;  %v589_v36 = vld [vmem:[%s764_s0 + $0x38] ss:$12 sps:$4 sm:$0xff]  }
   0xd   :  { %82 = vperm.xlu0 %556, %v68_v24   ;;  %92 = vperm.xlu1 %557, %v70_v25   ;;  %v586_v32 = vld [vmem:[%s764_s0 + $0x20] ss:$12 sps:$4 sm:$0xff]   ;;  %v591_v38 = vld [vmem:[%s764_s0 + $0x50] ss:$12 sps:$4 sm:$0xff]  }
   0xf   :  { %488 = vmatpush3.bf16.msra.mxu0 %v565_v8  ;;  %550 = vmatpush3.bf16.msra.mxu1 %v565_v8 }
  0x10   :  { %489 = vmatprep.subr.bf16.mxu0 %v566_v9  ;;  %543 = vmatprep.subr.bf16.mxu1 %v566_v9 }
  0x11   :  { %97 = vperm.xlu0 %556, %v71_v29   ;;  %102 = vperm.xlu1 %557, %v72_v30  }
  0x13   :  { %490 = vmatpush3.bf16.msra.mxu0 %v567_v10  ;;  %551 = vmatpush3.bf16.msra.mxu1 %v567_v10 }
  0x14   :  { %491 = vmatprep.subr.bf16.mxu0 %v568_v11  ;;  %544 = vmatprep.subr.bf16.mxu1 %v568_v11 }
  0x15   :  { %107 = vperm.xlu0 %556, %v73_v33   ;;  %112 = vperm.xlu1 %557, %v74_v34  }
  0x17   :  { %492 = vmatpush3.bf16.msra.mxu0 %v569_v14  ;;  %552 = vmatpush3.bf16.msra.mxu1 %v569_v14 }
  0x18   :  { %493 = vmatprep.subr.bf16.mxu0 %v570_v15  ;;  %545 = vmatprep.subr.bf16.mxu1 %v570_v15 }
  0x1b   :  { %494 = vmatpush3.bf16.msra.mxu0 %v571_v16  ;;  %553 = vmatpush3.bf16.msra.mxu1 %v571_v16 }
  0x1c   :  { %495 = vmatprep.subr.bf16.mxu0 %v572_v17  ;;  %546 = vmatprep.subr.bf16.mxu1 %v572_v17 }
  0x1f   :  { %496 = vmatpush3.bf16.msra.mxu0 %v573_v18  ;;  %554 = vmatpush3.bf16.msra.mxu1 %v573_v18 }
  0x20   :  { %527 = vmatprep.subr.bf16.mxu1 %v580_v21 }
  0x22   :  { %329 = vmatmul.mubr.bf16.vlgmr.msra.gmra.mxu0 %v574_v22  ;;  %353 = vmatmul.mubr.bf16.vlgmr.msra.gmra.mxu1 %v577_v23 }
  0x23   :  { %528 = vmatpush3.bf16.msra.mxu1 %v580_v21  ;;  %336 = vmatprep.mubr.bf16.mxu0 %v582_v26 }
  0x24   :  { %529 = vmatprep.subr.bf16.mxu1 %v581_v27  ;;  %531 = vmatprep.mubr.msk.bf16.mxu1 %vm283_vm0, %v584_v28 }
  0x27   :  { %530 = vmatpush3.bf16.msra.mxu1 %v581_v27 }
  0x2a   :  { %337 = vmatmul.mubr.bf16.gmra.mxu0 %v585_v31  ;;  %532 = vmatmul.mubr.msk.bf16.vlgmr.msra.gmra.mxu1 %vm283_vm0, %v586_v32 }
  0x2b   :  { %344 = vmatprep.mubr.bf16.mxu0 %v587_v35  ;;  %535 = vmatprep.mubr.msk.bf16.mxu1 %vm283_vm0, %v589_v36 }
  0x32   :  { %345 = vmatmul.mubr.bf16.gmra.mxu0 %v590_v37  ;;  %536 = vmatmul.mubr.msk.bf16.gmra.mxu1 %vm283_vm0, %v591_v38 }
  0x84   :  { %v78_v39 = vpop.permute.xlu0 %77  ;;  %v88_v40 = vpop.permute.xlu1 %87 }
  0x88   :  { %v83_v41 = vpop.permute.xlu0 %82  ;;  %v93_v46 = vpop.permute.xlu1 %92 }
  0x8c   :  { %v98_v49 = vpop.permute.xlu0 %97  ;;  %v103_v55 = vpop.permute.xlu1 %102 }
  0x90   :  { %v108_v61 = vpop.permute.xlu0 %107  ;;  %v113_v9 = vpop.permute.xlu1 %112 }
  0xe2   :  { %v497_v42 = vpop.f32.mrf.mxu0  ;;  %v515_v43 = vpop.f32.mrf.mxu1 }
  0xe4   :  { %v498_v44 = vpop.f32.mrf.mxu0  ;;  %v516_v45 = vpop.f32.mrf.mxu1 }
  0xe5   :  { %v499_v50 = vadd.f32 %v498_v44, %v497_v42  ;;  %v517_v58 = vadd.f32 %v516_v45, %v515_v43 }
  0xe6   :  { %v500_v47 = vpop.f32.mrf.mxu0  ;;  %v518_v48 = vpop.f32.mrf.mxu1 }
  0xe7   :  { %v331_v57 = vadd.f32 %v499_v50, %v78_v39  ;;  %v355_v5 = vadd.f32 %v517_v58, %v108_v61 }
  0xe8   :  { %v501_v51 = vpop.f32.mrf.mxu0  ;;  %v519_v52 = vpop.f32.mrf.mxu1 }
  0xe9   :  { %v502_v56 = vadd.f32 %v501_v51, %v500_v47  ;;  %v520_v8 = vadd.f32 %v519_v52, %v518_v48 }
  0xea   :  { %v503_v53 = vpop.f32.mrf.mxu0  ;;  %v533_v54 = vpop.f32.mrf.mxu1 }
  0xeb   :  { %v334_v4 = vadd.f32 %v502_v56, %v83_v41  ;;  %v358_v21 = vadd.f32 %v520_v8, %v113_v9 }
  0xec   :  { %v504_v59 = vpop.f32.mrf.mxu0  ;;  %v395_v60 = vpop.f32.mrf.mxu1 }
  0xed   :  { %v505_v62 = vadd.f32 %v504_v59, %v503_v53  ;;  %v396_v63 = vadd.f32 %v395_v60, %v331_v57 }
  0xee   :  { %v506_v0 = vpop.f32.mrf.mxu0  ;;  %v534_v1 = vpop.f32.mrf.mxu1 }
  0xef   :  { %v339_v2 = vadd.f32 %v505_v62, %v88_v40  ;;  %v426_v3 = vmax.f32 %v396_v63, 0.0 }
  0xf0   :  { %v507_v6 = vpop.f32.mrf.mxu0  ;;  %v398_v7 = vpop.f32.mrf.mxu1 }
  0xf1   :  { %v404_v10 = vadd.f32 %v533_v54, %v339_v2  ;;  %435 = vst.msk [vmem:[%s766_s3] sm:$0xff] %vm434_vm1, %v426_v3  ;;  %v508_v11 = vadd.f32 %v507_v6, %v506_v0  ;;  %v399_v12 = vadd.f32 %v398_v7, %v334_v4 }
  0xf2   :  { %v509_v13 = vpop.f32.mrf.mxu0  ;;  %v537_v14 = vpop.f32.mrf.mxu1 }
  0xf3   :  { %v428_v15 = vmax.f32 %v404_v10, 0.0  ;;  %v342_v16 = vadd.f32 %v508_v11, %v93_v46  ;;  %v427_v17 = vmax.f32 %v399_v12, 0.0  ;;  %v420_v18 = vadd.f32 %v537_v14, %v355_v5 }
  0xf4   :  { %v510_v19 = vpop.f32.mrf.mxu0  ;;  %v411_v20 = vpop.f32.mrf.mxu1 }
  0xf5   :  { %437 = vst.msk [vmem:[%s766_s3 + $0x10] sm:$0xff] %vm434_vm1, %v428_v15  ;;  %v407_v22 = vadd.f32 %v534_v1, %v342_v16  ;;  %436 = vst.msk [vmem:[%s766_s3 + $0x8] sm:$0xff] %vm434_vm1, %v427_v17  ;;  %v432_v23 = vmax.f32 %v420_v18, 0.0  ;;  %v511_v24 = vadd.f32 %v510_v19, %v509_v13 }
  0xf6   :  { %v512_v25 = vpop.f32.mrf.mxu0  ;;  %v538_v26 = vpop.f32.mrf.mxu1 }
  0xf7   :  { %v429_v27 = vmax.f32 %v407_v22, 0.0  ;;  %441 = vst.msk [vmem:[%s766_s3 + $0x30] sm:$0xff] %vm434_vm1, %v432_v23  ;;  %v347_v28 = vadd.f32 %v511_v24, %v98_v49  ;;  %v423_v29 = vadd.f32 %v538_v26, %v358_v21 }
  0xf8   :  { %v513_v30 = vpop.f32.mrf.mxu0  ;;  %v414_v36 = vpop.f32.mrf.mxu1 }
  0xf9   :  { %438 = vst.msk [vmem:[%s766_s3 + $0x18] sm:$0xff] %vm434_vm1, %v429_v27  ;;  %v412_v31 = vadd.f32 %v411_v20, %v347_v28  ;;  %v433_v32 = vmax.f32 %v423_v29, 0.0  ;;  %v514_v33 = vadd.f32 %v513_v30, %v512_v25 }
  0xfb   :  { %v430_v34 = vmax.f32 %v412_v31, 0.0  ;;  %442 = vst.msk [vmem:[%s766_s3 + $0x38] sm:$0xff] %vm434_vm1, %v433_v32  ;;  %v350_v35 = vadd.f32 %v514_v33, %v103_v55 }
  0xfd   :  { %439 = vst.msk [vmem:[%s766_s3 + $0x20] sm:$0xff] %vm434_vm1, %v430_v34  ;;  %v415_v37 = vadd.f32 %v414_v36, %v350_v35 }
  0xff   :  { %v431_v38 = vmax.f32 %v415_v37, 0.0 }
 0x101   :  { %440 = vst.msk [vmem:[%s766_s3 + $0x28] sm:$0xff] %vm434_vm1, %v431_v38 }

// kernel: tile.18
= control target key start
LH: loop header
LB: loop body
LE: loop exit
PB: predicated region body
PF: predicated region fallthrough
CT: control target
= control target key end

     0   :  { %s22_s0 = inlined_call_operand.vmem [shape: f32[32], index: 0, kind: input, shape index: {}]   ;;  %s23_s1 = inlined_call_operand.vmem [shape: f32[4,1,1,32], index: 1, kind: output, shape index: {}]  }
   0x1   :  { %v4_v0 = vld [vmem:[%s22_s0] ss:$0 sm:$0xff] }
   0x2   :  { %5 = vst [vmem:[%s23_s1] sm:$0xf] %v4_v0 }

// kernel: tile.0
= control target key start
LH: loop header
LB: loop body
LE: loop exit
PB: predicated region body
PF: predicated region fallthrough
CT: control target
= control target key end

     0   :  { %s547_s8 = smov 125   ;;  %s548_s9 = smov 126   ;;  %vm8_vm0 = vcmask 7168   ;;  %s1102_s0 = inlined_call_operand.vmem [shape: f32[4,1,1,32], index: 0, kind: input, shape index: {}]   ;;  %s1103_s1 = inlined_call_operand.vmem [shape: f32[128,1], index: 1, kind: output, shape index: {}]  }
   0x1   :  { %v5_v0 = vld [vmem:[%s1102_s0] sm:$0xf]  ;;  %s546_s0 = smov 127   ;;  %s549_s10 = smov 124  }
   0x2   :  { %6 = vst [vmem:[#allocation0] sm:$0xf] %v5_v0  ;;  %s550_s11 = smov 123   ;;  %s551_s12 = smov 122  }
   0x3   :  { %s552_s13 = smov 121   ;;  %s553_s14 = smov 120  }
   0x4   :  { %s554_s15 = smov 119   ;;  %s555_s16 = smov 118  }
   0x5   :  { %s556_s17 = smov 117   ;;  %s557_s18 = smov 116  }
   0x6   :  { %s558_s19 = smov 115   ;;  %s559_s20 = smov 114  }
   0x7   :  { %s560_s21 = smov 113   ;;  %s561_s22 = smov 112  }
   0x8   :  { %s562_s23 = smov 111   ;;  %s563_s24 = smov 110  }
   0x9   :  { %v16_v1 = vld [vmem:[#allocation0] sm:$0xf]   ;;  %s564_s25 = smov 109   ;;  %s565_s26 = smov 108  }
   0xa   :  { %v40_v2 = vld [vmem:[#allocation0] sm:$0xf]   ;;  %17 = vrot.lane.b32.xlu0 %v16_v1, %s546_s0  ;;  %s566_s27 = smov 107   ;;  %s567_s28 = smov 106  }
   0xb   :  { %41 = vrot.lane.b32.xlu1 %v40_v2, %s547_s8  ;;  %v28_v3 = vld [vmem:[#allocation0] sm:$0xf]   ;;  %s568_s29 = smov 105   ;;  %s569_s30 = smov 104  }
   0xc   :  { %v52_v4 = vld [vmem:[#allocation0] sm:$0xf]  }
   0xd   :  { %v64_v5 = vld [vmem:[#allocation0] sm:$0xf]  }
   0xe   :  { %29 = vrot.lane.b32.xlu0 %v28_v3, %s548_s9  ;;  %v76_v6 = vld [vmem:[#allocation0] sm:$0xf]   ;;  %s570_s9 = smov 103  }
   0xf   :  { %53 = vrot.lane.b32.xlu1 %v52_v4, %s549_s10  ;;  %v88_v7 = vld [vmem:[#allocation0] sm:$0xf]   ;;  %s571_s10 = smov 102  }
  0x10   :  { %v100_v8 = vld [vmem:[#allocation0] sm:$0xf]  }
  0x11   :  { %v112_v9 = vld [vmem:[#allocation0] sm:$0xf]  }
  0x12   :  { %65 = vrot.lane.b32.xlu0 %v64_v5, %s550_s11  ;;  %v124_v10 = vld [vmem:[#allocation0] sm:$0xf]   ;;  %s572_s11 = smov 101  }
  0x13   :  { %77 = vrot.lane.b32.xlu1 %v76_v6, %s551_s12  ;;  %v136_v11 = vld [vmem:[#allocation0] sm:$0xf]   ;;  %s573_s12 = smov 100  }
  0x14   :  { %v148_v12 = vld [vmem:[#allocation0] sm:$0xf]  }
  0x15   :  { %v160_v13 = vld [vmem:[#allocation0] sm:$0xf]  }
  0x16   :  { %89 = vrot.lane.b32.xlu0 %v88_v7, %s552_s13  ;;  %v172_v14 = vld [vmem:[#allocation0] sm:$0xf]   ;;  %s574_s13 = smov 99  }
  0x17   :  { %101 = vrot.lane.b32.xlu1 %v100_v8, %s553_s14  ;;  %v184_v15 = vld [vmem:[#allocation0] sm:$0xf]   ;;  %s575_s14 = smov 98  }
  0x18   :  { %v196_v16 = vld [vmem:[#allocation0] sm:$0xf]  }
  0x19   :  { %v208_v17 = vld [vmem:[#allocation0] sm:$0xf]  }
  0x1a   :  { %113 = vrot.lane.b32.xlu0 %v112_v9, %s554_s15  ;;  %v220_v18 = vld [vmem:[#allocation0] sm:$0xf]   ;;  %s576_s15 = smov 97  }
  0x1b   :  { %125 = vrot.lane.b32.xlu1 %v124_v10, %s555_s16  ;;  %v232_v19 = vld [vmem:[#allocation0] sm:$0xf]  }
  0x1c   :  { %v244_v20 = vld [vmem:[#allocation0] sm:$0xf]  }
  0x1d   :  { %v256_v21 = vld [vmem:[#allocation0] sm:$0xf]  }
  0x1e   :  { %137 = vrot.lane.b32.xlu0 %v136_v11, %s556_s17  ;;  %v268_v22 = vld [vmem:[#allocation0] sm:$0xf]  }
  0x1f   :  { %149 = vrot.lane.b32.xlu1 %v148_v12, %s557_s18  ;;  %v280_v23 = vld [vmem:[#allocation0] sm:$0xf]  }
  0x20   :  { %v292_v24 = vld [vmem:[#allocation0] sm:$0xf]  }
  0x21   :  { %v304_v25 = vld [vmem:[#allocation0] sm:$0xf]  }
  0x22   :  { %161 = vrot.lane.b32.xlu0 %v160_v13, %s558_s19  ;;  %v316_v26 = vld [vmem:[#allocation0] sm:$0xf]  }
  0x23   :  { %173 = vrot.lane.b32.xlu1 %v172_v14, %s559_s20  ;;  %v7_v27 = vld [vmem:[#allocation0] sm:$0xf]  }
  0x24   :  { %9 = vst.msk [vmem:[%s1103_s1] sm:$0x1] %vm8_vm0, %v7_v27   ;;  %388 = vst.msk [vmem:[%s1103_s1 + $0x1f] sm:$0x2] %vm8_vm0, %v7_v27   ;;  %v328_v28 = vld [vmem:[#allocation0] sm:$0xf]  }
  0x25   :  { %389 = vst.msk [vmem:[%s1103_s1 + $0x3e] sm:$0x4] %vm8_vm0, %v7_v27   ;;  %390 = vst.msk [vmem:[%s1103_s1 + $0x5d] sm:$0x8] %vm8_vm0, %v7_v27   ;;  %v340_v29 = vld [vmem:[#allocation0] sm:$0xf]  }
  0x26   :  { %185 = vrot.lane.b32.xlu0 %v184_v15, %s560_s21  ;;  %v352_v30 = vld [vmem:[#allocation0] sm:$0xf]  }
  0x27   :  { %197 = vrot.lane.b32.xlu1 %v196_v16, %s561_s22  ;;  %v364_v31 = vld [vmem:[#allocation0] sm:$0xf]  }
  0x28   :  { %v376_v32 = vld [vmem:[#allocation0] sm:$0xf]  }
  0x2a   :  { %209 = vrot.lane.b32.xlu0 %v208_v17, %s562_s23 }
  0x2b   :  { %221 = vrot.lane.b32.xlu1 %v220_v18, %s563_s24 }
  0x2e   :  { %233 = vrot.lane.b32.xlu0 %v232_v19, %s564_s25 }
  0x2f   :  { %245 = vrot.lane.b32.xlu1 %v244_v20, %s565_s26 }
  0x32   :  { %257 = vrot.lane.b32.xlu0 %v256_v21, %s566_s27 }
  0x33   :  { %269 = vrot.lane.b32.xlu1 %v268_v22, %s567_s28 }
  0x36   :  { %281 = vrot.lane.b32.xlu0 %v280_v23, %s568_s29 }
  0x37   :  { %293 = vrot.lane.b32.xlu1 %v292_v24, %s569_s30 }
  0x3a   :  { %305 = vrot.lane.b32.xlu0 %v304_v25, %s570_s9 }
  0x3b   :  { %317 = vrot.lane.b32.xlu1 %v316_v26, %s571_s10 }
  0x3e   :  { %329 = vrot.lane.b32.xlu0 %v328_v28, %s572_s11 }
  0x3f   :  { %341 = vrot.lane.b32.xlu1 %v340_v29, %s573_s12 }
  0x42   :  { %353 = vrot.lane.b32.xlu0 %v352_v30, %s574_s13 }
  0x43   :  { %365 = vrot.lane.b32.xlu1 %v364_v31, %s575_s14 }
  0x46   :  { %377 = vrot.lane.b32.xlu0 %v376_v32, %s576_s15 }
  0x7c   :  { %v18_v33 = vpop.permute.xlu0 %17  }
  0x7d   :  { %v42_v34 = vpop.permute.xlu1 %41   ;;  %391 = vst.msk [vmem:[%s1103_s1 + $0x1] sm:$0x1] %vm8_vm0, %v18_v33   ;;  %392 = vst.msk [vmem:[%s1103_s1 + $0x20] sm:$0x2] %vm8_vm0, %v18_v33  }
  0x7e   :  { %393 = vst.msk [vmem:[%s1103_s1 + $0x3f] sm:$0x4] %vm8_vm0, %v18_v33   ;;  %394 = vst.msk [vmem:[%s1103_s1 + $0x5e] sm:$0x8] %vm8_vm0, %v18_v33  }
  0x7f   :  { %399 = vst.msk [vmem:[%s1103_s1 + $0x3] sm:$0x1] %vm8_vm0, %v42_v34   ;;  %400 = vst.msk [vmem:[%s1103_s1 + $0x22] sm:$0x2] %vm8_vm0, %v42_v34  }
  0x80   :  { %401 = vst.msk [vmem:[%s1103_s1 + $0x41] sm:$0x4] %vm8_vm0, %v42_v34   ;;  %402 = vst.msk [vmem:[%s1103_s1 + $0x60] sm:$0x8] %vm8_vm0, %v42_v34   ;;  %v30_v35 = vpop.permute.xlu0 %29  }
  0x81   :  { %v54_v36 = vpop.permute.xlu1 %53   ;;  %395 = vst.msk [vmem:[%s1103_s1 + $0x2] sm:$0x1] %vm8_vm0, %v30_v35   ;;  %396 = vst.msk [vmem:[%s1103_s1 + $0x21] sm:$0x2] %vm8_vm0, %v30_v35  }
  0x82   :  { %397 = vst.msk [vmem:[%s1103_s1 + $0x40] sm:$0x4] %vm8_vm0, %v30_v35   ;;  %398 = vst.msk [vmem:[%s1103_s1 + $0x5f] sm:$0x8] %vm8_vm0, %v30_v35  }
  0x83   :  { %403 = vst.msk [vmem:[%s1103_s1 + $0x4] sm:$0x1] %vm8_vm0, %v54_v36   ;;  %404 = vst.msk [vmem:[%s1103_s1 + $0x23] sm:$0x2] %vm8_vm0, %v54_v36  }
  0x84   :  { %405 = vst.msk [vmem:[%s1103_s1 + $0x42] sm:$0x4] %vm8_vm0, %v54_v36   ;;  %406 = vst.msk [vmem:[%s1103_s1 + $0x61] sm:$0x8] %vm8_vm0, %v54_v36   ;;  %v66_v37 = vpop.permute.xlu0 %65  }
  0x85   :  { %v78_v38 = vpop.permute.xlu1 %77   ;;  %407 = vst.msk [vmem:[%s1103_s1 + $0x5] sm:$0x1] %vm8_vm0, %v66_v37   ;;  %408 = vst.msk [vmem:[%s1103_s1 + $0x24] sm:$0x2] %vm8_vm0, %v66_v37  }
  0x86   :  { %409 = vst.msk [vmem:[%s1103_s1 + $0x43] sm:$0x4] %vm8_vm0, %v66_v37   ;;  %410 = vst.msk [vmem:[%s1103_s1 + $0x62] sm:$0x8] %vm8_vm0, %v66_v37  }
  0x87   :  { %411 = vst.msk [vmem:[%s1103_s1 + $0x6] sm:$0x1] %vm8_vm0, %v78_v38   ;;  %412 = vst.msk [vmem:[%s1103_s1 + $0x25] sm:$0x2] %vm8_vm0, %v78_v38  }
  0x88   :  { %413 = vst.msk [vmem:[%s1103_s1 + $0x44] sm:$0x4] %vm8_vm0, %v78_v38   ;;  %414 = vst.msk [vmem:[%s1103_s1 + $0x63] sm:$0x8] %vm8_vm0, %v78_v38   ;;  %v90_v39 = vpop.permute.xlu0 %89  }
  0x89   :  { %v102_v40 = vpop.permute.xlu1 %101   ;;  %415 = vst.msk [vmem:[%s1103_s1 + $0x7] sm:$0x1] %vm8_vm0, %v90_v39   ;;  %416 = vst.msk [vmem:[%s1103_s1 + $0x26] sm:$0x2] %vm8_vm0, %v90_v39  }
  0x8a   :  { %417 = vst.msk [vmem:[%s1103_s1 + $0x45] sm:$0x4] %vm8_vm0, %v90_v39   ;;  %418 = vst.msk [vmem:[%s1103_s1 + $0x64] sm:$0x8] %vm8_vm0, %v90_v39  }
  0x8b   :  { %419 = vst.msk [vmem:[%s1103_s1 + $0x8] sm:$0x1] %vm8_vm0, %v102_v40   ;;  %420 = vst.msk [vmem:[%s1103_s1 + $0x27] sm:$0x2] %vm8_vm0, %v102_v40  }
  0x8c   :  { %421 = vst.msk [vmem:[%s1103_s1 + $0x46] sm:$0x4] %vm8_vm0, %v102_v40   ;;  %422 = vst.msk [vmem:[%s1103_s1 + $0x65] sm:$0x8] %vm8_vm0, %v102_v40   ;;  %v114_v41 = vpop.permute.xlu0 %113  }
  0x8d   :  { %v126_v42 = vpop.permute.xlu1 %125   ;;  %423 = vst.msk [vmem:[%s1103_s1 + $0x9] sm:$0x1] %vm8_vm0, %v114_v41   ;;  %424 = vst.msk [vmem:[%s1103_s1 + $0x28] sm:$0x2] %vm8_vm0, %v114_v41  }
  0x8e   :  { %425 = vst.msk [vmem:[%s1103_s1 + $0x47] sm:$0x4] %vm8_vm0, %v114_v41   ;;  %426 = vst.msk [vmem:[%s1103_s1 + $0x66] sm:$0x8] %vm8_vm0, %v114_v41  }
  0x8f   :  { %427 = vst.msk [vmem:[%s1103_s1 + $0xa] sm:$0x1] %vm8_vm0, %v126_v42   ;;  %428 = vst.msk [vmem:[%s1103_s1 + $0x29] sm:$0x2] %vm8_vm0, %v126_v42  }
  0x90   :  { %429 = vst.msk [vmem:[%s1103_s1 + $0x48] sm:$0x4] %vm8_vm0, %v126_v42   ;;  %430 = vst.msk [vmem:[%s1103_s1 + $0x67] sm:$0x8] %vm8_vm0, %v126_v42   ;;  %v138_v43 = vpop.permute.xlu0 %137  }
  0x91   :  { %v150_v44 = vpop.permute.xlu1 %149   ;;  %431 = vst.msk [vmem:[%s1103_s1 + $0xb] sm:$0x1] %vm8_vm0, %v138_v43   ;;  %432 = vst.msk [vmem:[%s1103_s1 + $0x2a] sm:$0x2] %vm8_vm0, %v138_v43  }
  0x92   :  { %433 = vst.msk [vmem:[%s1103_s1 + $0x49] sm:$0x4] %vm8_vm0, %v138_v43   ;;  %434 = vst.msk [vmem:[%s1103_s1 + $0x68] sm:$0x8] %vm8_vm0, %v138_v43  }
  0x93   :  { %435 = vst.msk [vmem:[%s1103_s1 + $0xc] sm:$0x1] %vm8_vm0, %v150_v44   ;;  %436 = vst.msk [vmem:[%s1103_s1 + $0x2b] sm:$0x2] %vm8_vm0, %v150_v44  }
  0x94   :  { %437 = vst.msk [vmem:[%s1103_s1 + $0x4a] sm:$0x4] %vm8_vm0, %v150_v44   ;;  %438 = vst.msk [vmem:[%s1103_s1 + $0x69] sm:$0x8] %vm8_vm0, %v150_v44   ;;  %v162_v45 = vpop.permute.xlu0 %161  }
  0x95   :  { %v174_v46 = vpop.permute.xlu1 %173   ;;  %439 = vst.msk [vmem:[%s1103_s1 + $0xd] sm:$0x1] %vm8_vm0, %v162_v45   ;;  %440 = vst.msk [vmem:[%s1103_s1 + $0x2c] sm:$0x2] %vm8_vm0, %v162_v45  }
  0x96   :  { %441 = vst.msk [vmem:[%s1103_s1 + $0x4b] sm:$0x4] %vm8_vm0, %v162_v45   ;;  %442 = vst.msk [vmem:[%s1103_s1 + $0x6a] sm:$0x8] %vm8_vm0, %v162_v45  }
  0x97   :  { %443 = vst.msk [vmem:[%s1103_s1 + $0xe] sm:$0x1] %vm8_vm0, %v174_v46   ;;  %444 = vst.msk [vmem:[%s1103_s1 + $0x2d] sm:$0x2] %vm8_vm0, %v174_v46  }
  0x98   :  { %445 = vst.msk [vmem:[%s1103_s1 + $0x4c] sm:$0x4] %vm8_vm0, %v174_v46   ;;  %446 = vst.msk [vmem:[%s1103_s1 + $0x6b] sm:$0x8] %vm8_vm0, %v174_v46   ;;  %v186_v47 = vpop.permute.xlu0 %185  }
  0x99   :  { %v198_v48 = vpop.permute.xlu1 %197   ;;  %447 = vst.msk [vmem:[%s1103_s1 + $0xf] sm:$0x1] %vm8_vm0, %v186_v47   ;;  %448 = vst.msk [vmem:[%s1103_s1 + $0x2e] sm:$0x2] %vm8_vm0, %v186_v47  }
  0x9a   :  { %449 = vst.msk [vmem:[%s1103_s1 + $0x4d] sm:$0x4] %vm8_vm0, %v186_v47   ;;  %450 = vst.msk [vmem:[%s1103_s1 + $0x6c] sm:$0x8] %vm8_vm0, %v186_v47  }
  0x9b   :  { %451 = vst.msk [vmem:[%s1103_s1 + $0x10] sm:$0x1] %vm8_vm0, %v198_v48   ;;  %452 = vst.msk [vmem:[%s1103_s1 + $0x2f] sm:$0x2] %vm8_vm0, %v198_v48  }
  0x9c   :  { %453 = vst.msk [vmem:[%s1103_s1 + $0x4e] sm:$0x4] %vm8_vm0, %v198_v48   ;;  %454 = vst.msk [vmem:[%s1103_s1 + $0x6d] sm:$0x8] %vm8_vm0, %v198_v48   ;;  %v210_v49 = vpop.permute.xlu0 %209  }
  0x9d   :  { %v222_v50 = vpop.permute.xlu1 %221   ;;  %455 = vst.msk [vmem:[%s1103_s1 + $0x11] sm:$0x1] %vm8_vm0, %v210_v49   ;;  %456 = vst.msk [vmem:[%s1103_s1 + $0x30] sm:$0x2] %vm8_vm0, %v210_v49  }
  0x9e   :  { %457 = vst.msk [vmem:[%s1103_s1 + $0x4f] sm:$0x4] %vm8_vm0, %v210_v49   ;;  %458 = vst.msk [vmem:[%s1103_s1 + $0x6e] sm:$0x8] %vm8_vm0, %v210_v49  }
  0x9f   :  { %459 = vst.msk [vmem:[%s1103_s1 + $0x12] sm:$0x1] %vm8_vm0, %v222_v50   ;;  %460 = vst.msk [vmem:[%s1103_s1 + $0x31] sm:$0x2] %vm8_vm0, %v222_v50  }
  0xa0   :  { %461 = vst.msk [vmem:[%s1103_s1 + $0x50] sm:$0x4] %vm8_vm0, %v222_v50   ;;  %462 = vst.msk [vmem:[%s1103_s1 + $0x6f] sm:$0x8] %vm8_vm0, %v222_v50   ;;  %v234_v51 = vpop.permute.xlu0 %233  }
  0xa1   :  { %v246_v52 = vpop.permute.xlu1 %245   ;;  %463 = vst.msk [vmem:[%s1103_s1 + $0x13] sm:$0x1] %vm8_vm0, %v234_v51   ;;  %464 = vst.msk [vmem:[%s1103_s1 + $0x32] sm:$0x2] %vm8_vm0, %v234_v51  }
  0xa2   :  { %465 = vst.msk [vmem:[%s1103_s1 + $0x51] sm:$0x4] %vm8_vm0, %v234_v51   ;;  %466 = vst.msk [vmem:[%s1103_s1 + $0x70] sm:$0x8] %vm8_vm0, %v234_v51  }
  0xa3   :  { %467 = vst.msk [vmem:[%s1103_s1 + $0x14] sm:$0x1] %vm8_vm0, %v246_v52   ;;  %468 = vst.msk [vmem:[%s1103_s1 + $0x33] sm:$0x2] %vm8_vm0, %v246_v52  }
  0xa4   :  { %469 = vst.msk [vmem:[%s1103_s1 + $0x52] sm:$0x4] %vm8_vm0, %v246_v52   ;;  %470 = vst.msk [vmem:[%s1103_s1 + $0x71] sm:$0x8] %vm8_vm0, %v246_v52   ;;  %v258_v53 = vpop.permute.xlu0 %257  }
  0xa5   :  { %v270_v54 = vpop.permute.xlu1 %269   ;;  %471 = vst.msk [vmem:[%s1103_s1 + $0x15] sm:$0x1] %vm8_vm0, %v258_v53   ;;  %472 = vst.msk [vmem:[%s1103_s1 + $0x34] sm:$0x2] %vm8_vm0, %v258_v53  }
  0xa6   :  { %473 = vst.msk [vmem:[%s1103_s1 + $0x53] sm:$0x4] %vm8_vm0, %v258_v53   ;;  %474 = vst.msk [vmem:[%s1103_s1 + $0x72] sm:$0x8] %vm8_vm0, %v258_v53  }
  0xa7   :  { %475 = vst.msk [vmem:[%s1103_s1 + $0x16] sm:$0x1] %vm8_vm0, %v270_v54   ;;  %476 = vst.msk [vmem:[%s1103_s1 + $0x35] sm:$0x2] %vm8_vm0, %v270_v54  }
  0xa8   :  { %477 = vst.msk [vmem:[%s1103_s1 + $0x54] sm:$0x4] %vm8_vm0, %v270_v54   ;;  %478 = vst.msk [vmem:[%s1103_s1 + $0x73] sm:$0x8] %vm8_vm0, %v270_v54   ;;  %v282_v55 = vpop.permute.xlu0 %281  }
  0xa9   :  { %v294_v56 = vpop.permute.xlu1 %293   ;;  %479 = vst.msk [vmem:[%s1103_s1 + $0x17] sm:$0x1] %vm8_vm0, %v282_v55   ;;  %480 = vst.msk [vmem:[%s1103_s1 + $0x36] sm:$0x2] %vm8_vm0, %v282_v55  }
  0xaa   :  { %481 = vst.msk [vmem:[%s1103_s1 + $0x55] sm:$0x4] %vm8_vm0, %v282_v55   ;;  %482 = vst.msk [vmem:[%s1103_s1 + $0x74] sm:$0x8] %vm8_vm0, %v282_v55  }
  0xab   :  { %483 = vst.msk [vmem:[%s1103_s1 + $0x18] sm:$0x1] %vm8_vm0, %v294_v56   ;;  %484 = vst.msk [vmem:[%s1103_s1 + $0x37] sm:$0x2] %vm8_vm0, %v294_v56  }
  0xac   :  { %485 = vst.msk [vmem:[%s1103_s1 + $0x56] sm:$0x4] %vm8_vm0, %v294_v56   ;;  %486 = vst.msk [vmem:[%s1103_s1 + $0x75] sm:$0x8] %vm8_vm0, %v294_v56   ;;  %v306_v57 = vpop.permute.xlu0 %305  }
  0xad   :  { %v318_v58 = vpop.permute.xlu1 %317   ;;  %487 = vst.msk [vmem:[%s1103_s1 + $0x19] sm:$0x1] %vm8_vm0, %v306_v57   ;;  %488 = vst.msk [vmem:[%s1103_s1 + $0x38] sm:$0x2] %vm8_vm0, %v306_v57  }
  0xae   :  { %489 = vst.msk [vmem:[%s1103_s1 + $0x57] sm:$0x4] %vm8_vm0, %v306_v57   ;;  %490 = vst.msk [vmem:[%s1103_s1 + $0x76] sm:$0x8] %vm8_vm0, %v306_v57  }
  0xaf   :  { %491 = vst.msk [vmem:[%s1103_s1 + $0x1a] sm:$0x1] %vm8_vm0, %v318_v58   ;;  %492 = vst.msk [vmem:[%s1103_s1 + $0x39] sm:$0x2] %vm8_vm0, %v318_v58  }
  0xb0   :  { %493 = vst.msk [vmem:[%s1103_s1 + $0x58] sm:$0x4] %vm8_vm0, %v318_v58   ;;  %494 = vst.msk [vmem:[%s1103_s1 + $0x77] sm:$0x8] %vm8_vm0, %v318_v58   ;;  %v330_v59 = vpop.permute.xlu0 %329  }
  0xb1   :  { %v342_v60 = vpop.permute.xlu1 %341   ;;  %495 = vst.msk [vmem:[%s1103_s1 + $0x1b] sm:$0x1] %vm8_vm0, %v330_v59   ;;  %496 = vst.msk [vmem:[%s1103_s1 + $0x3a] sm:$0x2] %vm8_vm0, %v330_v59  }
  0xb2   :  { %497 = vst.msk [vmem:[%s1103_s1 + $0x59] sm:$0x4] %vm8_vm0, %v330_v59   ;;  %498 = vst.msk [vmem:[%s1103_s1 + $0x78] sm:$0x8] %vm8_vm0, %v330_v59  }
  0xb3   :  { %499 = vst.msk [vmem:[%s1103_s1 + $0x1c] sm:$0x1] %vm8_vm0, %v342_v60   ;;  %500 = vst.msk [vmem:[%s1103_s1 + $0x3b] sm:$0x2] %vm8_vm0, %v342_v60  }
  0xb4   :  { %501 = vst.msk [vmem:[%s1103_s1 + $0x5a] sm:$0x4] %vm8_vm0, %v342_v60   ;;  %502 = vst.msk [vmem:[%s1103_s1 + $0x79] sm:$0x8] %vm8_vm0, %v342_v60   ;;  %v354_v61 = vpop.permute.xlu0 %353  }
  0xb5   :  { %v366_v62 = vpop.permute.xlu1 %365   ;;  %503 = vst.msk [vmem:[%s1103_s1 + $0x1d] sm:$0x1] %vm8_vm0, %v354_v61   ;;  %504 = vst.msk [vmem:[%s1103_s1 + $0x3c] sm:$0x2] %vm8_vm0, %v354_v61  }
  0xb6   :  { %505 = vst.msk [vmem:[%s1103_s1 + $0x5b] sm:$0x4] %vm8_vm0, %v354_v61   ;;  %506 = vst.msk [vmem:[%s1103_s1 + $0x7a] sm:$0x8] %vm8_vm0, %v354_v61  }
  0xb7   :  { %507 = vst.msk [vmem:[%s1103_s1 + $0x1e] sm:$0x1] %vm8_vm0, %v366_v62   ;;  %508 = vst.msk [vmem:[%s1103_s1 + $0x3d] sm:$0x2] %vm8_vm0, %v366_v62  }
  0xb8   :  { %509 = vst.msk [vmem:[%s1103_s1 + $0x5c] sm:$0x4] %vm8_vm0, %v366_v62   ;;  %510 = vst.msk [vmem:[%s1103_s1 + $0x7b] sm:$0x8] %vm8_vm0, %v366_v62   ;;  %v378_v63 = vpop.permute.xlu0 %377  }
  0xb9   :  { %511 = vst.msk [vmem:[%s1103_s1 + $0x1f] sm:$0x1] %vm8_vm0, %v378_v63   ;;  %512 = vst.msk [vmem:[%s1103_s1 + $0x3e] sm:$0x2] %vm8_vm0, %v378_v63  }
  0xba   :  { %513 = vst.msk [vmem:[%s1103_s1 + $0x5d] sm:$0x4] %vm8_vm0, %v378_v63   ;;  %514 = vst.msk [vmem:[%s1103_s1 + $0x7c] sm:$0x8] %vm8_vm0, %v378_v63  }

// kernel: net_forward.12
= control target key start
LH: loop header
LB: loop body
LE: loop exit
PB: predicated region body
PF: predicated region fallthrough
CT: control target
= control target key end

     0   :  { %v1386_v1 = vmov 0   ;;  %vm650_vm0 = vcmask 523264   ;;  %vm1014_vm1 = vcmask 64512   ;;  %s1928_s1 = inlined_call_operand.vmem [shape: bf16[576,8], index: 1, kind: input, shape index: {}]   ;;  %s1929_s0 = inlined_call_operand.vmem [shape: bf16[128,576], index: 0, kind: input, shape index: {}]   ;;  %s1930_s2 = inlined_call_operand.vmem [shape: f32[128,1], index: 2, kind: input, shape index: {}]   ;;  %s1931_s3 = inlined_call_operand.vmem [shape: f32[128,8], index: 3, kind: input, shape index: {}]   ;;  %s1932_s4 = inlined_call_operand.vmem [shape: f32[128,8], index: 4, kind: output, shape index: {}]  }
   0x1   :  { %v1294_v0 = vld [vmem:[%s1928_s1 + $0x78] sm:$0xff]   ;;  %1292 = vset.pattern.permute.xlu0 %v1386_v1  ;;  %1293 = vset.pattern.permute.xlu1 %v1386_v1  ;;  %v1298_v5 = vld [vmem:[%s1928_s1 + $0x70] sm:$0xff]   ;;  %v1302_v9 = vld [vmem:[%s1928_s1 + $0x68] sm:$0xff]  }
   0x2   :  { %v1295_v2 = vld [vmem:[%s1928_s1 + $0xf8] sm:$0xff]   ;;  %1119 = vmatprep.subr.bf16.mxu0 %v1294_v0  ;;  %v1299_v6 = vld [vmem:[%s1928_s1 + $0xf0] sm:$0xff]   ;;  %v1303_v10 = vld [vmem:[%s1928_s1 + $0xe8] sm:$0xff]  }
   0x3   :  { %v1296_v3 = vld [vmem:[%s1928_s1 + $0x38] sm:$0xff]   ;;  %1183 = vmatprep.subr.bf16.mxu1 %v1295_v2  ;;  %v1300_v7 = vld [vmem:[%s1928_s1 + $0x30] sm:$0xff]   ;;  %v1304_v11 = vld [vmem:[%s1928_s1 + $0x28] sm:$0xff]  }
   0x4   :  { %v1297_v4 = vld [vmem:[%s1928_s1 + $0xb8] sm:$0xff]   ;;  %1120 = vmatpush3.bf16.msra.mxu0 %v1296_v3  ;;  %v1301_v8 = vld [vmem:[%s1928_s1 + $0xb0] sm:$0xff]   ;;  %v1305_v12 = vld [vmem:[%s1928_s1 + $0xa8] sm:$0xff]  }
   0x5   :  { %1184 = vmatpush3.bf16.msra.mxu1 %v1297_v4  ;;  %1121 = vmatprep.subr.bf16.mxu0 %v1298_v5  ;;  %v1306_v13 = vld [vmem:[%s1928_s1 + $0x60] sm:$0xff]   ;;  %v1310_v17 = vld [vmem:[%s1928_s1 + $0x58] sm:$0xff]   ;;  %v1314_v21 = vld [vmem:[%s1928_s1 + $0x50] sm:$0xff]  }
   0x6   :  { %1185 = vmatprep.subr.bf16.mxu1 %v1299_v6  ;;  %v1307_v14 = vld [vmem:[%s1928_s1 + $0xe0] sm:$0xff]   ;;  %v1311_v18 = vld [vmem:[%s1928_s1 + $0xd8] sm:$0xff]   ;;  %v1315_v22 = vld [vmem:[%s1928_s1 + $0xd0] sm:$0xff]  }
   0x7   :  { %v1308_v15 = vld [vmem:[%s1928_s1 + $0x20] sm:$0xff]   ;;  %v1312_v19 = vld [vmem:[%s1928_s1 + $0x18] sm:$0xff]   ;;  %v1316_v23 = vld [vmem:[%s1928_s1 + $0x10] sm:$0xff]  }
   0x8   :  { %1122 = vmatpush3.bf16.msra.mxu0 %v1300_v7  ;;  %v1309_v16 = vld [vmem:[%s1928_s1 + $0xa0] sm:$0xff]   ;;  %v1313_v20 = vld [vmem:[%s1928_s1 + $0x98] sm:$0xff]   ;;  %v1317_v24 = vld [vmem:[%s1928_s1 + $0x90] sm:$0xff]  }
   0x9   :  { %1186 = vmatpush3.bf16.msra.mxu1 %v1301_v8  ;;  %1123 = vmatprep.subr.bf16.mxu0 %v1302_v9  ;;  %v1318_v25 = vld [vmem:[%s1928_s1 + $0x48] sm:$0xff]   ;;  %v1322_v29 = vld [vmem:[%s1928_s1 + $0x40] sm:$0xff]   ;;  %v1332_v37 = vld [vmem:[%s1928_s1 + $0x118] sm:$0xff]  }
   0xa   :  { %1187 = vmatprep.subr.bf16.mxu1 %v1303_v10  ;;  %v1319_v26 = vld [vmem:[%s1928_s1 + $0xc8] sm:$0xff]   ;;  %v1323_v30 = vld [vmem:[%s1928_s1 + $0xc0] sm:$0xff]   ;;  %v1345_v43 = vld [vmem:[%s1928_s1 + $0x110] sm:$0xff]  }
   0xb   :  { %v1320_v27 = vld [vmem:[%s1928_s1 + $0x8] sm:$0xff]   ;;  %v1324_v31 = vld [vmem:[%s1928_s1] sm:$0xff]   ;;  %v1341_v44 = vld [vmem:[%s1929_s0 + $0x5c] ss:$20 sps:$4 sm:$0xff]  }
   0xc   :  { %1124 = vmatpush3.bf16.msra.mxu0 %v1304_v11  ;;  %v1321_v28 = vld [vmem:[%s1928_s1 + $0x88] sm:$0xff]   ;;  %v1325_v32 = vld [vmem:[%s1928_s1 + $0x80] sm:$0xff]   ;;  %v1346_v48 = vld [vmem:[%s1929_s0 + $0x7c] ss:$20 sps:$4 sm:$0xff]  }
   0xd   :  { %1188 = vmatpush3.bf16.msra.mxu1 %v1305_v12  ;;  %1125 = vmatprep.subr.bf16.mxu0 %v1306_v13  ;;  %v1326_v33 = vld [vmem:[%s1929_s0] ss:$20 sps:$4 sm:$0xff]   ;;  %v1328_v34 = vld [vmem:[%s1929_s0 + $0x4] ss:$20 sps:$4 sm:$0xff]   ;;  %v1329_v35 = vld [vmem:[%s1929_s0 + $0x8] ss:$20 sps:$4 sm:$0xff]  }
   0xe   :  { %1189 = vmatprep.subr.bf16.mxu1 %v1307_v14  ;;  %v1331_v36 = vld [vmem:[%s1929_s0 + $0xc] ss:$20 sps:$4 sm:$0xff]   ;;  %707 = vmatprep.mubr.bf16.mxu0 %v1328_v34  ;;  %v1335_v39 = vld [vmem:[%s1929_s0 + $0x34] ss:$20 sps:$4 sm:$0xff]   ;;  %v1338_v41 = vld [vmem:[%s1929_s0 + $0x30] ss:$20 sps:$4 sm:$0xff]  }
   0xf   :  { %804 = vmatprep.mubr.bf16.mxu1 %v1331_v36  ;;  %v1333_v38 = vld [vmem:[%s1929_s0 + $0x2c] ss:$20 sps:$4 sm:$0xff]   ;;  %v1337_v40 = vld [vmem:[%s1929_s0 + $0x28] ss:$20 sps:$4 sm:$0xff]   ;;  %v1343_v45 = vld [vmem:[%s1929_s0 + $0x50] ss:$20 sps:$4 sm:$0xff]  }
  0x10   :  { %1126 = vmatpush3.bf16.msra.mxu0 %v1308_v15  ;;  %v1339_v42 = vld [vmem:[%s1929_s0 + $0x54] ss:$20 sps:$4 sm:$0xff]   ;;  %v1344_v46 = vld [vmem:[%s1929_s0 + $0x58] ss:$20 sps:$4 sm:$0xff]   ;;  %v1371_v50 = vld [vmem:[%s1928_s1 + $0x100] sm:$0xff]  }
  0x11   :  { %1190 = vmatpush3.bf16.msra.mxu1 %v1309_v16  ;;  %1127 = vmatprep.subr.bf16.mxu0 %v1310_v17  ;;  %v1358_v47 = vld [vmem:[%s1928_s1 + $0x108] sm:$0xff]   ;;  %v1348_v49 = vld [vmem:[%s1929_s0 + $0x84] ss:$20 sps:$4 sm:$0xff]   ;;  %v1351_v52 = vld [vmem:[%s1929_s0 + $0x80] ss:$20 sps:$4 sm:$0xff]  }
  0x12   :  { %1191 = vmatprep.subr.bf16.mxu1 %v1311_v18  ;;  %v1350_v51 = vld [vmem:[%s1929_s0 + $0x78] ss:$20 sps:$4 sm:$0xff]   ;;  %v1356_v55 = vld [vmem:[%s1929_s0 + $0xa0] ss:$20 sps:$4 sm:$0xff]   ;;  %v1357_v56 = vld [vmem:[%s1929_s0 + $0xa8] ss:$20 sps:$4 sm:$0xff]  }
  0x13   :  { %v1352_v53 = vld [vmem:[%s1929_s0 + $0xa4] ss:$20 sps:$4 sm:$0xff]   ;;  %v1354_v54 = vld [vmem:[%s1929_s0 + $0xac] ss:$20 sps:$4 sm:$0xff]   ;;  %v1361_v59 = vld [vmem:[%s1929_s0 + $0xd4] ss:$20 sps:$4 sm:$0xff]  }
  0x14   :  { %1128 = vmatpush3.bf16.msra.mxu0 %v1312_v19  ;;  %v1359_v57 = vld [vmem:[%s1929_s0 + $0xcc] ss:$20 sps:$4 sm:$0xff]   ;;  %v140_v60 = vld [vmem:[%s1930_s2 + $0x10] sm:$0xff]  ;;  %v141_v62 = vld [vmem:[%s1930_s2 + $0x18] sm:$0xff] }
  0x15   :  { %1192 = vmatpush3.bf16.msra.mxu1 %v1313_v20  ;;  %1129 = vmatprep.subr.bf16.mxu0 %v1314_v21  ;;  %v138_v58 = vld [vmem:[%s1930_s2] sm:$0xff]  ;;  %v139_v61 = vld [vmem:[%s1930_s2 + $0x8] sm:$0xff]  ;;  %v1367_v4 = vld [vmem:[%s1929_s0 + $0xfc] ss:$20 sps:$4 sm:$0xff]  }
  0x16   :  { %1193 = vmatprep.subr.bf16.mxu1 %v1315_v22  ;;  %156 = vperm.xlu0 %1292, %v138_v58   ;;  %v142_v63 = vld [vmem:[%s1930_s2 + $0x20] sm:$0xff]  ;;  %v1363_v0 = vld [vmem:[%s1929_s0 + $0xc8] ss:$20 sps:$4 sm:$0xff]   ;;  %v144_v5 = vld [vmem:[%s1930_s2 + $0x30] sm:$0xff] }
  0x17   :  { %166 = vperm.xlu1 %1293, %v140_v60   ;;  %v143_v1 = vld [vmem:[%s1930_s2 + $0x28] sm:$0xff]  ;;  %v1364_v2 = vld [vmem:[%s1929_s0 + $0xd0] ss:$20 sps:$4 sm:$0xff]   ;;  %v145_v6 = vld [vmem:[%s1930_s2 + $0x38] sm:$0xff] }
  0x18   :  { %1130 = vmatpush3.bf16.msra.mxu0 %v1316_v23  ;;  %v1365_v3 = vld [vmem:[%s1929_s0 + $0xf4] ss:$20 sps:$4 sm:$0xff]   ;;  %v146_v7 = vld [vmem:[%s1930_s2 + $0x40] sm:$0xff]  ;;  %v1370_v10 = vld [vmem:[%s1929_s0 + $0xf8] ss:$20 sps:$4 sm:$0xff]  }
  0x19   :  { %1194 = vmatpush3.bf16.msra.mxu1 %v1317_v24  ;;  %1131 = vmatprep.subr.bf16.mxu0 %v1318_v25  ;;  %v1369_v8 = vld [vmem:[%s1929_s0 + $0xf0] ss:$20 sps:$4 sm:$0xff]   ;;  %v147_v9 = vld [vmem:[%s1930_s2 + $0x48] sm:$0xff]  ;;  %v149_v14 = vld [vmem:[%s1930_s2 + $0x58] sm:$0xff] }
  0x1a   :  { %1195 = vmatprep.subr.bf16.mxu1 %v1319_v26  ;;  %161 = vperm.xlu0 %1292, %v139_v61   ;;  %v1372_v11 = vld [vmem:[%s1929_s0 + $0x11c] ss:$20 sps:$4 sm:$0xff]   ;;  %v1374_v12 = vld [vmem:[%s1929_s0 + $0x124] ss:$20 sps:$4 sm:$0xff]   ;;  %v151_v17 = vld [vmem:[%s1930_s2 + $0x68] sm:$0xff] }
  0x1b   :  { %171 = vperm.xlu1 %1293, %v141_v62   ;;  %v148_v13 = vld [vmem:[%s1930_s2 + $0x50] sm:$0xff]  ;;  %v150_v15 = vld [vmem:[%s1930_s2 + $0x60] sm:$0xff]  ;;  %v1376_v16 = vld [vmem:[%s1929_s0 + $0x118] ss:$20 sps:$4 sm:$0xff]  }
  0x1c   :  { %1132 = vmatpush3.bf16.msra.mxu0 %v1320_v27  ;;  %v1377_v18 = vld [vmem:[%s1929_s0 + $0x120] ss:$20 sps:$4 sm:$0xff]   ;;  %v1378_v19 = vld [vmem:[%s1929_s0 + $0x10] ss:$20 sps:$4 sm:$0xff]   ;;  %v153_v22 = vld [vmem:[%s1930_s2 + $0x78] sm:$0xff] }
  0x1d   :  { %1196 = vmatpush3.bf16.msra.mxu1 %v1321_v28  ;;  %1133 = vmatprep.subr.bf16.mxu0 %v1322_v29  ;;  %v1379_v20 = vld [vmem:[%s1929_s0 + $0xb0] ss:$20 sps:$4 sm:$0xff]   ;;  %v1380_v23 = vld [vmem:[%s1929_s0 + $0x38] ss:$20 sps:$4 sm:$0xff]   ;;  %v1382_v25 = vld [vmem:[%s1929_s0 + $0x60] ss:$20 sps:$4 sm:$0xff]  }
  0x1e   :  { %1197 = vmatprep.subr.bf16.mxu1 %v1323_v30  ;;  %176 = vperm.xlu0 %1292, %v142_v63   ;;  %v152_v21 = vld [vmem:[%s1930_s2 + $0x70] sm:$0xff]  ;;  %v1381_v24 = vld [vmem:[%s1929_s0 + $0xd8] ss:$20 sps:$4 sm:$0xff]   ;;  %v1384_v27 = vld [vmem:[%s1929_s0 + $0x88] ss:$20 sps:$4 sm:$0xff]  }
  0x1f   :  { %181 = vperm.xlu1 %1293, %v143_v1   ;;  %v1383_v26 = vld [vmem:[%s1929_s0 + $0x100] ss:$20 sps:$4 sm:$0xff]   ;;  %v1385_v28 = vld [vmem:[%s1929_s0 + $0x128] ss:$20 sps:$4 sm:$0xff]  }
  0x20   :  { %1134 = vmatpush3.bf16.msra.mxu0 %v1324_v31 }
  0x21   :  { %1198 = vmatpush3.bf16.msra.mxu1 %v1325_v32  ;;  %1259 = vmatprep.subr.bf16.mxu0 %v1332_v37 }
  0x22   :  { %1283 = vmatprep.subr.bf16.mxu1 %v1332_v37  ;;  %186 = vperm.xlu0 %1292, %v144_v5  }
  0x23   :  { %708 = vmatmul.mubr.bf16.vlgmr.msra.gmra.mxu0 %v1326_v33  ;;  %191 = vperm.xlu1 %1293, %v145_v6  }
  0x24   :  { %805 = vmatmul.mubr.bf16.vlgmr.msra.gmra.mxu1 %v1329_v35  ;;  %1260 = vmatpush3.bf16.msra.mxu0 %v1332_v37 }
  0x25   :  { %1287 = vmatpush3.bf16.msra.mxu1 %v1332_v37  ;;  %715 = vmatprep.mubr.bf16.mxu0 %v1333_v38 }
  0x26   :  { %812 = vmatprep.mubr.bf16.mxu1 %v1335_v39  ;;  %1261 = vmatprep.subr.bf16.mxu0 %v1345_v43 }
  0x27   :  { %1284 = vmatprep.subr.bf16.mxu1 %v1345_v43  ;;  %196 = vperm.xlu0 %1292, %v146_v7  }
  0x28   :  { %1262 = vmatpush3.bf16.msra.mxu0 %v1345_v43  ;;  %201 = vperm.xlu1 %1293, %v147_v9  }
  0x29   :  { %1288 = vmatpush3.bf16.msra.mxu1 %v1345_v43  ;;  %1263 = vmatprep.subr.bf16.mxu0 %v1358_v47 }
  0x2a   :  { %1285 = vmatprep.subr.bf16.mxu1 %v1358_v47 }
  0x2b   :  { %716 = vmatmul.mubr.bf16.gmra.mxu0 %v1337_v40  ;;  %206 = vperm.xlu0 %1292, %v148_v13  }
  0x2c   :  { %813 = vmatmul.mubr.bf16.gmra.mxu1 %v1338_v41  ;;  %723 = vmatprep.mubr.bf16.mxu0 %v1339_v42 }
  0x2d   :  { %820 = vmatprep.mubr.bf16.mxu1 %v1341_v44  ;;  %1264 = vmatpush3.bf16.msra.mxu0 %v1358_v47 }
  0x2e   :  { %1289 = vmatpush3.bf16.msra.mxu1 %v1358_v47  ;;  %1265 = vmatprep.subr.bf16.mxu0 %v1371_v50 }
  0x2f   :  { %1286 = vmatprep.subr.bf16.mxu1 %v1371_v50  ;;  %211 = vperm.xlu1 %1293, %v149_v14  }
  0x30   :  { %216 = vperm.xlu0 %1292, %v150_v15  }
  0x31   :  { %1266 = vmatpush3.bf16.msra.mxu0 %v1371_v50 }
  0x32   :  { %1290 = vmatpush3.bf16.msra.mxu1 %v1371_v50 }
  0x33   :  { %724 = vmatmul.mubr.bf16.gmra.mxu0 %v1343_v45  ;;  %221 = vperm.xlu1 %1293, %v151_v17  }
  0x34   :  { %821 = vmatmul.mubr.bf16.gmra.mxu1 %v1344_v46  ;;  %731 = vmatprep.mubr.bf16.mxu0 %v1346_v48 }
  0x35   :  { %828 = vmatprep.mubr.bf16.mxu1 %v1348_v49  ;;  %226 = vperm.xlu0 %1292, %v152_v21  }
  0x37   :  { %231 = vperm.xlu1 %1293, %v153_v22  }
  0x3b   :  { %732 = vmatmul.mubr.bf16.gmra.mxu0 %v1350_v51 }
  0x3c   :  { %829 = vmatmul.mubr.bf16.gmra.mxu1 %v1351_v52  ;;  %739 = vmatprep.mubr.bf16.mxu0 %v1352_v53 }
  0x3d   :  { %836 = vmatprep.mubr.bf16.mxu1 %v1354_v54 }
  0x43   :  { %740 = vmatmul.mubr.bf16.gmra.mxu0 %v1356_v55 }
  0x44   :  { %837 = vmatmul.mubr.bf16.gmra.mxu1 %v1357_v56  ;;  %747 = vmatprep.mubr.bf16.mxu0 %v1359_v57 }
  0x45   :  { %844 = vmatprep.mubr.bf16.mxu1 %v1361_v59 }
  0x4b   :  { %748 = vmatmul.mubr.bf16.gmra.mxu0 %v1363_v0 }
  0x4c   :  { %845 = vmatmul.mubr.bf16.gmra.mxu1 %v1364_v2  ;;  %755 = vmatprep.mubr.bf16.mxu0 %v1365_v3 }
  0x4d   :  { %852 = vmatprep.mubr.bf16.mxu1 %v1367_v4 }
  0x53   :  { %756 = vmatmul.mubr.bf16.gmra.mxu0 %v1369_v8 }
  0x54   :  { %853 = vmatmul.mubr.bf16.gmra.mxu1 %v1370_v10  ;;  %763 = vmatprep.mubr.bf16.mxu0 %v1372_v11 }
  0x55   :  { %860 = vmatprep.mubr.bf16.mxu1 %v1374_v12 }
  0x5b   :  { %764 = vmatmul.mubr.bf16.gmra.mxu0 %v1376_v16 }
  0x5c   :  { %861 = vmatmul.mubr.bf16.gmra.mxu1 %v1377_v18  ;;  %1267 = vmatprep.mubr.msk.bf16.mxu0 %vm650_vm0, %v1378_v19 }
  0x5d   :  { %1275 = vmatprep.mubr.msk.bf16.mxu1 %vm650_vm0, %v1379_v20 }
  0x63   :  { %1268 = vmatmul.mubr.msk.bf16.vlgmr.msra.gmra.mxu0 %vm650_vm0, %v1380_v23 }
  0x64   :  { %1276 = vmatmul.mubr.msk.bf16.vlgmr.msra.gmra.mxu1 %vm650_vm0, %v1381_v24  ;;  %1271 = vmatprep.mubr.msk.bf16.mxu0 %vm650_vm0, %v1382_v25 }
  0x65   :  { %1279 = vmatprep.mubr.msk.bf16.mxu1 %vm650_vm0, %v1383_v26 }
  0x6b   :  { %1272 = vmatmul.mubr.msk.bf16.gmra.mxu0 %vm650_vm0, %v1384_v27 }
  0x6c   :  { %1280 = vmatmul.mubr.msk.bf16.gmra.mxu1 %vm650_vm0, %v1385_v28 }
  0x91   :  { %v157_v59 = vpop.permute.xlu0 %156 }
  0x92   :  { %v167_v63 = vpop.permute.xlu1 %166 }
  0x95   :  { %v162_v3 = vpop.permute.xlu0 %161 }
  0x96   :  { %v172_v7 = vpop.permute.xlu1 %171 }
  0x99   :  { %v177_v9 = vpop.permute.xlu0 %176 }
  0x9a   :  { %v1742_v13 = vpop.permute.xlu1 %181 }
  0x9b   :  { %1939 = vst [vmem:[#allocation8_spill] sm:$0xff] %v1742_v13 }
  0x9d   :  { %v187_v15 = vpop.permute.xlu0 %186 }
  0x9e   :  { %v192_v19 = vpop.permute.xlu1 %191 }
  0xa2   :  { %v197_v21 = vpop.permute.xlu0 %196 }
  0xe3   :  { %v1135_v29 = vpop.f32.mrf.mxu0 }
  0xe4   :  { %v1696_v30 = vpop.f32.mrf.mxu1 }
  0xe5   :  { %v1136_v31 = vpop.f32.mrf.mxu0 }
  0xe6   :  { %v1698_v32 = vpop.f32.mrf.mxu1  ;;  %v1137_v25 = vadd.f32 %v1136_v31, %v1135_v29 }
  0xe7   :  { %v1138_v33 = vpop.f32.mrf.mxu0 }
  0xe8   :  { %v1700_v34 = vpop.f32.mrf.mxu1 }
  0xe9   :  { %v1139_v35 = vpop.f32.mrf.mxu0 }
  0xea   :  { %v1702_v36 = vpop.f32.mrf.mxu1  ;;  %v1140_v26 = vadd.f32 %v1139_v35, %v1138_v33 }
  0xeb   :  { %v1141_v37 = vpop.f32.mrf.mxu0  ;;  %v1204_v33 = vadd.f32 %v1702_v36, %v1700_v34 }
  0xec   :  { %v1704_v38 = vpop.f32.mrf.mxu1 }
  0xed   :  { %v1142_v39 = vpop.f32.mrf.mxu0 }
  0xee   :  { %v1706_v40 = vpop.f32.mrf.mxu1  ;;  %v1143_v27 = vadd.f32 %v1142_v39, %v1141_v37 }
  0xef   :  { %v1144_v41 = vpop.f32.mrf.mxu0 }
  0xf0   :  { %v1708_v42 = vpop.f32.mrf.mxu1  ;;  %v718_v29 = vadd.f32 %v1143_v27, %v167_v63 }
  0xf1   :  { %v1145_v43 = vpop.f32.mrf.mxu0 }
  0xf2   :  { %v1710_v44 = vpop.f32.mrf.mxu1 }
  0xf3   :  { %v1147_v45 = vpop.f32.mrf.mxu0 }
  0xf4   :  { %v1712_v46 = vpop.f32.mrf.mxu1 }
  0xf5   :  { %v1148_v47 = vpop.f32.mrf.mxu0 }
  0xf6   :  { %v1714_v48 = vpop.f32.mrf.mxu1 }
  0xf7   :  { %v1716_v49 = vpop.f32.mrf.mxu0 }
  0xf8   :  { %v1718_v50 = vpop.f32.mrf.mxu1 }
  0xf9   :  { %v1720_v51 = vpop.f32.mrf.mxu0 }
  0xfa   :  { %v1722_v52 = vpop.f32.mrf.mxu1 }
  0xfb   :  { %v1153_v53 = vpop.f32.mrf.mxu0 }
  0xfc   :  { %v1724_v54 = vpop.f32.mrf.mxu1 }
  0xfd   :  { %v1154_v55 = vpop.f32.mrf.mxu0 }
  0xfe   :  { %v1726_v56 = vpop.f32.mrf.mxu1 }
  0xff   :  { %v1156_v57 = vpop.f32.mrf.mxu0 }
 0x100   :  { %v1728_v58 = vpop.f32.mrf.mxu1 }
 0x101   :  { %1933 = vst [vmem:[#allocation2_spill] sm:$0xff] %v1728_v58  ;;  %v1157_v60 = vpop.f32.mrf.mxu0  ;;  %v713_v58 = vadd.f32 %v1140_v26, %v162_v3 }
 0x102   :  { %v1730_v61 = vpop.f32.mrf.mxu1 }
 0x103   :  { %1934 = vst [vmem:[#allocation3_spill] sm:$0xff] %v1730_v61  ;;  %v1159_v62 = vpop.f32.mrf.mxu0 }
 0x104   :  { %v1732_v0 = vpop.f32.mrf.mxu1 }
 0x105   :  { %1935 = vst [vmem:[#allocation4_spill] sm:$0xff] %v1732_v0  ;;  %v1160_v1 = vpop.f32.mrf.mxu0  ;;  %v207_v0 = vpop.permute.xlu0 %206 }
 0x106   :  { %v1734_v2 = vpop.f32.mrf.mxu1 }
 0x107   :  { %1936 = vst [vmem:[#allocation5_spill] sm:$0xff] %v1734_v2  ;;  %v1162_v4 = vpop.f32.mrf.mxu0  ;;  %v202_v2 = vpop.permute.xlu1 %201 }
 0x108   :  { %v1736_v5 = vpop.f32.mrf.mxu1 }
 0x109   :  { %1937 = vst [vmem:[#allocation6_spill] sm:$0xff] %v1736_v5  ;;  %v1163_v6 = vpop.f32.mrf.mxu0  ;;  %v1149_v5 = vadd.f32 %v1148_v47, %v1147_v45  ;;  %v1155_v45 = vadd.f32 %v1154_v55, %v1153_v53  ;;  %v1158_v47 = vadd.f32 %v1157_v60, %v1156_v57  ;;  %v217_v53 = vpop.permute.xlu0 %216 }
 0x10a   :  { %v1738_v8 = vpop.f32.mrf.mxu1 }
 0x10b   :  { %1938 = vst [vmem:[#allocation7_spill] sm:$0xff] %v1738_v8  ;;  %v1165_v10 = vpop.f32.mrf.mxu0  ;;  %v1146_v8 = vadd.f32 %v1145_v43, %v1144_v41  ;;  %v726_v37 = vadd.f32 %v1149_v5, %v177_v9  ;;  %v1207_v43 = vadd.f32 %v1706_v40, %v1704_v38  ;;  %v212_v63 = vpop.permute.xlu1 %211  ;;  %v1152_v38 = vadd.f32 %v1720_v51, %v1716_v49  ;;  %v1946_v9 = vld [vmem:[#allocation3_spill] sm:$0xff] }
 0x10c   :  { %v1740_v11 = vpop.f32.mrf.mxu1  ;;  %v737_v57 = vadd.f32 %v1158_v47, %v192_v19 }
 0x10d   :  { %v1166_v12 = vpop.f32.mrf.mxu0  ;;  %v721_v35 = vadd.f32 %v1146_v8, %v172_v7  ;;  %v815_v5 = vadd.f32 %v1207_v43, %v718_v29  ;;  %v1772_v8 = vadd.f32 %v1204_v33, %v713_v58  ;;  %v227_v29 = vpop.permute.xlu0 %226 }
 0x10e   :  { %v1230_v14 = vpop.f32.mrf.mxu1  ;;  %v1167_v39 = vadd.f32 %v1166_v12, %v1165_v10  ;;  %v1947_v12 = vld [vmem:[#allocation4_spill] sm:$0xff] }
 0x10f   :  { %v1168_v16 = vpop.f32.mrf.mxu0 }
 0x110   :  { %v1744_v17 = vpop.f32.mrf.mxu1  ;;  %v750_v40 = vadd.f32 %v1167_v39, %v207_v0 }
 0x111   :  { %1940 = vst [vmem:[#allocation9_spill] sm:$0xff] %v1744_v17  ;;  %v1169_v18 = vpop.f32.mrf.mxu0 }
 0x112   :  { %v1746_v20 = vpop.f32.mrf.mxu1  ;;  %v1170_v34 = vadd.f32 %v1169_v18, %v1168_v16 }
 0x113   :  { %1941 = vst [vmem:[#allocation10_spill] sm:$0xff] %v1746_v20  ;;  %v1171_v22 = vpop.f32.mrf.mxu0  ;;  %v1201_v20 = vadd.f32 %v1698_v32, %v1696_v30  ;;  %v1210_v30 = vadd.f32 %v1710_v44, %v1708_v42  ;;  %v1213_v32 = vadd.f32 %v1714_v48, %v1712_v46  ;;  %v1780_v46 = vadd.f32 %v1722_v52, %v1718_v50  ;;  %v1948_v50 = vld [vmem:[#allocation5_spill] sm:$0xff] }
 0x114   :  { %v1748_v23 = vpop.f32.mrf.mxu1  ;;  %v734_v48 = vadd.f32 %v1155_v45, %v187_v15  ;;  %v753_v49 = vadd.f32 %v1170_v34, %v212_v63  ;;  %v1225_v52 = vadd.f32 %v1948_v50, %v1947_v12 }
 0x115   :  { %1942 = vst [vmem:[#allocation11_spill] sm:$0xff] %v1748_v23  ;;  %v1172_v24 = vpop.f32.mrf.mxu0  ;;  %v710_v23 = vadd.f32 %v1137_v25, %v157_v59  ;;  %v1164_v59 = vadd.f32 %v1163_v6, %v1162_v4  ;;  %v818_v42 = vadd.f32 %v1210_v30, %v721_v35  ;;  %v1776_v44 = vadd.f32 %v1213_v32, %v726_v37  ;;  %v1945_v6 = vld [vmem:[#allocation2_spill] sm:$0xff]  ;;  %v984_v35 = vld [vmem:[%s1931_s3 + $0x10] sm:$0xff] }
 0x116   :  { %v1750_v28 = vpop.f32.mrf.mxu1  ;;  %v1173_v51 = vadd.f32 %v1172_v24, %v1171_v22  ;;  %v1219_v4 = vadd.f32 %v1726_v56, %v1724_v54  ;;  %v1222_v10 = vadd.f32 %v1946_v9, %v1945_v6  ;;  %v222_v56 = vpop.permute.xlu1 %221 }
 0x117   :  { %v1752_v13 = vpop.f32.mrf.mxu0  ;;  %v807_v7 = vadd.f32 %v1201_v20, %v710_v23  ;;  %v745_v58 = vadd.f32 %v1164_v59, %v202_v2  ;;  %v1950_v2 = vld [vmem:[#allocation6_spill] sm:$0xff]  ;;  %v992_v59 = vld [vmem:[%s1931_s3 + $0x50] sm:$0xff] }
 0x118   :  { %v1754_v17 = vpop.f32.mrf.mxu1  ;;  %v1952_v19 = vld [vmem:[#allocation9_spill] sm:$0xff]  ;;  %v831_v26 = vadd.f32 %v1219_v4, %v734_v48  ;;  %v1800_v27 = vadd.f32 %v1222_v10, %v737_v57  ;;  %v758_v33 = vadd.f32 %v1173_v51, %v217_v53  ;;  %v982_v53 = vld [vmem:[%s1931_s3] sm:$0xff] }
 0x119   :  { %1943 = vst [vmem:[#allocation12_spill] sm:$0xff] %v1754_v17  ;;  %v1756_v61 = vpop.f32.mrf.mxu0  ;;  %v1161_v17 = vadd.f32 %v1160_v1, %v1159_v62  ;;  %v1231_v1 = vadd.f32 %v1230_v14, %v1740_v11  ;;  %v1951_v11 = vld [vmem:[#allocation7_spill] sm:$0xff] }
 0x11a   :  { %1944 = vst [vmem:[#allocation13_spill] sm:$0xff] %v1756_v61  ;;  %v1760_v31 = vpop.f32.mrf.mxu1  ;;  %v1228_v14 = vadd.f32 %v1951_v11, %v1950_v2  ;;  %v1953_v20 = vld [vmem:[#allocation10_spill] sm:$0xff]  ;;  %v232_v9 = vpop.permute.xlu1 %231  ;;  %v983_v2 = vld [vmem:[%s1931_s3 + $0x8] sm:$0xff] }
 0x11b   :  { %v1177_v41 = vpop.f32.mrf.mxu0  ;;  %v742_v60 = vadd.f32 %v1161_v17, %v197_v21  ;;  %v1949_v17 = vld [vmem:[#allocation8_spill] sm:$0xff]  ;;  %v1234_v21 = vadd.f32 %v1953_v20, %v1952_v19  ;;  %v847_v54 = vadd.f32 %v1231_v1, %v750_v40 }
 0x11c   :  { %v1766_v61 = vpop.f32.mrf.mxu1  ;;  %v1794_v18 = vadd.f32 %v1152_v38, %v1949_v17  ;;  %v842_v43 = vadd.f32 %v1228_v14, %v745_v58  ;;  %v1954_v45 = vld [vmem:[#allocation11_spill] sm:$0xff] }
 0x11d   :  { %v1178_v36 = vpop.f32.mrf.mxu0  ;;  %v839_v25 = vadd.f32 %v1225_v52, %v742_v60  ;;  %v1237_v47 = vadd.f32 %v1750_v28, %v1954_v45  ;;  %v986_v45 = vld [vmem:[%s1931_s3 + $0x20] sm:$0xff] }
 0x11e   :  { %v1242_v3 = vpop.f32.mrf.mxu1  ;;  %v1179_v15 = vadd.f32 %v1178_v36, %v1177_v41  ;;  %v850_v41 = vadd.f32 %v1234_v21, %v753_v49  ;;  %v991_v21 = vld [vmem:[%s1931_s3 + $0x48] sm:$0xff] }
 0x11f   :  { %v1180_v55 = vpop.f32.mrf.mxu0  ;;  %v1243_v28 = vadd.f32 %v1242_v3, %v1766_v61  ;;  %v855_v6 = vadd.f32 %v1237_v47, %v758_v33 }
 0x120   :  { %v1782_v62 = vpop.f32.mrf.mxu1  ;;  %v766_v30 = vadd.f32 %v1179_v15, %v227_v29 }
 0x121   :  { %v1181_v0 = vpop.f32.mrf.mxu0  ;;  %v1955_v63 = vld [vmem:[#allocation13_spill] sm:$0xff] }
 0x122   :  { %v1791_v16 = vpop.f32.mrf.mxu1  ;;  %v1182_v38 = vadd.f32 %v1181_v0, %v1180_v55  ;;  %v985_v55 = vld [vmem:[%s1931_s3 + $0x18] sm:$0xff]  ;;  %v863_v50 = vadd.f32 %v1243_v28, %v766_v30 }
 0x123   :  { %v1269_v22 = vpop.f32.mrf.mxu0 }
 0x124   :  { %v912_v23 = vadd.f32 %v1269_v22, %v815_v5  ;;  %v1277_v24 = vpop.f32.mrf.mxu1  ;;  %v1176_v5 = vadd.f32 %v1955_v63, %v1752_v13  ;;  %v769_v52 = vadd.f32 %v1182_v38, %v232_v9 }
 0x125   :  { %v944_v37 = vadd.f32 %v1277_v24, %v847_v54  ;;  %v903_v39 = vpop.f32.mrf.mxu0 }
 0x126   :  { %v968_v32 = vmax.f32 %v912_v23, 0.0  ;;  %v904_v34 = vadd.f32 %v903_v39, %v807_v7  ;;  %v935_v36 = vpop.f32.mrf.mxu1  ;;  %v990_v7 = vld [vmem:[%s1931_s3 + $0x40] sm:$0xff]  ;;  %v761_v19 = vadd.f32 %v1176_v5, %v222_v56  ;;  %v1246_v23 = vadd.f32 %v1791_v16, %v1782_v62 }
 0x127   :  { %v976_v40 = vmax.f32 %v944_v37, 0.0  ;;  %v936_v48 = vadd.f32 %v935_v36, %v839_v25  ;;  %v1270_v57 = vpop.f32.mrf.mxu0  ;;  %v988_v25 = vld [vmem:[%s1931_s3 + $0x30] sm:$0xff]  ;;  %v826_v5 = vadd.f32 %v1780_v46, %v1794_v18 }
 0x128   :  { %v1000_v60 = vadd.f32 %v984_v35, %v968_v32  ;;  %v966_v58 = vmax.f32 %v904_v34, 0.0  ;;  %v915_v1 = vadd.f32 %v1270_v57, %v818_v42  ;;  %v1278_v49 = vpop.f32.mrf.mxu1  ;;  %v993_v42 = vld [vmem:[%s1931_s3 + $0x58] sm:$0xff]  ;;  %v1956_v35 = vld [vmem:[#allocation12_spill] sm:$0xff]  ;;  %v866_v32 = vadd.f32 %v1246_v23, %v769_v52  ;;  %v994_v34 = vld [vmem:[%s1931_s3 + $0x60] sm:$0xff] }
 0x129   :  { %v1008_v51 = vadd.f32 %v992_v59, %v976_v40  ;;  %v974_v13 = vmax.f32 %v936_v48, 0.0  ;;  %v947_v0 = vadd.f32 %v1278_v49, %v850_v41  ;;  %v906_v4 = vpop.f32.mrf.mxu0  ;;  %v996_v37 = vld [vmem:[%s1931_s3 + $0x70] sm:$0xff]  ;;  %v987_v49 = vld [vmem:[%s1931_s3 + $0x28] sm:$0xff] }
 0x12a   :  { %1017 = vst.msk [vmem:[%s1932_s4 + $0x10] sm:$0xff] %vm1014_vm1, %v1000_v60  ;;  %v998_v61 = vadd.f32 %v982_v53, %v966_v58  ;;  %v969_v3 = vmax.f32 %v915_v1, 0.0  ;;  %v907_v10 = vadd.f32 %v906_v4, %v1772_v8  ;;  %v938_v12 = vpop.f32.mrf.mxu1  ;;  %v989_v53 = vld [vmem:[%s1931_s3 + $0x38] sm:$0xff] }
 0x12b   :  { %1025 = vst.msk [vmem:[%s1932_s4 + $0x50] sm:$0xff] %vm1014_vm1, %v1008_v51  ;;  %v1006_v15 = vadd.f32 %v990_v7, %v974_v13  ;;  %v977_v17 = vmax.f32 %v947_v0, 0.0  ;;  %v939_v11 = vadd.f32 %v938_v12, %v842_v43  ;;  %v1273_v14 = vpop.f32.mrf.mxu0  ;;  %v995_v0 = vld [vmem:[%s1931_s3 + $0x68] sm:$0xff] }
 0x12c   :  { %1015 = vst.msk [vmem:[%s1932_s4] sm:$0xff] %vm1014_vm1, %v998_v61  ;;  %v1001_v8 = vadd.f32 %v985_v55, %v969_v3  ;;  %v967_v20 = vmax.f32 %v907_v10, 0.0  ;;  %v928_v22 = vadd.f32 %v1273_v14, %v831_v26  ;;  %v1281_v54 = vpop.f32.mrf.mxu1  ;;  %v1240_v26 = vadd.f32 %v1760_v31, %v1956_v35 }
 0x12d   :  { %1023 = vst.msk [vmem:[%s1932_s4 + $0x40] sm:$0xff] %vm1014_vm1, %v1006_v15  ;;  %v1009_v56 = vadd.f32 %v993_v42, %v977_v17  ;;  %v975_v24 = vmax.f32 %v939_v11, 0.0  ;;  %v960_v29 = vadd.f32 %v1281_v54, %v863_v50  ;;  %v919_v33 = vpop.f32.mrf.mxu0 }
 0x12e   :  { %1018 = vst.msk [vmem:[%s1932_s4 + $0x18] sm:$0xff] %vm1014_vm1, %v1001_v8  ;;  %v999_v62 = vadd.f32 %v983_v2, %v967_v20  ;;  %v972_v16 = vmax.f32 %v928_v22, 0.0  ;;  %v920_v39 = vadd.f32 %v919_v33, %v1776_v44  ;;  %v951_v41 = vpop.f32.mrf.mxu1  ;;  %v858_v28 = vadd.f32 %v1240_v26, %v761_v19 }
 0x12f   :  { %1026 = vst.msk [vmem:[%s1932_s4 + $0x58] sm:$0xff] %vm1014_vm1, %v1009_v56  ;;  %v1007_v31 = vadd.f32 %v991_v21, %v975_v24  ;;  %v980_v43 = vmax.f32 %v960_v29, 0.0  ;;  %v952_v47 = vadd.f32 %v951_v41, %v855_v6  ;;  %v1274_v30 = vpop.f32.mrf.mxu0 }
 0x130   :  { %1016 = vst.msk [vmem:[%s1932_s4 + $0x8] sm:$0xff] %vm1014_vm1, %v999_v62  ;;  %v1004_v44 = vadd.f32 %v988_v25, %v972_v16  ;;  %v970_v59 = vmax.f32 %v920_v39, 0.0  ;;  %v931_v36 = vadd.f32 %v1274_v30, %v1800_v27  ;;  %v1282_v63 = vpop.f32.mrf.mxu1  ;;  %v997_v27 = vld [vmem:[%s1931_s3 + $0x78] sm:$0xff] }
 0x131   :  { %1024 = vst.msk [vmem:[%s1932_s4 + $0x48] sm:$0xff] %vm1014_vm1, %v1007_v31  ;;  %v1012_v38 = vadd.f32 %v996_v37, %v980_v43  ;;  %v978_v40 = vmax.f32 %v952_v47, 0.0  ;;  %v963_v48 = vadd.f32 %v1282_v63, %v866_v32  ;;  %v922_v57 = vpop.f32.mrf.mxu0 }
 0x132   :  { %1021 = vst.msk [vmem:[%s1932_s4 + $0x30] sm:$0xff] %vm1014_vm1, %v1004_v44  ;;  %v1002_v46 = vadd.f32 %v986_v45, %v970_v59  ;;  %v973_v18 = vmax.f32 %v931_v36, 0.0  ;;  %v923_v60 = vadd.f32 %v922_v57, %v826_v5  ;;  %v954_v58 = vpop.f32.mrf.mxu1 }
 0x133   :  { %1029 = vst.msk [vmem:[%s1932_s4 + $0x70] sm:$0xff] %vm1014_vm1, %v1012_v38  ;;  %v1010_v7 = vadd.f32 %v994_v34, %v978_v40  ;;  %v981_v1 = vmax.f32 %v963_v48, 0.0  ;;  %v955_v51 = vadd.f32 %v954_v58, %v858_v28 }
 0x134   :  { %1019 = vst.msk [vmem:[%s1932_s4 + $0x20] sm:$0xff] %vm1014_vm1, %v1002_v46  ;;  %v1005_v13 = vadd.f32 %v989_v53, %v973_v18  ;;  %v971_v55 = vmax.f32 %v923_v60, 0.0 }
 0x135   :  { %1027 = vst.msk [vmem:[%s1932_s4 + $0x60] sm:$0xff] %vm1014_vm1, %v1010_v7  ;;  %v1013_v4 = vadd.f32 %v997_v27, %v981_v1  ;;  %v979_v6 = vmax.f32 %v955_v51, 0.0 }
 0x136   :  { %1022 = vst.msk [vmem:[%s1932_s4 + $0x38] sm:$0xff] %vm1014_vm1, %v1005_v13  ;;  %v1003_v9 = vadd.f32 %v987_v49, %v971_v55 }
 0x137   :  { %1030 = vst.msk [vmem:[%s1932_s4 + $0x78] sm:$0xff] %vm1014_vm1, %v1013_v4  ;;  %v1011_v61 = vadd.f32 %v995_v0, %v979_v6 }
 0x138   :  { %1020 = vst.msk [vmem:[%s1932_s4 + $0x28] sm:$0xff] %vm1014_vm1, %v1003_v9 }
 0x139   :  { %1028 = vst.msk [vmem:[%s1932_s4 + $0x68] sm:$0xff] %vm1014_vm1, %v1011_v61 }

// kernel: tile.22
= control target key start
LH: loop header
LB: loop body
LE: loop exit
PB: predicated region body
PF: predicated region fallthrough
CT: control target
= control target key end

     0   :  { %s22_s0 = inlined_call_operand.vmem [shape: f32[16], index: 0, kind: input, shape index: {}]   ;;  %s23_s1 = inlined_call_operand.vmem [shape: f32[4,1,1,16], index: 1, kind: output, shape index: {}]  }
   0x1   :  { %v4_v0 = vld [vmem:[%s22_s0] ss:$0 sm:$0xff] }
   0x2   :  { %5 = vst [vmem:[%s23_s1] sm:$0xf] %v4_v0 }

// kernel: tile.1
= control target key start
LH: loop header
LB: loop body
LE: loop exit
PB: predicated region body
PF: predicated region fallthrough
CT: control target
= control target key end

     0   :  { %s177_s8 = smov 125   ;;  %s178_s9 = smov 126   ;;  %vm8_vm0 = vcmask 7168   ;;  %s332_s0 = inlined_call_operand.vmem [shape: f32[4,1,1,16], index: 0, kind: input, shape index: {}]   ;;  %s333_s1 = inlined_call_operand.vmem [shape: f32[64,1], index: 1, kind: output, shape index: {}]  }
   0x1   :  { %v5_v0 = vld [vmem:[%s332_s0] sm:$0xf]  ;;  %s176_s0 = smov 127   ;;  %s179_s10 = smov 124  }
   0x2   :  { %6 = vst [vmem:[#allocation0] sm:$0xf] %v5_v0  ;;  %s180_s11 = smov 123   ;;  %s181_s12 = smov 122  }
   0x3   :  { %s182_s13 = smov 121   ;;  %s183_s14 = smov 120  }
   0x4   :  { %s184_s19 = smov 119   ;;  %s185_s20 = smov 118  }
   0x5   :  { %s186_s21 = smov 117   ;;  %s187_s22 = smov 116  }
   0x6   :  { %s188_s23 = smov 115   ;;  %s189_s24 = smov 114  }
   0x7   :  { %s190_s25 = smov 113  }
   0x9   :  { %v11_v1 = vld [vmem:[#allocation0] sm:$0xf]  }
   0xa   :  { %v27_v2 = vld [vmem:[#allocation0] sm:$0xf]   ;;  %12 = vrot.lane.b32.xlu0 %v11_v1, %s176_s0 }
   0xb   :  { %28 = vrot.lane.b32.xlu1 %v27_v2, %s177_s8  ;;  %v19_v3 = vld [vmem:[#allocation0] sm:$0xf]  }
   0xc   :  { %v35_v4 = vld [vmem:[#allocation0] sm:$0xf]  }
   0xd   :  { %v43_v5 = vld [vmem:[#allocation0] sm:$0xf]  }
   0xe   :  { %20 = vrot.lane.b32.xlu0 %v19_v3, %s178_s9  ;;  %v51_v6 = vld [vmem:[#allocation0] sm:$0xf]  }
   0xf   :  { %36 = vrot.lane.b32.xlu1 %v35_v4, %s179_s10  ;;  %v59_v7 = vld [vmem:[#allocation0] sm:$0xf]  }
  0x10   :  { %v67_v8 = vld [vmem:[#allocation0] sm:$0xf]  }
  0x11   :  { %v75_v9 = vld [vmem:[#allocation0] sm:$0xf]  }
  0x12   :  { %44 = vrot.lane.b32.xlu0 %v43_v5, %s180_s11  ;;  %v83_v10 = vld [vmem:[#allocation0] sm:$0xf]  }
  0x13   :  { %52 = vrot.lane.b32.xlu1 %v51_v6, %s181_s12  ;;  %v7_v11 = vld [vmem:[#allocation0] sm:$0xf]  }
  0x14   :  { %9 = vst.msk [vmem:[%s333_s1] ss:$16 sm:$0x3] %vm8_vm0, %v7_v11   ;;  %10 = vst.msk [vmem:[%s333_s1] ss:$16 sm:$0xc] %vm8_vm0, %v7_v11  }
  0x15   :  { %v91_v12 = vld [vmem:[#allocation0] sm:$0xf]  }
  0x16   :  { %60 = vrot.lane.b32.xlu0 %v59_v7, %s182_s13  ;;  %v99_v13 = vld [vmem:[#allocation0] sm:$0xf]  }
  0x17   :  { %68 = vrot.lane.b32.xlu1 %v67_v8, %s183_s14  ;;  %v107_v14 = vld [vmem:[#allocation0] sm:$0xf]  }
  0x18   :  { %v115_v15 = vld [vmem:[#allocation0] sm:$0xf]  }
  0x19   :  { %v123_v16 = vld [vmem:[#allocation0] sm:$0xf]  }
  0x1a   :  { %76 = vrot.lane.b32.xlu0 %v75_v9, %s184_s19 }
  0x1b   :  { %84 = vrot.lane.b32.xlu1 %v83_v10, %s185_s20 }
  0x1e   :  { %92 = vrot.lane.b32.xlu0 %v91_v12, %s186_s21 }
  0x1f   :  { %100 = vrot.lane.b32.xlu1 %v99_v13, %s187_s22 }
  0x22   :  { %108 = vrot.lane.b32.xlu0 %v107_v14, %s188_s23 }
  0x23   :  { %116 = vrot.lane.b32.xlu1 %v115_v15, %s189_s24 }
  0x26   :  { %124 = vrot.lane.b32.xlu0 %v123_v16, %s190_s25 }
  0x7c   :  { %v13_v17 = vpop.permute.xlu0 %12  }
  0x7d   :  { %v29_v18 = vpop.permute.xlu1 %28   ;;  %131 = vst.msk [vmem:[%s333_s1 + $0x1] ss:$16 sm:$0x3] %vm8_vm0, %v13_v17   ;;  %132 = vst.msk [vmem:[%s333_s1 + $0x1] ss:$16 sm:$0xc] %vm8_vm0, %v13_v17  }
  0x7e   :  { %135 = vst.msk [vmem:[%s333_s1 + $0x3] ss:$16 sm:$0x3] %vm8_vm0, %v29_v18   ;;  %136 = vst.msk [vmem:[%s333_s1 + $0x3] ss:$16 sm:$0xc] %vm8_vm0, %v29_v18  }
  0x80   :  { %v21_v19 = vpop.permute.xlu0 %20  }
  0x81   :  { %v37_v20 = vpop.permute.xlu1 %36   ;;  %133 = vst.msk [vmem:[%s333_s1 + $0x2] ss:$16 sm:$0x3] %vm8_vm0, %v21_v19   ;;  %134 = vst.msk [vmem:[%s333_s1 + $0x2] ss:$16 sm:$0xc] %vm8_vm0, %v21_v19  }
  0x82   :  { %137 = vst.msk [vmem:[%s333_s1 + $0x4] ss:$16 sm:$0x3] %vm8_vm0, %v37_v20   ;;  %138 = vst.msk [vmem:[%s333_s1 + $0x4] ss:$16 sm:$0xc] %vm8_vm0, %v37_v20  }
  0x84   :  { %v45_v21 = vpop.permute.xlu0 %44  }
  0x85   :  { %v53_v22 = vpop.permute.xlu1 %52   ;;  %139 = vst.msk [vmem:[%s333_s1 + $0x5] ss:$16 sm:$0x3] %vm8_vm0, %v45_v21   ;;  %140 = vst.msk [vmem:[%s333_s1 + $0x5] ss:$16 sm:$0xc] %vm8_vm0, %v45_v21  }
  0x86   :  { %141 = vst.msk [vmem:[%s333_s1 + $0x6] ss:$16 sm:$0x3] %vm8_vm0, %v53_v22   ;;  %142 = vst.msk [vmem:[%s333_s1 + $0x6] ss:$16 sm:$0xc] %vm8_vm0, %v53_v22  }
  0x88   :  { %v61_v23 = vpop.permute.xlu0 %60  }
  0x89   :  { %v69_v24 = vpop.permute.xlu1 %68   ;;  %143 = vst.msk [vmem:[%s333_s1 + $0x7] ss:$16 sm:$0x3] %vm8_vm0, %v61_v23   ;;  %144 = vst.msk [vmem:[%s333_s1 + $0x7] ss:$16 sm:$0xc] %vm8_vm0, %v61_v23  }
  0x8a   :  { %145 = vst.msk [vmem:[%s333_s1 + $0x8] ss:$16 sm:$0x3] %vm8_vm0, %v69_v24   ;;  %146 = vst.msk [vmem:[%s333_s1 + $0x8] ss:$16 sm:$0xc] %vm8_vm0, %v69_v24  }
  0x8c   :  { %v77_v25 = vpop.permute.xlu0 %76  }
  0x8d   :  { %v85_v26 = vpop.permute.xlu1 %84   ;;  %147 = vst.msk [vmem:[%s333_s1 + $0x9] ss:$16 sm:$0x3] %vm8_vm0, %v77_v25   ;;  %148 = vst.msk [vmem:[%s333_s1 + $0x9] ss:$16 sm:$0xc] %vm8_vm0, %v77_v25  }
  0x8e   :  { %149 = vst.msk [vmem:[%s333_s1 + $0xa] ss:$16 sm:$0x3] %vm8_vm0, %v85_v26   ;;  %150 = vst.msk [vmem:[%s333_s1 + $0xa] ss:$16 sm:$0xc] %vm8_vm0, %v85_v26  }
  0x90   :  { %v93_v27 = vpop.permute.xlu0 %92  }
  0x91   :  { %v101_v28 = vpop.permute.xlu1 %100   ;;  %151 = vst.msk [vmem:[%s333_s1 + $0xb] ss:$16 sm:$0x3] %vm8_vm0, %v93_v27   ;;  %152 = vst.msk [vmem:[%s333_s1 + $0xb] ss:$16 sm:$0xc] %vm8_vm0, %v93_v27  }
  0x92   :  { %153 = vst.msk [vmem:[%s333_s1 + $0xc] ss:$16 sm:$0x3] %vm8_vm0, %v101_v28   ;;  %154 = vst.msk [vmem:[%s333_s1 + $0xc] ss:$16 sm:$0xc] %vm8_vm0, %v101_v28  }
  0x94   :  { %v109_v29 = vpop.permute.xlu0 %108  }
  0x95   :  { %v117_v30 = vpop.permute.xlu1 %116   ;;  %155 = vst.msk [vmem:[%s333_s1 + $0xd] ss:$16 sm:$0x3] %vm8_vm0, %v109_v29   ;;  %156 = vst.msk [vmem:[%s333_s1 + $0xd] ss:$16 sm:$0xc] %vm8_vm0, %v109_v29  }
  0x96   :  { %157 = vst.msk [vmem:[%s333_s1 + $0xe] ss:$16 sm:$0x3] %vm8_vm0, %v117_v30   ;;  %158 = vst.msk [vmem:[%s333_s1 + $0xe] ss:$16 sm:$0xc] %vm8_vm0, %v117_v30  }
  0x98   :  { %v125_v31 = vpop.permute.xlu0 %124  }
  0x99   :  { %159 = vst.msk [vmem:[%s333_s1 + $0xf] ss:$16 sm:$0x3] %vm8_vm0, %v125_v31   ;;  %160 = vst.msk [vmem:[%s333_s1 + $0xf] ss:$16 sm:$0xc] %vm8_vm0, %v125_v31  }

// kernel: net_forward.13
= control target key start
LH: loop header
LB: loop body
LE: loop exit
PB: predicated region body
PF: predicated region fallthrough
CT: control target
= control target key end

     0   :  { %v610_v1 = vmov 0   ;;  %vm286_vm0 = vcmask 261120   ;;  %s813_s1 = inlined_call_operand.vmem [shape: bf16[288,32], index: 1, kind: input, shape index: {}]   ;;  %s814_s0 = inlined_call_operand.vmem [shape: bf16[64,288], index: 0, kind: input, shape index: {}]   ;;  %s815_s2 = inlined_call_operand.vmem [shape: f32[64,1], index: 2, kind: input, shape index: {}]   ;;  %s816_s3 = inlined_call_operand.vmem [shape: f32[64,32], index: 3, kind: input, shape index: {}]   ;;  %s817_s4 = inlined_call_operand.vmem [shape: f32[64,32], index: 4, kind: output, shape index: {}]  }
   0x1   :  { %v576_v0 = vld [vmem:[%s813_s1 + $0x78] sm:$0xff]   ;;  %574 = vset.pattern.permute.xlu0 %v610_v1  ;;  %575 = vset.pattern.permute.xlu1 %v610_v1  ;;  %v578_v3 = vld [vmem:[%s813_s1 + $0x70] sm:$0xff]   ;;  %v580_v5 = vld [vmem:[%s813_s1 + $0x68] sm:$0xff]  }
   0x2   :  { %v577_v2 = vld [vmem:[%s813_s1 + $0x38] sm:$0xff]   ;;  %499 = vmatprep.subr.bf16.mxu0 %v576_v0  ;;  %557 = vmatprep.subr.bf16.mxu1 %v576_v0  ;;  %v579_v4 = vld [vmem:[%s813_s1 + $0x30] sm:$0xff]   ;;  %v581_v6 = vld [vmem:[%s813_s1 + $0x28] sm:$0xff]  }
   0x3   :  { %500 = vmatpush3.bf16.msra.mxu0 %v577_v2  ;;  %565 = vmatpush3.bf16.msra.mxu1 %v577_v2  ;;  %v582_v7 = vld [vmem:[%s813_s1 + $0x60] sm:$0xff]   ;;  %v584_v9 = vld [vmem:[%s813_s1 + $0x58] sm:$0xff]   ;;  %v586_v11 = vld [vmem:[%s813_s1 + $0x50] sm:$0xff]  }
   0x4   :  { %501 = vmatprep.subr.bf16.mxu0 %v578_v3  ;;  %558 = vmatprep.subr.bf16.mxu1 %v578_v3  ;;  %v583_v8 = vld [vmem:[%s813_s1 + $0x20] sm:$0xff]   ;;  %v585_v10 = vld [vmem:[%s813_s1 + $0x18] sm:$0xff]   ;;  %v587_v14 = vld [vmem:[%s813_s1 + $0x10] sm:$0xff]  }
   0x5   :  { %v594_v12 = vld [vmem:[%s814_s0 + $0x4] ss:$12 sps:$4 sm:$0xff]   ;;  %v597_v13 = vld [vmem:[%s814_s0 + $0x4c] ss:$12 sps:$4 sm:$0xff]   ;;  %v595_v23 = vld [vmem:[%s814_s0 + $0x48] ss:$12 sps:$4 sm:$0xff]  }
   0x6   :  { %v588_v15 = vld [vmem:[%s813_s1 + $0x48] sm:$0xff]   ;;  %331 = vmatprep.mubr.bf16.mxu0 %v594_v12  ;;  %355 = vmatprep.mubr.bf16.mxu1 %v597_v13  ;;  %v590_v17 = vld [vmem:[%s813_s1 + $0x40] sm:$0xff]   ;;  %v72_v20 = vld [vmem:[%s815_s2 + $0x10] sm:$0xff] }
   0x7   :  { %502 = vmatpush3.bf16.msra.mxu0 %v579_v4  ;;  %566 = vmatpush3.bf16.msra.mxu1 %v579_v4  ;;  %v589_v16 = vld [vmem:[%s813_s1 + $0x8] sm:$0xff]   ;;  %v591_v18 = vld [vmem:[%s813_s1] sm:$0xff]   ;;  %v73_v25 = vld [vmem:[%s815_s2 + $0x18] sm:$0xff] }
   0x8   :  { %503 = vmatprep.subr.bf16.mxu0 %v580_v5  ;;  %559 = vmatprep.subr.bf16.mxu1 %v580_v5  ;;  %v70_v19 = vld [vmem:[%s815_s2] sm:$0xff]  ;;  %v598_v21 = vld [vmem:[%s813_s1 + $0x88] sm:$0xff]   ;;  %v76_v33 = vld [vmem:[%s815_s2 + $0x30] sm:$0xff] }
   0x9   :  { %v592_v22 = vld [vmem:[%s814_s0] ss:$12 sps:$4 sm:$0xff]   ;;  %80 = vperm.xlu0 %574, %v70_v19   ;;  %90 = vperm.xlu1 %575, %v72_v20   ;;  %v600_v26 = vld [vmem:[%s814_s0 + $0x1c] ss:$12 sps:$4 sm:$0xff]   ;;  %v603_v31 = vld [vmem:[%s814_s0 + $0x18] ss:$12 sps:$4 sm:$0xff]  }
   0xa   :  { %v71_v24 = vld [vmem:[%s815_s2 + $0x8] sm:$0xff]  ;;  %v599_v27 = vld [vmem:[%s813_s1 + $0x80] sm:$0xff]   ;;  %v77_v34 = vld [vmem:[%s815_s2 + $0x38] sm:$0xff] }
   0xb   :  { %504 = vmatpush3.bf16.msra.mxu0 %v581_v6  ;;  %567 = vmatpush3.bf16.msra.mxu1 %v581_v6  ;;  %v602_v28 = vld [vmem:[%s814_s0 + $0x8] ss:$12 sps:$4 sm:$0xff]   ;;  %v74_v29 = vld [vmem:[%s815_s2 + $0x20] sm:$0xff]  ;;  %v608_v37 = vld [vmem:[%s814_s0 + $0x30] ss:$12 sps:$4 sm:$0xff]  }
   0xc   :  { %505 = vmatprep.subr.bf16.mxu0 %v582_v7  ;;  %560 = vmatprep.subr.bf16.mxu1 %v582_v7  ;;  %v75_v30 = vld [vmem:[%s815_s2 + $0x28] sm:$0xff]  ;;  %v605_v35 = vld [vmem:[%s814_s0 + $0x34] ss:$12 sps:$4 sm:$0xff]   ;;  %v607_v36 = vld [vmem:[%s814_s0 + $0x38] ss:$12 sps:$4 sm:$0xff]  }
   0xd   :  { %85 = vperm.xlu0 %574, %v71_v24   ;;  %95 = vperm.xlu1 %575, %v73_v25   ;;  %v604_v32 = vld [vmem:[%s814_s0 + $0x20] ss:$12 sps:$4 sm:$0xff]   ;;  %v609_v38 = vld [vmem:[%s814_s0 + $0x50] ss:$12 sps:$4 sm:$0xff]  }
   0xe   :  { %v437_v0 = vld [vmem:[%s816_s3] sm:$0xff]  ;;  %v443_v24 = vld [vmem:[%s816_s3 + $0x30] sm:$0xff] }
   0xf   :  { %506 = vmatpush3.bf16.msra.mxu0 %v583_v8  ;;  %568 = vmatpush3.bf16.msra.mxu1 %v583_v8 }
  0x10   :  { %507 = vmatprep.subr.bf16.mxu0 %v584_v9  ;;  %561 = vmatprep.subr.bf16.mxu1 %v584_v9 }
  0x11   :  { %100 = vperm.xlu0 %574, %v74_v29   ;;  %105 = vperm.xlu1 %575, %v75_v30  }
  0x13   :  { %508 = vmatpush3.bf16.msra.mxu0 %v585_v10  ;;  %569 = vmatpush3.bf16.msra.mxu1 %v585_v10 }
  0x14   :  { %509 = vmatprep.subr.bf16.mxu0 %v586_v11  ;;  %562 = vmatprep.subr.bf16.mxu1 %v586_v11 }
  0x15   :  { %110 = vperm.xlu0 %574, %v76_v33   ;;  %115 = vperm.xlu1 %575, %v77_v34  }
  0x17   :  { %510 = vmatpush3.bf16.msra.mxu0 %v587_v14  ;;  %570 = vmatpush3.bf16.msra.mxu1 %v587_v14 }
  0x18   :  { %511 = vmatprep.subr.bf16.mxu0 %v588_v15  ;;  %563 = vmatprep.subr.bf16.mxu1 %v588_v15  ;;  %v439_v15 = vld [vmem:[%s816_s3 + $0x10] sm:$0xff] }
  0x1b   :  { %512 = vmatpush3.bf16.msra.mxu0 %v589_v16  ;;  %571 = vmatpush3.bf16.msra.mxu1 %v589_v16  ;;  %v438_v16 = vld [vmem:[%s816_s3 + $0x8] sm:$0xff] }
  0x1c   :  { %513 = vmatprep.subr.bf16.mxu0 %v590_v17  ;;  %564 = vmatprep.subr.bf16.mxu1 %v590_v17 }
  0x1f   :  { %514 = vmatpush3.bf16.msra.mxu0 %v591_v18  ;;  %572 = vmatpush3.bf16.msra.mxu1 %v591_v18 }
  0x20   :  { %545 = vmatprep.subr.bf16.mxu1 %v598_v21 }
  0x22   :  { %332 = vmatmul.mubr.bf16.vlgmr.msra.gmra.mxu0 %v592_v22  ;;  %356 = vmatmul.mubr.bf16.vlgmr.msra.gmra.mxu1 %v595_v23 }
  0x23   :  { %546 = vmatpush3.bf16.msra.mxu1 %v598_v21  ;;  %339 = vmatprep.mubr.bf16.mxu0 %v600_v26 }
  0x24   :  { %547 = vmatprep.subr.bf16.mxu1 %v599_v27  ;;  %549 = vmatprep.mubr.msk.bf16.mxu1 %vm286_vm0, %v602_v28 }
  0x27   :  { %548 = vmatpush3.bf16.msra.mxu1 %v599_v27 }
  0x2a   :  { %340 = vmatmul.mubr.bf16.gmra.mxu0 %v603_v31  ;;  %550 = vmatmul.mubr.msk.bf16.vlgmr.msra.gmra.mxu1 %vm286_vm0, %v604_v32  ;;  %v440_v31 = vld [vmem:[%s816_s3 + $0x18] sm:$0xff] }
  0x2b   :  { %347 = vmatprep.mubr.bf16.mxu0 %v605_v35  ;;  %553 = vmatprep.mubr.msk.bf16.mxu1 %vm286_vm0, %v607_v36 }
  0x32   :  { %348 = vmatmul.mubr.bf16.gmra.mxu0 %v608_v37  ;;  %554 = vmatmul.mubr.msk.bf16.gmra.mxu1 %vm286_vm0, %v609_v38 }
  0x84   :  { %v81_v39 = vpop.permute.xlu0 %80  ;;  %v91_v40 = vpop.permute.xlu1 %90 }
  0x88   :  { %v86_v41 = vpop.permute.xlu0 %85  ;;  %v96_v46 = vpop.permute.xlu1 %95 }
  0x8c   :  { %v101_v49 = vpop.permute.xlu0 %100  ;;  %v754_v55 = vpop.permute.xlu1 %105 }
  0x90   :  { %v111_v61 = vpop.permute.xlu0 %110  ;;  %v116_v10 = vpop.permute.xlu1 %115 }
  0xe2   :  { %v515_v42 = vpop.f32.mrf.mxu0  ;;  %v533_v43 = vpop.f32.mrf.mxu1 }
  0xe4   :  { %v516_v44 = vpop.f32.mrf.mxu0  ;;  %v534_v45 = vpop.f32.mrf.mxu1 }
  0xe5   :  { %v517_v50 = vadd.f32 %v516_v44, %v515_v42  ;;  %v535_v58 = vadd.f32 %v534_v45, %v533_v43  ;;  %v441_v45 = vld [vmem:[%s816_s3 + $0x20] sm:$0xff] }
  0xe6   :  { %v518_v47 = vpop.f32.mrf.mxu0  ;;  %v536_v48 = vpop.f32.mrf.mxu1 }
  0xe7   :  { %v334_v57 = vadd.f32 %v517_v50, %v81_v39  ;;  %v358_v6 = vadd.f32 %v535_v58, %v111_v61  ;;  %v444_v39 = vld [vmem:[%s816_s3 + $0x38] sm:$0xff] }
  0xe8   :  { %v519_v51 = vpop.f32.mrf.mxu0  ;;  %v537_v52 = vpop.f32.mrf.mxu1 }
  0xe9   :  { %v520_v56 = vadd.f32 %v519_v51, %v518_v47  ;;  %v538_v7 = vadd.f32 %v537_v52, %v536_v48  ;;  %v442_v52 = vld [vmem:[%s816_s3 + $0x28] sm:$0xff] }
  0xea   :  { %v521_v53 = vpop.f32.mrf.mxu0  ;;  %v551_v54 = vpop.f32.mrf.mxu1 }
  0xeb   :  { %v337_v5 = vadd.f32 %v520_v56, %v86_v41  ;;  %v361_v23 = vadd.f32 %v538_v7, %v116_v10 }
  0xec   :  { %v522_v59 = vpop.f32.mrf.mxu0  ;;  %v398_v60 = vpop.f32.mrf.mxu1 }
  0xed   :  { %v523_v62 = vadd.f32 %v522_v59, %v521_v53  ;;  %v399_v63 = vadd.f32 %v398_v60, %v334_v57 }
  0xee   :  { %v524_v1 = vpop.f32.mrf.mxu0  ;;  %v552_v2 = vpop.f32.mrf.mxu1 }
  0xef   :  { %v342_v3 = vadd.f32 %v523_v62, %v91_v40  ;;  %v429_v4 = vmax.f32 %v399_v63, 0.0 }
  0xf0   :  { %v525_v8 = vpop.f32.mrf.mxu0  ;;  %v401_v9 = vpop.f32.mrf.mxu1 }
  0xf1   :  { %v407_v11 = vadd.f32 %v551_v54, %v342_v3  ;;  %v445_v12 = vadd.f32 %v437_v0, %v429_v4  ;;  %v526_v13 = vadd.f32 %v525_v8, %v524_v1  ;;  %v402_v14 = vadd.f32 %v401_v9, %v337_v5 }
  0xf2   :  { %v527_v17 = vpop.f32.mrf.mxu0  ;;  %v555_v18 = vpop.f32.mrf.mxu1 }
  0xf3   :  { %v431_v19 = vmax.f32 %v407_v11, 0.0  ;;  %453 = vst.msk [vmem:[%s817_s4] sm:$0xff] %vm286_vm0, %v445_v12  ;;  %v345_v20 = vadd.f32 %v526_v13, %v96_v46  ;;  %v430_v21 = vmax.f32 %v402_v14, 0.0  ;;  %v423_v22 = vadd.f32 %v555_v18, %v358_v6 }
  0xf4   :  { %v528_v25 = vpop.f32.mrf.mxu0  ;;  %v414_v26 = vpop.f32.mrf.mxu1 }
  0xf5   :  { %v447_v27 = vadd.f32 %v439_v15, %v431_v19  ;;  %v410_v28 = vadd.f32 %v552_v2, %v345_v20  ;;  %v446_v29 = vadd.f32 %v438_v16, %v430_v21  ;;  %v435_v30 = vmax.f32 %v423_v22, 0.0 }
  0xf6   :  { %v529_v32 = vadd.f32 %v528_v25, %v527_v17  ;;  %v530_v33 = vpop.f32.mrf.mxu0  ;;  %v556_v34 = vpop.f32.mrf.mxu1 }
  0xf7   :  { %455 = vst.msk [vmem:[%s817_s4 + $0x10] sm:$0xff] %vm286_vm0, %v447_v27  ;;  %v432_v35 = vmax.f32 %v410_v28, 0.0  ;;  %454 = vst.msk [vmem:[%s817_s4 + $0x8] sm:$0xff] %vm286_vm0, %v446_v29  ;;  %v451_v36 = vadd.f32 %v443_v24, %v435_v30  ;;  %v426_v37 = vadd.f32 %v556_v34, %v361_v23 }
  0xf8   :  { %v350_v38 = vadd.f32 %v529_v32, %v101_v49  ;;  %v531_v40 = vpop.f32.mrf.mxu0  ;;  %v417_v49 = vpop.f32.mrf.mxu1 }
  0xf9   :  { %v448_v41 = vadd.f32 %v440_v31, %v432_v35  ;;  %459 = vst.msk [vmem:[%s817_s4 + $0x30] sm:$0xff] %vm286_vm0, %v451_v36  ;;  %v436_v42 = vmax.f32 %v426_v37, 0.0  ;;  %v532_v43 = vadd.f32 %v531_v40, %v530_v33 }
  0xfa   :  { %v415_v44 = vadd.f32 %v414_v26, %v350_v38 }
  0xfb   :  { %456 = vst.msk [vmem:[%s817_s4 + $0x18] sm:$0xff] %vm286_vm0, %v448_v41  ;;  %v452_v46 = vadd.f32 %v444_v39, %v436_v42  ;;  %v353_v47 = vadd.f32 %v532_v43, %v754_v55 }
  0xfc   :  { %v433_v48 = vmax.f32 %v415_v44, 0.0 }
  0xfd   :  { %460 = vst.msk [vmem:[%s817_s4 + $0x38] sm:$0xff] %vm286_vm0, %v452_v46  ;;  %v418_v50 = vadd.f32 %v417_v49, %v353_v47 }
  0xfe   :  { %v449_v51 = vadd.f32 %v441_v45, %v433_v48 }
  0xff   :  { %v434_v53 = vmax.f32 %v418_v50, 0.0 }
 0x100   :  { %457 = vst.msk [vmem:[%s817_s4 + $0x20] sm:$0xff] %vm286_vm0, %v449_v51 }
 0x101   :  { %v450_v54 = vadd.f32 %v442_v52, %v434_v53 }
 0x103   :  { %458 = vst.msk [vmem:[%s817_s4 + $0x28] sm:$0xff] %vm286_vm0, %v450_v54 }

// kernel: tile.26
= control target key start
LH: loop header
LB: loop body
LE: loop exit
PB: predicated region body
PF: predicated region fallthrough
CT: control target
= control target key end

     0   :  { %s22_s0 = inlined_call_operand.vmem [shape: f32[8], index: 0, kind: input, shape index: {}]   ;;  %s23_s1 = inlined_call_operand.vmem [shape: f32[4,1,1,8], index: 1, kind: output, shape index: {}]  }
   0x1   :  { %v4_v0 = vld [vmem:[%s22_s0] ss:$0 sm:$0xff] }
   0x2   :  { %5 = vst [vmem:[%s23_s1] sm:$0xf] %v4_v0 }

// kernel: tile.2
= control target key start
LH: loop header
LB: loop body
LE: loop exit
PB: predicated region body
PF: predicated region fallthrough
CT: control target
= control target key end

     0   :  { %s67_s8 = smov 125   ;;  %vm8_vm0 = vcmask 7168   ;;  %s68_s11 = smov 126   ;;  %s118_s0 = inlined_call_operand.vmem [shape: f32[4,1,1,8], index: 0, kind: input, shape index: {}]   ;;  %s119_s1 = inlined_call_operand.vmem [shape: f32[32,1], index: 1, kind: output, shape index: {}]  }
   0x1   :  { %v5_v0 = vld [vmem:[%s118_s0] sm:$0xf]  ;;  %s66_s0 = smov 127   ;;  %s69_s12 = smov 124  }
   0x2   :  { %6 = vst [vmem:[#allocation0] sm:$0xf] %v5_v0  ;;  %s70_s13 = smov 123   ;;  %s71_s14 = smov 122  }
   0x3   :  { %s72_s15 = smov 121  }
   0x9   :  { %v10_v1 = vld [vmem:[#allocation0] sm:$0xf]  }
   0xa   :  { %v22_v2 = vld [vmem:[#allocation0] sm:$0xf]   ;;  %11 = vrot.lane.b32.xlu0 %v10_v1, %s66_s0 }
   0xb   :  { %23 = vrot.lane.b32.xlu1 %v22_v2, %s67_s8  ;;  %v16_v3 = vld [vmem:[#allocation0] sm:$0xf]  }
   0xc   :  { %v28_v4 = vld [vmem:[#allocation0] sm:$0xf]  }
   0xd   :  { %v7_v5 = vld [vmem:[#allocation0] sm:$0xf]  }
   0xe   :  { %9 = vst.msk [vmem:[%s119_s1] ss:$8 sm:$0xf] %vm8_vm0, %v7_v5   ;;  %17 = vrot.lane.b32.xlu0 %v16_v3, %s68_s11  ;;  %v34_v6 = vld [vmem:[#allocation0] sm:$0xf]  }
   0xf   :  { %29 = vrot.lane.b32.xlu1 %v28_v4, %s69_s12  ;;  %v40_v7 = vld [vmem:[#allocation0] sm:$0xf]  }
  0x10   :  { %v46_v8 = vld [vmem:[#allocation0] sm:$0xf]  }
  0x12   :  { %35 = vrot.lane.b32.xlu0 %v34_v6, %s70_s13 }
  0x13   :  { %41 = vrot.lane.b32.xlu1 %v40_v7, %s71_s14 }
  0x16   :  { %47 = vrot.lane.b32.xlu0 %v46_v8, %s72_s15 }
  0x7c   :  { %v12_v9 = vpop.permute.xlu0 %11  }
  0x7d   :  { %v24_v10 = vpop.permute.xlu1 %23   ;;  %52 = vst.msk [vmem:[%s119_s1 + $0x1] ss:$8 sm:$0xf] %vm8_vm0, %v12_v9  }
  0x7e   :  { %54 = vst.msk [vmem:[%s119_s1 + $0x3] ss:$8 sm:$0xf] %vm8_vm0, %v24_v10  }
  0x80   :  { %v18_v11 = vpop.permute.xlu0 %17  }
  0x81   :  { %v30_v12 = vpop.permute.xlu1 %29   ;;  %53 = vst.msk [vmem:[%s119_s1 + $0x2] ss:$8 sm:$0xf] %vm8_vm0, %v18_v11  }
  0x82   :  { %55 = vst.msk [vmem:[%s119_s1 + $0x4] ss:$8 sm:$0xf] %vm8_vm0, %v30_v12  }
  0x84   :  { %v36_v13 = vpop.permute.xlu0 %35  }
  0x85   :  { %v42_v14 = vpop.permute.xlu1 %41   ;;  %56 = vst.msk [vmem:[%s119_s1 + $0x5] ss:$8 sm:$0xf] %vm8_vm0, %v36_v13  }
  0x86   :  { %57 = vst.msk [vmem:[%s119_s1 + $0x6] ss:$8 sm:$0xf] %vm8_vm0, %v42_v14  }
  0x88   :  { %v48_v15 = vpop.permute.xlu0 %47  }
  0x89   :  { %58 = vst.msk [vmem:[%s119_s1 + $0x7] ss:$8 sm:$0xf] %vm8_vm0, %v48_v15  }

// kernel: net_forward.14
= control target key start
LH: loop header
LB: loop body
LE: loop exit
PB: predicated region body
PF: predicated region fallthrough
CT: control target
= control target key end

     0   :  { %v263_v0 = vmov 0   ;;  %vm136_vm0 = vcmask 130048   ;;  %s364_s1 = inlined_call_operand.vmem [shape: bf16[144,128], index: 1, kind: input, shape index: {}]   ;;  %s365_s0 = inlined_call_operand.vmem [shape: bf16[32,144], index: 0, kind: input, shape index: {}]   ;;  %s366_s2 = inlined_call_operand.vmem [shape: f32[32,1], index: 2, kind: input, shape index: {}]   ;;  %s367_s3 = inlined_call_operand.vmem [shape: f32[32,128], index: 3, kind: input, shape index: {}]   ;;  %s368_s4 = inlined_call_operand.vmem [shape: f32[32,128], index: 4, kind: output, shape index: {}]  }
   0x1   :  { %143 = vmatprep.subr.bf16.mxu0 %v263_v0  ;;  %227 = vmatprep.subr.bf16.mxu1 %v263_v0  ;;  %v248_v1 = vld [vmem:[%s364_s1 + $0x38] sm:$0xff]   ;;  %v249_v2 = vld [vmem:[%s364_s1 + $0x30] sm:$0xff]   ;;  %v250_v3 = vld [vmem:[%s364_s1 + $0x28] sm:$0xff]  }
   0x2   :  { %247 = vset.pattern.permute.xlu1 %v263_v0  ;;  %246 = vset.pattern.permute.xlu0 %v263_v0  ;;  %v251_v4 = vld [vmem:[%s364_s1 + $0x20] sm:$0xff]   ;;  %v262_v6 = vld [vmem:[%s365_s0 + $0x14] ss:$8 sps:$4 sm:$0xff]   ;;  %v41_v11 = vld [vmem:[%s366_s2 + $0x8] sm:$0xff] }
   0x3   :  { %144 = vmatpush1.bf16.msra.mxu0 %v248_v1  ;;  %236 = vmatpush1.bf16.msra.mxu1 %v248_v1  ;;  %v259_v5 = vld [vmem:[%s365_s0 + $0x4] ss:$8 sps:$4 sm:$0xff]   ;;  %v42_v7 = vld [vmem:[%s366_s2 + $0x10] sm:$0xff]  ;;  %v43_v9 = vld [vmem:[%s366_s2 + $0x18] sm:$0xff] }
   0x4   :  { %145 = vmatprep.subr.bf16.mxu0 %v263_v0  ;;  %228 = vmatprep.subr.bf16.mxu1 %v263_v0  ;;  %v40_v8 = vld [vmem:[%s366_s2] sm:$0xff]  ;;  %v252_v10 = vld [vmem:[%s364_s1 + $0x18] sm:$0xff]   ;;  %v253_v12 = vld [vmem:[%s364_s1 + $0x10] sm:$0xff]  }
   0x5   :  { %225 = vmatprep.mubr.msk.bf16.mxu0 %vm136_vm0, %v259_v5  ;;  %56 = vperm.xlu1 %247, %v42_v7   ;;  %v254_v13 = vld [vmem:[%s364_s1 + $0x8] sm:$0xff]   ;;  %v255_v14 = vld [vmem:[%s364_s1] sm:$0xff]   ;;  %v260_v17 = vld [vmem:[%s365_s0 + $0x10] ss:$8 sps:$4 sm:$0xff]  }
   0x6   :  { %226 = vmatprep.mubr.msk.bf16.mxu1 %vm136_vm0, %v262_v6  ;;  %46 = vperm.xlu0 %246, %v40_v8   ;;  %v256_v15 = vld [vmem:[%s364_s1 + $0x40] sm:$0xff]   ;;  %v198_v25 = vld [vmem:[%s367_s3 + $0x10] sm:$0xff]  ;;  %v197_v38 = vld [vmem:[%s367_s3 + $0x8] sm:$0xff] }
   0x7   :  { %146 = vmatpush1.bf16.msra.mxu0 %v249_v2  ;;  %237 = vmatpush1.bf16.msra.mxu1 %v249_v2  ;;  %v257_v16 = vld [vmem:[%s365_s0] ss:$8 sps:$4 sm:$0xff]   ;;  %v199_v39 = vld [vmem:[%s367_s3 + $0x18] sm:$0xff] }
   0x8   :  { %147 = vmatprep.subr.bf16.mxu0 %v263_v0  ;;  %229 = vmatprep.subr.bf16.mxu1 %v263_v0  ;;  %v196_v24 = vld [vmem:[%s367_s3] sm:$0xff] }
   0x9   :  { %61 = vperm.xlu1 %247, %v43_v9  }
   0xa   :  { %51 = vperm.xlu0 %246, %v41_v11  }
   0xb   :  { %148 = vmatpush1.bf16.msra.mxu0 %v250_v3  ;;  %238 = vmatpush1.bf16.msra.mxu1 %v250_v3 }
   0xc   :  { %149 = vmatprep.subr.bf16.mxu0 %v263_v0  ;;  %230 = vmatprep.subr.bf16.mxu1 %v263_v0 }
   0xf   :  { %150 = vmatpush1.bf16.msra.mxu0 %v251_v4  ;;  %239 = vmatpush1.bf16.msra.mxu1 %v251_v4 }
  0x10   :  { %151 = vmatprep.subr.bf16.mxu0 %v263_v0  ;;  %231 = vmatprep.subr.bf16.mxu1 %v263_v0 }
  0x13   :  { %152 = vmatpush1.bf16.msra.mxu0 %v252_v10  ;;  %240 = vmatpush1.bf16.msra.mxu1 %v252_v10 }
  0x14   :  { %153 = vmatprep.subr.bf16.mxu0 %v263_v0  ;;  %232 = vmatprep.subr.bf16.mxu1 %v263_v0 }
  0x17   :  { %154 = vmatpush1.bf16.msra.mxu0 %v253_v12  ;;  %241 = vmatpush1.bf16.msra.mxu1 %v253_v12 }
  0x18   :  { %155 = vmatprep.subr.bf16.mxu0 %v263_v0  ;;  %233 = vmatprep.subr.bf16.mxu1 %v263_v0 }
  0x1b   :  { %156 = vmatpush1.bf16.msra.mxu0 %v254_v13  ;;  %242 = vmatpush1.bf16.msra.mxu1 %v254_v13 }
  0x1c   :  { %157 = vmatprep.subr.bf16.mxu0 %v263_v0  ;;  %234 = vmatprep.subr.bf16.mxu1 %v263_v0 }
  0x1f   :  { %158 = vmatpush1.bf16.msra.mxu0 %v255_v14  ;;  %243 = vmatpush1.bf16.msra.mxu1 %v255_v14 }
  0x20   :  { %173 = vmatprep.subr.bf16.mxu0 %v263_v0  ;;  %235 = vmatprep.subr.bf16.mxu1 %v263_v0 }
  0x23   :  { %174 = vmatpush2.bf16.msra.mxu0 %v256_v15  ;;  %244 = vmatpush2.bf16.msra.mxu1 %v256_v15 }
  0x26   :  { %176 = vmatmul.mubr.bf16.vlgmr.msra.gmra.mxu0 %v257_v16  ;;  %184 = vmatmul.mubr.bf16.vlgmr.msra.gmra.mxu1 %v260_v17 }
  0x80   :  { %v57_v18 = vpop.permute.xlu1 %56 }
  0x81   :  { %v47_v19 = vpop.permute.xlu0 %46 }
  0x84   :  { %v62_v28 = vpop.permute.xlu1 %61 }
  0x85   :  { %v52_v29 = vpop.permute.xlu0 %51 }
  0xe6   :  { %v177_v20 = vpop.f32.mrf.mxu0  ;;  %v185_v21 = vpop.f32.mrf.mxu1 }
  0xe7   :  { %v178_v22 = vadd.f32 %v177_v20, %v47_v19  ;;  %v186_v23 = vadd.f32 %v185_v21, %v57_v18 }
  0xe8   :  { %v179_v26 = vpop.f32.mrf.mxu0  ;;  %v187_v27 = vpop.f32.mrf.mxu1 }
  0xe9   :  { %v192_v30 = vmax.f32 %v178_v22, 0.0  ;;  %v194_v31 = vmax.f32 %v186_v23, 0.0 }
  0xea   :  { %v180_v32 = vpop.f32.mrf.mxu0  ;;  %v188_v33 = vpop.f32.mrf.mxu1 }
  0xeb   :  { %v200_v34 = vadd.f32 %v196_v24, %v192_v30  ;;  %v202_v35 = vadd.f32 %v198_v25, %v194_v31  ;;  %v181_v36 = vadd.f32 %v180_v32, %v52_v29  ;;  %v189_v37 = vadd.f32 %v188_v33, %v62_v28 }
  0xec   :  { %v182_v40 = vpop.f32.mrf.mxu0  ;;  %v190_v41 = vpop.f32.mrf.mxu1 }
  0xed   :  { %204 = vst [vmem:[%s368_s4] sm:$0xff] %v200_v34  ;;  %206 = vst [vmem:[%s368_s4 + $0x10] sm:$0xff] %v202_v35  ;;  %v193_v42 = vmax.f32 %v181_v36, 0.0  ;;  %v195_v43 = vmax.f32 %v189_v37, 0.0 }
  0xef   :  { %v201_v44 = vadd.f32 %v197_v38, %v193_v42  ;;  %v203_v45 = vadd.f32 %v199_v39, %v195_v43 }
  0xf1   :  { %205 = vst [vmem:[%s368_s4 + $0x8] sm:$0xff] %v201_v44  ;;  %207 = vst [vmem:[%s368_s4 + $0x18] sm:$0xff] %v203_v45 }

// kernel: net_forward.15
= control target key start
LH: loop header
LB: loop body
LE: loop exit
PB: predicated region body
PF: predicated region fallthrough
CT: control target
= control target key end

     0   :  { %s555_s12 = smov 0   ;;  %s557_s13 = smov 0   ;;  %s613_s0 = inlined_call_operand.vmem [shape: bf16[4,72], index: 0, kind: input, shape index: {}]   ;;  %s614_s1 = inlined_call_operand.vmem [shape: bf16[72,512], index: 1, kind: input, shape index: {}]   ;;  %s615_s2 = inlined_call_operand.vmem [shape: f32[4,1], index: 2, kind: input, shape index: {}]   ;;  %s616_s3 = inlined_call_operand.vmem [shape: f32[4,512], index: 3, kind: output, shape index: {}]  }
   0x1   :  { %s559_s14 = smov 0  }
   0x2 LB: > { %s434_s15 = sadd.s32 4294967295, %s532_s14   ;;  %s572_s16 = sadd.s32 1, %s532_s14   ;;  %s532_s14 = sphi %s559_s14, %s619_s14   ;;  %s528_s13 = sphi %s557_s13, %s618_s13   ;;  %s524_s12 = sphi %s555_s12, %s617_s12  }
   0x3   : > { %s38_s17 = ssub.s32 %s532_s14, %s572_s16  ;;  %s41_s18 = sadd.s32 1, %s528_s13 }
   0x4   : > { %p39_p0 = scmp.eq.s32.totalorder %s38_s17, 0  ;;  %p48_p1 = scmp.ne.s32.totalorder %s528_s13, %s524_s12 }
   0x5   : > { %p49_p2 = scmp.eq.s32.totalorder %s532_s14, 0  ;;  %p437_p4 = scmp.ge.s32.totalorder %s532_s14, 2 }
   0x6   : > { %s581_s19 = scalar_select %p39_p0, %s528_s13, %s41_s18  }
   0x7   : > { %p50_p3 = por %p49_p2, %p48_p1  ;;  %127 = sbr.rel (%p437_p4) target bundleno = 21 (0x15), region = 24 }
   0xc   : > { %130 = sbr.rel (!%p50_p3) target bundleno = 21 (0x15), region = 28  ;;  %s132_s20 = sand.u32 (%p50_p3), 1, %s528_s13  }
   0xd   : > { %s459_s21 = sshll.u32 (%p50_p3), %s532_s14, 3  ;;  %s460_s22 = smul.u32 (%p50_p3), 72, %s132_s20 }
   0xe   : > { %s137_s25 = scalar_lea.vmem (%p50_p3), %s614_s1, %s459_s21 }
   0xf   : > { %v182_v0 = vld [vmem:[%s137_s25] sm:$0xff] (%p50_p3)  ;;  %v184_v1 = vld [vmem:[%s137_s25 + $0x10] sm:$0xff] (%p50_p3)  ;;  %s134_s26 = scalar_lea.vmem (%p50_p3), [#allocation2], %s460_s22 }
  0x10   : > { %v186_v2 = vld [vmem:[%s137_s25 + $0x20] sm:$0xff] (%p50_p3)  ;;  %v188_v3 = vld [vmem:[%s137_s25 + $0x30] sm:$0xff] (%p50_p3)  ;;  %183 = vst [vmem:[%s134_s26] sm:$0xff] (%p50_p3), %v182_v0  ;;  %185 = vst [vmem:[%s134_s26 + $0x8] sm:$0xff] (%p50_p3), %v184_v1 }
  0x11   : > { %v190_v4 = vld [vmem:[%s137_s25 + $0x40] sm:$0xff]  ;;  %v192_v5 = vld [vmem:[%s137_s25 + $0x50] sm:$0xff]  ;;  %187 = vst [vmem:[%s134_s26 + $0x10] sm:$0xff] %v186_v2  ;;  %189 = vst [vmem:[%s134_s26 + $0x18] sm:$0xff] %v188_v3 }
  0x12   : > { %191 = vst [vmem:[%s134_s26 + $0x20] sm:$0xff] %v190_v4  ;;  %193 = vst [vmem:[%s134_s26 + $0x28] sm:$0xff] %v192_v5  ;;  %v194_v6 = vld [vmem:[%s137_s25 + $0x60] sm:$0xff]  ;;  %v196_v7 = vld [vmem:[%s137_s25 + $0x70] sm:$0xff] }
  0x13   : > { %v198_v8 = vld [vmem:[%s137_s25 + $0x80] sm:$0xff]  ;;  %195 = vst [vmem:[%s134_s26 + $0x30] sm:$0xff] %v194_v6  ;;  %197 = vst [vmem:[%s134_s26 + $0x38] sm:$0xff] %v196_v7 }
  0x14   : > { %199 = vst [vmem:[%s134_s26 + $0x40] sm:$0xff] %v198_v8 }
  0x15 PF: > { %p440_p5 = scmp.ge.s32.totalorder %s532_s14, 1  ;;  %p204_p6 = scmp.lt.s32.totalorder %s532_s14, 3 }
  0x17   : > { %p205_p7 = pnand %p440_p5, %p204_p6 }
  0x18   : > { %s211_s27 = sand.u32 (!%p205_p7), 1, %s524_s12   ;;  %s441_s7 = sshll.u32 (!%p205_p7), %s434_s15, 1 }
  0x19   : > { %208 = sbr.rel (%p205_p7) target bundleno = 286 (0x11e), region = 66  ;;  %p236_p8 = scmp.lt.s32.totalorder (!%p205_p7), %s441_s7, 3 }
  0x1a   : > { %s461_s28 = smul.u32 (!%p205_p7), 72, %s211_s27 }
  0x1c   : > { %s213_s4 = scalar_lea.vmem (!%p205_p7), [#allocation2], %s461_s28 }
  0x1e   : > { %v534_v9 = vmov 0   ;;  %v252_v10 = vld [vmem:[%s615_s2] sm:$0xf]  ;;  %vm307_vm0 = vcmask 1043456   ;;  %v490_v14 = vld [vmem:[%s213_s4 + $0x34] ss:$8 sps:$4 sm:$0xff]  }
  0x1f   : > { %346 = vmatprep.mubr.bf16.mxu0 %v534_v9  ;;  %487 = vset.pattern.permute.xlu0 %v534_v9  ;;  %v251_v11 = vld [vmem:[%s213_s4 + $0x40] sm:$0xff]  ;;  %v492_v16 = vld [vmem:[%s213_s4 + $0x30] ss:$8 sps:$4 sm:$0xff]   ;;  %v496_v19 = vld [vmem:[%s213_s4 + $0x14] ss:$8 sps:$4 sm:$0xff]   ;;  %vm303_vm1 = vcmask 588800  }
  0x20   : > { %255 = vperm.xlu0 %487, %v252_v10   ;;  %v452_v12 = vcombine.high %v251_v11, %v251_v11  ;;  %v451_v13 = vcombine.low %v251_v11, %v251_v11  ;;  %v493_v17 = vld [vmem:[%s213_s4 + $0x24] ss:$8 sps:$4 sm:$0xff]   ;;  %v495_v18 = vld [vmem:[%s213_s4 + $0x20] ss:$8 sps:$4 sm:$0xff]   ;;  %v498_v20 = vld [vmem:[%s213_s4 + $0x10] ss:$8 sps:$4 sm:$0xff]  }
  0x21   : > { %v499_v21 = vld [vmem:[%s213_s4 + $0x4] ss:$8 sps:$4 sm:$0xff]   ;;  %v501_v22 = vld [vmem:[%s213_s4] ss:$8 sps:$4 sm:$0xff]   ;;  %s621_s7 = smov (!%p236_p8, %s441_s7), 3 }
  0x22   : > { %453 = vmatprep.subr.msk.bf16.mxu0 %vm307_vm0, %v452_v12  ;;  %v309_v15 = vsel %vm307_vm0, %v451_v13, 0  ;;  %v242_v23 = vld [vmem:[%s613_s0] sm:$0x3]  ;;  %s442_s8 = sshll.u32 %s621_s7, 2 }
  0x23   : > { %321 = vmatpush1.bf16.msra.mxu0 %v309_v15  ;;  %s239_s11 = scalar_lea.vmem %s616_s3, %s442_s8 }
  0x24   : > { %322 = vmatprep.subr.bf16.mxu0 %v490_v14 }
  0x27   : > { %323 = vmatpush1.bf16.msra.mxu0 %v492_v16 }
  0x28   : > { %324 = vmatprep.subr.bf16.mxu0 %v493_v17 }
  0x2b   : > { %325 = vmatpush1.bf16.msra.mxu0 %v495_v18 }
  0x2c   : > { %326 = vmatprep.subr.bf16.mxu0 %v496_v19 }
  0x2f   : > { %327 = vmatpush1.bf16.msra.mxu0 %v498_v20 }
  0x30   : > { %328 = vmatprep.subr.bf16.mxu0 %v499_v21 }
  0x33   : > { %329 = vmatpush1.bf16.msra.mxu0 %v501_v22 }
  0x36   : > { %454 = vmatmul.mubr.msk.bf16.vlgmr.msra.gmra.mxu0 %vm303_vm1, %v242_v23 }
  0x9b   : > { %v256_v24 = vpop.permute.xlu0 %255 }
  0xf6   : > { %v348_v25 = vpop.f32.mrf.mxu0 }
  0xf7   : > { %v349_v26 = vadd.f32 %v348_v25, %v256_v24 }
  0xf8   : > { %v350_v27 = vpop.f32.mrf.mxu0 }
  0xf9   : > { %v455_v28 = vmul.f32 -1.442695, %v349_v26  ;;  %v351_v29 = vadd.f32 %v350_v27, %v256_v24 }
  0xfa   : > { %v352_v30 = vpop.f32.mrf.mxu0 }
  0xfb   : > { %502 = vpow2.f32 %v455_v28  ;;  %v456_v31 = vmul.f32 -1.442695, %v351_v29 }
  0xfc   : > { %v353_v32 = vpop.f32.mrf.mxu0 }
  0xfd   : > { %504 = vpow2.f32 %v456_v31 }
 0x108   : > { %v503_v33 = vpop.eup %502 }
 0x109   : > { %v361_v34 = vadd.f32 1.0, %v503_v33 }
 0x10a   : > { %v505_v35 = vpop.eup %504 }
 0x10b   : > { %v362_v36 = vadd.f32 1.0, %v505_v35  ;;  %506 = vrcp.f32 %v361_v34 }
 0x10d   : > { %508 = vrcp.f32 %v362_v36 }
 0x118   : > { %v507_v37 = vpop.eup %506 }
 0x11a   : > { %v509_v38 = vpop.eup %508 }
 0x11b   : > { %v369_v39 = vcombine.low %v507_v37, %v509_v38 }
 0x11d   : > { %371 = vst [vmem:[%s239_s11] sm:$0xff] %v369_v39 }
 0x11e PF: > { %p10_p9 = scmp.ge.s32.totalorder %s572_s16, 4   ;;  %s617_s12 = smov %s528_s13 }
 0x11f   : > { %s618_s13 = smov %s581_s19  ;;  %s619_s14 = smov %s572_s16 }
 0x120   :  { %12 = sbr.rel (!%p10_p9) target bundleno = 2 (0x2), region = 105 }

</bundles_post_ra>
